<compile_context>
chip_gen: v6e
topology: v6e:2x2x1
jax: 0.10.0
libtpu: 0.0.40
codegen_flags: <defaults>
</compile_context>

<pallas_src>
import functools

import jax
import jax.numpy as jnp
from jax.experimental import pallas as pl
from jax.experimental.pallas import tpu as pltpu


# ----------------------------- Pallas kernels ------------------------------ #

def _conv3x3_kernel(x_ref, w_ref, b_ref, o_ref, acc_ref, *, stride, th, wo):
    """Fused 3x3 conv + folded-BN bias + ReLU for one (batch, row-tile) grid cell.

    x_ref : (1, s*s, Hps, Wps, Cin)  phased padded image (whole batch element, bf16)
    w_ref : (3, 3, Cin, Cout)        BN-scale-folded weights (bf16)
    b_ref : (1, Cout)                folded BN bias (f32)
    o_ref : (1, th, wo, Cout)        output row tile
    acc_ref: (th*wo, Cout) f32 VMEM scratch accumulator
    """
    s = stride
    r0 = pl.program_id(1) * th
    tap = 0
    for kh in range(3):
        # Row window(s) for this kh: one full-width load per kw-phase (s loads).
        wins = []
        for pc in range(s):
            phase = (kh % s) * s + pc
            wins.append(x_ref[0, phase, pl.ds(r0 + kh // s, th), :, :])  # (th, Wps, Cin)
        for kw in range(3):
            src = wins[kw % s]
            c0 = kw // s
            xt = src[:, c0:c0 + wo, :].reshape(th * wo, src.shape[-1])
            contrib = jnp.dot(xt, w_ref[kh, kw], preferred_element_type=jnp.float32)
            if tap == 0:
                acc_ref[...] = contrib        # first tap: overwrite (no zero-init pass)
            else:
                acc_ref[...] += contrib
            tap += 1
    y = jnp.maximum(acc_ref[...] + b_ref[...], 0.0)           # bias + ReLU in f32
    o_ref[...] = y.reshape(o_ref.shape).astype(o_ref.dtype)


def _maxpool3x3_kernel(x_ref, o_ref, *, th, wo):
    """3x3 / stride-2 / pad-1 max pool for one (batch, row-tile) grid cell."""
    r0 = pl.program_id(1) * th
    out = None
    for kh in range(3):
        wins = [x_ref[0, (kh % 2) * 2 + pc, pl.ds(r0 + kh // 2, th), :, :]
                for pc in range(2)]
        for kw in range(3):
            xt = wins[kw % 2][:, (kw // 2):(kw // 2) + wo, :]
            out = xt if out is None else jnp.maximum(out, xt)
    o_ref[...] = out.reshape(o_ref.shape).astype(o_ref.dtype)


# ------------------------------ JAX glue ----------------------------------- #

def _largest_divisor_tile(n, target):
    t = max(1, min(n, target))
    while n % t:
        t -= 1
    return t


def _pad_and_phase(x, stride, pad_value):
    """Pad spatially by 1 and split into stride*stride space-to-depth phase planes.

    Returns phases of shape (N, s*s, Hps, Wps, C) so that a 3x3/stride-s tap
    (kh, kw) is a unit-stride slice of phase (kh % s)*s + (kw % s) at row offset
    kh // s and column offset kw // s.
    """
    N, H, W, C = x.shape
    s = stride
    xp = jnp.pad(x, ((0, 0), (1, 1), (1, 1), (0, 0)), constant_values=pad_value)
    Hp = (H + 2 + s - 1) // s * s
    Wp = (W + 2 + s - 1) // s * s
    if (Hp, Wp) != (H + 2, W + 2):                     # make spatial dims divisible by s
        xp = jnp.pad(xp, ((0, 0), (0, Hp - (H + 2)), (0, Wp - (W + 2)), (0, 0)),
                     constant_values=pad_value)
    Hps, Wps = Hp // s, Wp // s
    phases = xp.reshape(N, Hps, s, Wps, s, C).transpose(0, 2, 4, 1, 3, 5)
    return phases.reshape(N, s * s, Hps, Wps, C), Hps, Wps


def conv3x3_bn_relu(x, w_oihw, gamma, beta, mean, var, *, stride, eps=1e-5,
                    compute_dtype=jnp.bfloat16, out_dtype=jnp.float32,
                    max_row_tile=16):
    """3x3 conv (pad=1) + BatchNorm (eval mode) + ReLU.  x is NHWC."""
    N, H, W, Cin = x.shape
    Cout = w_oihw.shape[0]
    s = stride
    Ho = (H - 1) // s + 1
    Wo = (W - 1) // s + 1

    # Fold BN (eval mode) into weight scale + bias (exact, done once host-side).
    bn_scale = gamma / jnp.sqrt(var + eps)
    bias = (beta - mean * bn_scale).reshape(1, Cout).astype(jnp.float32)
    w = jnp.transpose(w_oihw * bn_scale[:, None, None, None], (2, 3, 1, 0))  # (kh,kw,Cin,Cout)

    # Pad Cin up to a multiple of 8 (cheap; keeps the MXU contraction well formed
    # for the 3-channel first layer).
    cin_p = ((max(Cin, 8) + 7) // 8) * 8
    if cin_p != Cin:
        x = jnp.pad(x, ((0, 0), (0, 0), (0, 0), (0, cin_p - Cin)))
        w = jnp.pad(w, ((0, 0), (0, 0), (0, cin_p - Cin), (0, 0)))
    w = w.astype(compute_dtype)

    phases, Hps, Wps = _pad_and_phase(x.astype(compute_dtype), s, 0.0)

    th = _largest_divisor_tile(Ho, max_row_tile)
    grid = (N, Ho // th)
    kernel = functools.partial(_conv3x3_kernel, stride=s, th=th, wo=Wo)

    return pl.pallas_call(
        kernel,
        out_shape=jax.ShapeDtypeStruct((N, Ho, Wo, Cout), out_dtype),
        grid_spec=pltpu.PrefetchScalarGridSpec(
            num_scalar_prefetch=0,
            grid=grid,
            in_specs=[
                # whole phased image of batch element n stays resident across row tiles
                pl.BlockSpec((1, s * s, Hps, Wps, cin_p), lambda n, i: (n, 0, 0, 0, 0)),
                pl.BlockSpec((3, 3, cin_p, Cout), lambda n, i: (0, 0, 0, 0)),
                pl.BlockSpec((1, Cout), lambda n, i: (0, 0)),
            ],
            out_specs=pl.BlockSpec((1, th, Wo, Cout), lambda n, i: (n, i, 0, 0)),
            scratch_shapes=[pltpu.VMEM((th * Wo, Cout), jnp.float32)],
        ),
        compiler_params=pltpu.CompilerParams(
            dimension_semantics=("parallel", "parallel")),
    )(phases, w, bias)


def maxpool_3x3_s2_p1(x, *, max_row_tile=16):
    """MaxPool2d(kernel=3, stride=2, padding=1) on NHWC input."""
    N, H, W, C = x.shape
    Ho = (H - 1) // 2 + 1
    Wo = (W - 1) // 2 + 1
    phases, Hps, Wps = _pad_and_phase(x, 2, -jnp.inf)   # PyTorch maxpool pads with -inf
    th = _largest_divisor_tile(Ho, max_row_tile)
    grid = (N, Ho // th)
    kernel = functools.partial(_maxpool3x3_kernel, th=th, wo=Wo)
    return pl.pallas_call(
        kernel,
        out_shape=jax.ShapeDtypeStruct((N, Ho, Wo, C), x.dtype),
        grid_spec=pltpu.PrefetchScalarGridSpec(
            num_scalar_prefetch=0,
            grid=grid,
            in_specs=[pl.BlockSpec((1, 4, Hps, Wps, C), lambda n, i: (n, 0, 0, 0, 0))],
            out_specs=pl.BlockSpec((1, th, Wo, C), lambda n, i: (n, i, 0, 0)),
        ),
        compiler_params=pltpu.CompilerParams(
            dimension_semantics=("parallel", "parallel")),
    )(phases)


def rtdetr_resnet_embeddings(pixel_values_nchw, params, num_channels):
    if pixel_values_nchw.shape[1] != num_channels:
        raise ValueError(
            "Make sure that the channel dimension of the pixel values match with the "
            "one set in the configuration."
        )
    x = jnp.transpose(pixel_values_nchw, (0, 2, 3, 1))           # NCHW -> NHWC
    strides = (2, 1, 1)
    # bf16 activations between conv layers (halves HBM traffic); layer feeding the
    # pool (and the module output) stays f32.
    out_dtypes = (jnp.bfloat16, jnp.bfloat16, jnp.float32)
    for layer, stride, od in zip(params["layers"], strides, out_dtypes):
        x = conv3x3_bn_relu(x, layer["w"], layer["gamma"], layer["beta"],
                            layer["mean"], layer["var"], stride=stride, out_dtype=od)
    x = maxpool_3x3_s2_p1(x)
    return jnp.transpose(x, (0, 3, 1, 2))                        # NHWC -> NCHW


# ------------------------- deterministic parameters ------------------------ #

def init_params(key, num_channels, embedding_size):
    dims = [
        (num_channels, embedding_size // 2),
        (embedding_size // 2, embedding_size // 2),
        (embedding_size // 2, embedding_size),
    ]
    layers = []
    for cin, cout in dims:
        k1, k2, k3, k4, k5, key = jax.random.split(key, 6)
        layers.append(dict(
            w=0.1 * jax.random.normal(k1, (cout, cin, 3, 3), jnp.float32),
            gamma=1.0 + 0.1 * jax.random.normal(k2, (cout,), jnp.float32),
            beta=0.1 * jax.random.normal(k3, (cout,), jnp.float32),
            mean=0.05 * jax.random.normal(k4, (cout,), jnp.float32),       # BN running_mean
            var=1.0 + 0.1 * jax.random.uniform(k5, (cout,), jnp.float32),  # BN running_var
        ))
    return {"layers": layers}


# ----------------------------- pure-JAX reference --------------------------- #

def reference_forward(x_nchw, params, eps=1e-5, compute_dtype=jnp.bfloat16):
    # Mirrors the kernel's numerics: BN scale folded into weights, bf16 conv inputs,
    # f32 accumulation / bias / ReLU, f32 maxpool with -inf padding.
    x = jnp.transpose(x_nchw, (0, 2, 3, 1))
    for layer, stride in zip(params["layers"], (2, 1, 1)):
        s = layer["gamma"] / jnp.sqrt(layer["var"] + eps)
        w = jnp.transpose(layer["w"] * s[:, None, None, None], (2, 3, 1, 0))  # OIHW -> HWIO
        y = jax.lax.conv_general_dilated(
            x.astype(compute_dtype), w.astype(compute_dtype),
            (stride, stride), ((1, 1), (1, 1)),
            dimension_numbers=("NHWC", "HWIO", "NHWC"),
            preferred_element_type=jnp.float32)
        x = jnp.maximum(y + (layer["beta"] - layer["mean"] * s), 0.0)
    y = jax.lax.reduce_window(
        x, -jnp.inf, jax.lax.max, (1, 3, 3, 1), (1, 2, 2, 1),
        ((0, 0), (1, 1), (1, 1), (0, 0)))
    return jnp.transpose(y, (0, 3, 1, 2))


# ---------------------------------- main ----------------------------------- #

if __name__ == "__main__":
    batch, num_channels, spatial, embedding_size = 2, 3, 16, 32

    key = jax.random.PRNGKey(0)
    k_x, k_p = jax.random.split(key)
    pixel_values = jax.random.normal(k_x, (batch, num_channels, spatial, spatial), jnp.float32)
    params = init_params(k_p, num_channels, embedding_size)

    fwd = jax.jit(rtdetr_resnet_embeddings, static_argnums=(2,))
    out = jax.block_until_ready(fwd(pixel_values, params, num_channels))

    # stride-2 conv then stride-2 pool: 16 -> 8 -> 4
    assert out.shape == (batch, embedding_size, spatial // 4, spatial // 4), out.shape

    ref = jax.block_until_ready(reference_forward(pixel_values, params))
    max_err = float(jnp.max(jnp.abs(out - ref)))
    assert jnp.allclose(out, ref, atol=2e-2, rtol=2e-2), max_err

    print("KERNEL_OK")
</pallas_src>

<mosaic_0001>
module attributes {stable_mosaic.version = 11 : i64} {
  func.func @_conv3x3_kernel(%arg0: i32, %arg1: i32, %arg2: memref<1x4x9x9x8xbf16, #tpu.memory_space<vmem>>, %arg3: memref<3x3x8x16xbf16, #tpu.memory_space<vmem>>, %arg4: memref<1x16xf32, #tpu.memory_space<vmem>>, %arg5: memref<1x8x8x16xbf16, #tpu.memory_space<vmem>>, %arg6: memref<64x16xf32, #tpu.memory_space<vmem>>) attributes {dimension_semantics = [#tpu.dimension_semantics<parallel>, #tpu.dimension_semantics<parallel>], iteration_bounds = array<i64: 2, 1>, scalar_prefetch = 0 : i64, scratch_operands = 1 : i64, tpu.core_type = #tpu.core_type<tc>, window_params = [{transform_indices = @transform_0, window_bounds = array<i64: 1, 4, 9, 9, 8>}, {pipeline_mode = #tpu.pipeline_mode<synchronous>, transform_indices = @transform_1, window_bounds = array<i64: 3, 3, 8, 16>}, {pipeline_mode = #tpu.pipeline_mode<synchronous>, transform_indices = @transform_2, window_bounds = array<i64: 1, 16>}, {transform_indices = @transform_3, window_bounds = array<i64: 1, 8, 8, 16>}]} {
    %c8_i32 = arith.constant 8 : i32
    %0 = arith.muli %arg1, %c8_i32 : i32
    %c0_i32 = arith.constant 0 : i32
    %1 = arith.addi %0, %c0_i32 : i32
    %c0 = arith.constant 0 : index
    %c0_0 = arith.constant 0 : index
    %2 = arith.index_cast %1 : i32 to index
    %c0_1 = arith.constant 0 : index
    %c0_2 = arith.constant 0 : index
    %3 = vector.load %arg2[%c0, %c0_0, %2, %c0_1, %c0_2] : memref<1x4x9x9x8xbf16, #tpu.memory_space<vmem>>, vector<1x1x8x9x8xbf16>
    %4 = vector.shape_cast %3 : vector<1x1x8x9x8xbf16> to vector<8x9x8xbf16>
    %c0_i32_3 = arith.constant 0 : i32
    %5 = arith.addi %0, %c0_i32_3 : i32
    %c0_4 = arith.constant 0 : index
    %c1 = arith.constant 1 : index
    %6 = arith.index_cast %5 : i32 to index
    %c0_5 = arith.constant 0 : index
    %c0_6 = arith.constant 0 : index
    %7 = vector.load %arg2[%c0_4, %c1, %6, %c0_5, %c0_6] : memref<1x4x9x9x8xbf16, #tpu.memory_space<vmem>>, vector<1x1x8x9x8xbf16>
    %8 = vector.shape_cast %7 : vector<1x1x8x9x8xbf16> to vector<8x9x8xbf16>
    %9 = vector.extract_strided_slice %4 {offsets = [0, 0, 0], sizes = [8, 8, 8], strides = [1, 1, 1]} : vector<8x9x8xbf16> to vector<8x8x8xbf16>
    %10 = vector.shape_cast %9 : vector<8x8x8xbf16> to vector<64x8xbf16>
    %c0_7 = arith.constant 0 : index
    %c0_8 = arith.constant 0 : index
    %c0_9 = arith.constant 0 : index
    %c0_10 = arith.constant 0 : index
    %11 = vector.load %arg3[%c0_7, %c0_8, %c0_9, %c0_10] : memref<3x3x8x16xbf16, #tpu.memory_space<vmem>>, vector<1x1x8x16xbf16>
    %12 = vector.shape_cast %11 : vector<1x1x8x16xbf16> to vector<8x16xbf16>
    %cst = arith.constant dense<0.000000e+00> : vector<64x16xf32>
    %13 = tpu.matmul %10, %12, %cst {dimension_numbers = #tpu.dot_dimension_numbers<[1], [0], [0], [1], [0, 0, 1, 1], [], []>} : vector<64x8xbf16>, vector<8x16xbf16>, vector<64x16xf32> -> vector<64x16xf32>
    %c0_11 = arith.constant 0 : index
    %c0_12 = arith.constant 0 : index
    %14 = vector.load %arg6[%c0_11, %c0_12] : memref<64x16xf32, #tpu.memory_space<vmem>>, vector<64x16xf32>
    tpu.vector_store %arg6[%c0_11, %c0_12], %13 {strides = array<i32>} : memref<64x16xf32, #tpu.memory_space<vmem>>, vector<64x16xf32>,
    %15 = vector.extract_strided_slice %8 {offsets = [0, 0, 0], sizes = [8, 8, 8], strides = [1, 1, 1]} : vector<8x9x8xbf16> to vector<8x8x8xbf16>
    %16 = vector.shape_cast %15 : vector<8x8x8xbf16> to vector<64x8xbf16>
    %c0_13 = arith.constant 0 : index
    %c1_14 = arith.constant 1 : index
    %c0_15 = arith.constant 0 : index
    %c0_16 = arith.constant 0 : index
    %17 = vector.load %arg3[%c0_13, %c1_14, %c0_15, %c0_16] : memref<3x3x8x16xbf16, #tpu.memory_space<vmem>>, vector<1x1x8x16xbf16>
    %18 = vector.shape_cast %17 : vector<1x1x8x16xbf16> to vector<8x16xbf16>
    %cst_17 = arith.constant dense<0.000000e+00> : vector<64x16xf32>
    %19 = tpu.matmul %16, %18, %cst_17 {dimension_numbers = #tpu.dot_dimension_numbers<[1], [0], [0], [1], [0, 0, 1, 1], [], []>} : vector<64x8xbf16>, vector<8x16xbf16>, vector<64x16xf32> -> vector<64x16xf32>
    %c0_18 = arith.constant 0 : index
    %c0_19 = arith.constant 0 : index
    %20 = vector.load %arg6[%c0_18, %c0_19] : memref<64x16xf32, #tpu.memory_space<vmem>>, vector<64x16xf32>
    %21 = arith.addf %20, %19 : vector<64x16xf32>
    %c0_20 = arith.constant 0 : index
    %c0_21 = arith.constant 0 : index
    %22 = vector.load %arg6[%c0_20, %c0_21] : memref<64x16xf32, #tpu.memory_space<vmem>>, vector<64x16xf32>
    tpu.vector_store %arg6[%c0_20, %c0_21], %21 {strides = array<i32>} : memref<64x16xf32, #tpu.memory_space<vmem>>, vector<64x16xf32>,
    %23 = vector.extract_strided_slice %4 {offsets = [0, 1, 0], sizes = [8, 8, 8], strides = [1, 1, 1]} : vector<8x9x8xbf16> to vector<8x8x8xbf16>
    %24 = vector.shape_cast %23 : vector<8x8x8xbf16> to vector<64x8xbf16>
    %c0_22 = arith.constant 0 : index
    %c2 = arith.constant 2 : index
    %c0_23 = arith.constant 0 : index
    %c0_24 = arith.constant 0 : index
    %25 = vector.load %arg3[%c0_22, %c2, %c0_23, %c0_24] : memref<3x3x8x16xbf16, #tpu.memory_space<vmem>>, vector<1x1x8x16xbf16>
    %26 = vector.shape_cast %25 : vector<1x1x8x16xbf16> to vector<8x16xbf16>
    %cst_25 = arith.constant dense<0.000000e+00> : vector<64x16xf32>
    %27 = tpu.matmul %24, %26, %cst_25 {dimension_numbers = #tpu.dot_dimension_numbers<[1], [0], [0], [1], [0, 0, 1, 1], [], []>} : vector<64x8xbf16>, vector<8x16xbf16>, vector<64x16xf32> -> vector<64x16xf32>
    %c0_26 = arith.constant 0 : index
    %c0_27 = arith.constant 0 : index
    %28 = vector.load %arg6[%c0_26, %c0_27] : memref<64x16xf32, #tpu.memory_space<vmem>>, vector<64x16xf32>
    %29 = arith.addf %28, %27 : vector<64x16xf32>
    %c0_28 = arith.constant 0 : index
    %c0_29 = arith.constant 0 : index
    %30 = vector.load %arg6[%c0_28, %c0_29] : memref<64x16xf32, #tpu.memory_space<vmem>>, vector<64x16xf32>
    tpu.vector_store %arg6[%c0_28, %c0_29], %29 {strides = array<i32>} : memref<64x16xf32, #tpu.memory_space<vmem>>, vector<64x16xf32>,
    %c0_i32_30 = arith.constant 0 : i32
    %31 = arith.addi %0, %c0_i32_30 : i32
    %c0_31 = arith.constant 0 : index
    %c2_32 = arith.constant 2 : index
    %32 = arith.index_cast %31 : i32 to index
    %c0_33 = arith.constant 0 : index
    %c0_34 = arith.constant 0 : index
    %33 = vector.load %arg2[%c0_31, %c2_32, %32, %c0_33, %c0_34] : memref<1x4x9x9x8xbf16, #tpu.memory_space<vmem>>, vector<1x1x8x9x8xbf16>
    %34 = vector.shape_cast %33 : vector<1x1x8x9x8xbf16> to vector<8x9x8xbf16>
    %c0_i32_35 = arith.constant 0 : i32
    %35 = arith.addi %0, %c0_i32_35 : i32
    %c0_36 = arith.constant 0 : index
    %c3 = arith.constant 3 : index
    %36 = arith.index_cast %35 : i32 to index
    %c0_37 = arith.constant 0 : index
    %c0_38 = arith.constant 0 : index
    %37 = vector.load %arg2[%c0_36, %c3, %36, %c0_37, %c0_38] : memref<1x4x9x9x8xbf16, #tpu.memory_space<vmem>>, vector<1x1x8x9x8xbf16>
    %38 = vector.shape_cast %37 : vector<1x1x8x9x8xbf16> to vector<8x9x8xbf16>
    %39 = vector.extract_strided_slice %34 {offsets = [0, 0, 0], sizes = [8, 8, 8], strides = [1, 1, 1]} : vector<8x9x8xbf16> to vector<8x8x8xbf16>
    %40 = vector.shape_cast %39 : vector<8x8x8xbf16> to vector<64x8xbf16>
    %c1_39 = arith.constant 1 : index
    %c0_40 = arith.constant 0 : index
    %c0_41 = arith.constant 0 : index
    %c0_42 = arith.constant 0 : index
    %41 = vector.load %arg3[%c1_39, %c0_40, %c0_41, %c0_42] : memref<3x3x8x16xbf16, #tpu.memory_space<vmem>>, vector<1x1x8x16xbf16>
    %42 = vector.shape_cast %41 : vector<1x1x8x16xbf16> to vector<8x16xbf16>
    %cst_43 = arith.constant dense<0.000000e+00> : vector<64x16xf32>
    %43 = tpu.matmul %40, %42, %cst_43 {dimension_numbers = #tpu.dot_dimension_numbers<[1], [0], [0], [1], [0, 0, 1, 1], [], []>} : vector<64x8xbf16>, vector<8x16xbf16>, vector<64x16xf32> -> vector<64x16xf32>
    %c0_44 = arith.constant 0 : index
    %c0_45 = arith.constant 0 : index
    %44 = vector.load %arg6[%c0_44, %c0_45] : memref<64x16xf32, #tpu.memory_space<vmem>>, vector<64x16xf32>
    %45 = arith.addf %44, %43 : vector<64x16xf32>
    %c0_46 = arith.constant 0 : index
    %c0_47 = arith.constant 0 : index
    %46 = vector.load %arg6[%c0_46, %c0_47] : memref<64x16xf32, #tpu.memory_space<vmem>>, vector<64x16xf32>
    tpu.vector_store %arg6[%c0_46, %c0_47], %45 {strides = array<i32>} : memref<64x16xf32, #tpu.memory_space<vmem>>, vector<64x16xf32>,
    %47 = vector.extract_strided_slice %38 {offsets = [0, 0, 0], sizes = [8, 8, 8], strides = [1, 1, 1]} : vector<8x9x8xbf16> to vector<8x8x8xbf16>
    %48 = vector.shape_cast %47 : vector<8x8x8xbf16> to vector<64x8xbf16>
    %c1_48 = arith.constant 1 : index
    %c1_49 = arith.constant 1 : index
    %c0_50 = arith.constant 0 : index
    %c0_51 = arith.constant 0 : index
    %49 = vector.load %arg3[%c1_48, %c1_49, %c0_50, %c0_51] : memref<3x3x8x16xbf16, #tpu.memory_space<vmem>>, vector<1x1x8x16xbf16>
    %50 = vector.shape_cast %49 : vector<1x1x8x16xbf16> to vector<8x16xbf16>
    %cst_52 = arith.constant dense<0.000000e+00> : vector<64x16xf32>
    %51 = tpu.matmul %48, %50, %cst_52 {dimension_numbers = #tpu.dot_dimension_numbers<[1], [0], [0], [1], [0, 0, 1, 1], [], []>} : vector<64x8xbf16>, vector<8x16xbf16>, vector<64x16xf32> -> vector<64x16xf32>
    %c0_53 = arith.constant 0 : index
    %c0_54 = arith.constant 0 : index
    %52 = vector.load %arg6[%c0_53, %c0_54] : memref<64x16xf32, #tpu.memory_space<vmem>>, vector<64x16xf32>
    %53 = arith.addf %52, %51 : vector<64x16xf32>
    %c0_55 = arith.constant 0 : index
    %c0_56 = arith.constant 0 : index
    %54 = vector.load %arg6[%c0_55, %c0_56] : memref<64x16xf32, #tpu.memory_space<vmem>>, vector<64x16xf32>
    tpu.vector_store %arg6[%c0_55, %c0_56], %53 {strides = array<i32>} : memref<64x16xf32, #tpu.memory_space<vmem>>, vector<64x16xf32>,
    %55 = vector.extract_strided_slice %34 {offsets = [0, 1, 0], sizes = [8, 8, 8], strides = [1, 1, 1]} : vector<8x9x8xbf16> to vector<8x8x8xbf16>
    %56 = vector.shape_cast %55 : vector<8x8x8xbf16> to vector<64x8xbf16>
    %c1_57 = arith.constant 1 : index
    %c2_58 = arith.constant 2 : index
    %c0_59 = arith.constant 0 : index
    %c0_60 = arith.constant 0 : index
    %57 = vector.load %arg3[%c1_57, %c2_58, %c0_59, %c0_60] : memref<3x3x8x16xbf16, #tpu.memory_space<vmem>>, vector<1x1x8x16xbf16>
    %58 = vector.shape_cast %57 : vector<1x1x8x16xbf16> to vector<8x16xbf16>
    %cst_61 = arith.constant dense<0.000000e+00> : vector<64x16xf32>
    %59 = tpu.matmul %56, %58, %cst_61 {dimension_numbers = #tpu.dot_dimension_numbers<[1], [0], [0], [1], [0, 0, 1, 1], [], []>} : vector<64x8xbf16>, vector<8x16xbf16>, vector<64x16xf32> -> vector<64x16xf32>
    %c0_62 = arith.constant 0 : index
    %c0_63 = arith.constant 0 : index
    %60 = vector.load %arg6[%c0_62, %c0_63] : memref<64x16xf32, #tpu.memory_space<vmem>>, vector<64x16xf32>
    %61 = arith.addf %60, %59 : vector<64x16xf32>
    %c0_64 = arith.constant 0 : index
    %c0_65 = arith.constant 0 : index
    %62 = vector.load %arg6[%c0_64, %c0_65] : memref<64x16xf32, #tpu.memory_space<vmem>>, vector<64x16xf32>
    tpu.vector_store %arg6[%c0_64, %c0_65], %61 {strides = array<i32>} : memref<64x16xf32, #tpu.memory_space<vmem>>, vector<64x16xf32>,
    %c1_i32 = arith.constant 1 : i32
    %63 = arith.addi %0, %c1_i32 : i32
    %c0_66 = arith.constant 0 : index
    %c0_67 = arith.constant 0 : index
    %64 = arith.index_cast %63 : i32 to index
    %c0_68 = arith.constant 0 : index
    %c0_69 = arith.constant 0 : index
    %65 = vector.load %arg2[%c0_66, %c0_67, %64, %c0_68, %c0_69] : memref<1x4x9x9x8xbf16, #tpu.memory_space<vmem>>, vector<1x1x8x9x8xbf16>
    %66 = vector.shape_cast %65 : vector<1x1x8x9x8xbf16> to vector<8x9x8xbf16>
    %c1_i32_70 = arith.constant 1 : i32
    %67 = arith.addi %0, %c1_i32_70 : i32
    %c0_71 = arith.constant 0 : index
    %c1_72 = arith.constant 1 : index
    %68 = arith.index_cast %67 : i32 to index
    %c0_73 = arith.constant 0 : index
    %c0_74 = arith.constant 0 : index
    %69 = vector.load %arg2[%c0_71, %c1_72, %68, %c0_73, %c0_74] : memref<1x4x9x9x8xbf16, #tpu.memory_space<vmem>>, vector<1x1x8x9x8xbf16>
    %70 = vector.shape_cast %69 : vector<1x1x8x9x8xbf16> to vector<8x9x8xbf16>
    %71 = vector.extract_strided_slice %66 {offsets = [0, 0, 0], sizes = [8, 8, 8], strides = [1, 1, 1]} : vector<8x9x8xbf16> to vector<8x8x8xbf16>
    %72 = vector.shape_cast %71 : vector<8x8x8xbf16> to vector<64x8xbf16>
    %c2_75 = arith.constant 2 : index
    %c0_76 = arith.constant 0 : index
    %c0_77 = arith.constant 0 : index
    %c0_78 = arith.constant 0 : index
    %73 = vector.load %arg3[%c2_75, %c0_76, %c0_77, %c0_78] : memref<3x3x8x16xbf16, #tpu.memory_space<vmem>>, vector<1x1x8x16xbf16>
    %74 = vector.shape_cast %73 : vector<1x1x8x16xbf16> to vector<8x16xbf16>
    %cst_79 = arith.constant dense<0.000000e+00> : vector<64x16xf32>
    %75 = tpu.matmul %72, %74, %cst_79 {dimension_numbers = #tpu.dot_dimension_numbers<[1], [0], [0], [1], [0, 0, 1, 1], [], []>} : vector<64x8xbf16>, vector<8x16xbf16>, vector<64x16xf32> -> vector<64x16xf32>
    %c0_80 = arith.constant 0 : index
    %c0_81 = arith.constant 0 : index
    %76 = vector.load %arg6[%c0_80, %c0_81] : memref<64x16xf32, #tpu.memory_space<vmem>>, vector<64x16xf32>
    %77 = arith.addf %76, %75 : vector<64x16xf32>
    %c0_82 = arith.constant 0 : index
    %c0_83 = arith.constant 0 : index
    %78 = vector.load %arg6[%c0_82, %c0_83] : memref<64x16xf32, #tpu.memory_space<vmem>>, vector<64x16xf32>
    tpu.vector_store %arg6[%c0_82, %c0_83], %77 {strides = array<i32>} : memref<64x16xf32, #tpu.memory_space<vmem>>, vector<64x16xf32>,
    %79 = vector.extract_strided_slice %70 {offsets = [0, 0, 0], sizes = [8, 8, 8], strides = [1, 1, 1]} : vector<8x9x8xbf16> to vector<8x8x8xbf16>
    %80 = vector.shape_cast %79 : vector<8x8x8xbf16> to vector<64x8xbf16>
    %c2_84 = arith.constant 2 : index
    %c1_85 = arith.constant 1 : index
    %c0_86 = arith.constant 0 : index
    %c0_87 = arith.constant 0 : index
    %81 = vector.load %arg3[%c2_84, %c1_85, %c0_86, %c0_87] : memref<3x3x8x16xbf16, #tpu.memory_space<vmem>>, vector<1x1x8x16xbf16>
    %82 = vector.shape_cast %81 : vector<1x1x8x16xbf16> to vector<8x16xbf16>
    %cst_88 = arith.constant dense<0.000000e+00> : vector<64x16xf32>
    %83 = tpu.matmul %80, %82, %cst_88 {dimension_numbers = #tpu.dot_dimension_numbers<[1], [0], [0], [1], [0, 0, 1, 1], [], []>} : vector<64x8xbf16>, vector<8x16xbf16>, vector<64x16xf32> -> vector<64x16xf32>
    %c0_89 = arith.constant 0 : index
    %c0_90 = arith.constant 0 : index
    %84 = vector.load %arg6[%c0_89, %c0_90] : memref<64x16xf32, #tpu.memory_space<vmem>>, vector<64x16xf32>
    %85 = arith.addf %84, %83 : vector<64x16xf32>
    %c0_91 = arith.constant 0 : index
    %c0_92 = arith.constant 0 : index
    %86 = vector.load %arg6[%c0_91, %c0_92] : memref<64x16xf32, #tpu.memory_space<vmem>>, vector<64x16xf32>
    tpu.vector_store %arg6[%c0_91, %c0_92], %85 {strides = array<i32>} : memref<64x16xf32, #tpu.memory_space<vmem>>, vector<64x16xf32>,
    %87 = vector.extract_strided_slice %66 {offsets = [0, 1, 0], sizes = [8, 8, 8], strides = [1, 1, 1]} : vector<8x9x8xbf16> to vector<8x8x8xbf16>
    %88 = vector.shape_cast %87 : vector<8x8x8xbf16> to vector<64x8xbf16>
    %c2_93 = arith.constant 2 : index
    %c2_94 = arith.constant 2 : index
    %c0_95 = arith.constant 0 : index
    %c0_96 = arith.constant 0 : index
    %89 = vector.load %arg3[%c2_93, %c2_94, %c0_95, %c0_96] : memref<3x3x8x16xbf16, #tpu.memory_space<vmem>>, vector<1x1x8x16xbf16>
    %90 = vector.shape_cast %89 : vector<1x1x8x16xbf16> to vector<8x16xbf16>
    %cst_97 = arith.constant dense<0.000000e+00> : vector<64x16xf32>
    %91 = tpu.matmul %88, %90, %cst_97 {dimension_numbers = #tpu.dot_dimension_numbers<[1], [0], [0], [1], [0, 0, 1, 1], [], []>} : vector<64x8xbf16>, vector<8x16xbf16>, vector<64x16xf32> -> vector<64x16xf32>
    %c0_98 = arith.constant 0 : index
    %c0_99 = arith.constant 0 : index
    %92 = vector.load %arg6[%c0_98, %c0_99] : memref<64x16xf32, #tpu.memory_space<vmem>>, vector<64x16xf32>
    %93 = arith.addf %92, %91 : vector<64x16xf32>
    %c0_100 = arith.constant 0 : index
    %c0_101 = arith.constant 0 : index
    %94 = vector.load %arg6[%c0_100, %c0_101] : memref<64x16xf32, #tpu.memory_space<vmem>>, vector<64x16xf32>
    tpu.vector_store %arg6[%c0_100, %c0_101], %93 {strides = array<i32>} : memref<64x16xf32, #tpu.memory_space<vmem>>, vector<64x16xf32>,
    %c0_102 = arith.constant 0 : index
    %c0_103 = arith.constant 0 : index
    %95 = vector.load %arg6[%c0_102, %c0_103] : memref<64x16xf32, #tpu.memory_space<vmem>>, vector<64x16xf32>
    %c0_104 = arith.constant 0 : index
    %c0_105 = arith.constant 0 : index
    %96 = vector.load %arg4[%c0_104, %c0_105] : memref<1x16xf32, #tpu.memory_space<vmem>>, vector<1x16xf32>
    %97 = vector.broadcast %96 : vector<1x16xf32> to vector<64x16xf32>
    %98 = arith.addf %95, %97 : vector<64x16xf32>
    %cst_106 = arith.constant 0.000000e+00 : f32
    %99 = vector.broadcast %cst_106 : f32 to vector<64x16xf32>
    %100 = arith.maximumf %98, %99 : vector<64x16xf32>
    %101 = vector.shape_cast %100 : vector<64x16xf32> to vector<1x8x8x16xf32>
    %102 = arith.truncf %101 : vector<1x8x8x16xf32> to vector<1x8x8x16xbf16>
    %c0_107 = arith.constant 0 : index
    %c0_108 = arith.constant 0 : index
    %c0_109 = arith.constant 0 : index
    %c0_110 = arith.constant 0 : index
    %103 = vector.load %arg5[%c0_107, %c0_108, %c0_109, %c0_110] : memref<1x8x8x16xbf16, #tpu.memory_space<vmem>>, vector<1x8x8x16xbf16>
    tpu.vector_store %arg5[%c0_107, %c0_108, %c0_109, %c0_110], %102 {strides = array<i32>} : memref<1x8x8x16xbf16, #tpu.memory_space<vmem>>, vector<1x8x8x16xbf16>,
    return
  }
  func.func @transform_0(%arg0: i32, %arg1: i32) -> (i32, i32, i32, i32, i32) {
    %c0_i32 = arith.constant 0 : i32
    %c0_i32_0 = arith.constant 0 : i32
    %c0_i32_1 = arith.constant 0 : i32
    %c0_i32_2 = arith.constant 0 : i32
    %c0_i32_3 = arith.constant 0 : i32
    return %arg0, %c0_i32, %c0_i32_0, %c0_i32_1, %c0_i32_2 : i32, i32, i32, i32, i32
  }
  func.func @transform_1(%arg0: i32, %arg1: i32) -> (i32, i32, i32, i32) {
    %c0_i32 = arith.constant 0 : i32
    %c0_i32_0 = arith.constant 0 : i32
    %c0_i32_1 = arith.constant 0 : i32
    %c0_i32_2 = arith.constant 0 : i32
    %c0_i32_3 = arith.constant 0 : i32
    return %c0_i32, %c0_i32_0, %c0_i32_1, %c0_i32_2 : i32, i32, i32, i32
  }
  func.func @transform_2(%arg0: i32, %arg1: i32) -> (i32, i32) {
    %c0_i32 = arith.constant 0 : i32
    %c0_i32_0 = arith.constant 0 : i32
    %c0_i32_1 = arith.constant 0 : i32
    return %c0_i32, %c0_i32_0 : i32, i32
  }
  func.func @transform_3(%arg0: i32, %arg1: i32) -> (i32, i32, i32, i32) {
    %c0_i32 = arith.constant 0 : i32
    %c0_i32_0 = arith.constant 0 : i32
    %c0_i32_1 = arith.constant 0 : i32
    return %arg0, %arg1, %c0_i32, %c0_i32_0 : i32, i32, i32, i32
  }
}

module attributes {stable_mosaic.version = 11 : i64} {
  func.func @_conv3x3_kernel(%arg0: i32, %arg1: i32, %arg2: memref<1x1x10x10x16xbf16, #tpu.memory_space<vmem>>, %arg3: memref<3x3x16x16xbf16, #tpu.memory_space<vmem>>, %arg4: memref<1x16xf32, #tpu.memory_space<vmem>>, %arg5: memref<1x8x8x16xbf16, #tpu.memory_space<vmem>>, %arg6: memref<64x16xf32, #tpu.memory_space<vmem>>) attributes {dimension_semantics = [#tpu.dimension_semantics<parallel>, #tpu.dimension_semantics<parallel>], iteration_bounds = array<i64: 2, 1>, scalar_prefetch = 0 : i64, scratch_operands = 1 : i64, tpu.core_type = #tpu.core_type<tc>, window_params = [{transform_indices = @transform_0, window_bounds = array<i64: 1, 1, 10, 10, 16>}, {pipeline_mode = #tpu.pipeline_mode<synchronous>, transform_indices = @transform_1, window_bounds = array<i64: 3, 3, 16, 16>}, {pipeline_mode = #tpu.pipeline_mode<synchronous>, transform_indices = @transform_2, window_bounds = array<i64: 1, 16>}, {transform_indices = @transform_3, window_bounds = array<i64: 1, 8, 8, 16>}]} {
    %c8_i32 = arith.constant 8 : i32
    %0 = arith.muli %arg1, %c8_i32 : i32
    %c0_i32 = arith.constant 0 : i32
    %1 = arith.addi %0, %c0_i32 : i32
    %c0 = arith.constant 0 : index
    %c0_0 = arith.constant 0 : index
    %2 = arith.index_cast %1 : i32 to index
    %c0_1 = arith.constant 0 : index
    %c0_2 = arith.constant 0 : index
    %3 = vector.load %arg2[%c0, %c0_0, %2, %c0_1, %c0_2] : memref<1x1x10x10x16xbf16, #tpu.memory_space<vmem>>, vector<1x1x8x10x16xbf16>
    %4 = vector.shape_cast %3 : vector<1x1x8x10x16xbf16> to vector<8x10x16xbf16>
    %5 = vector.extract_strided_slice %4 {offsets = [0, 0, 0], sizes = [8, 8, 16], strides = [1, 1, 1]} : vector<8x10x16xbf16> to vector<8x8x16xbf16>
    %6 = vector.shape_cast %5 : vector<8x8x16xbf16> to vector<64x16xbf16>
    %c0_3 = arith.constant 0 : index
    %c0_4 = arith.constant 0 : index
    %c0_5 = arith.constant 0 : index
    %c0_6 = arith.constant 0 : index
    %7 = vector.load %arg3[%c0_3, %c0_4, %c0_5, %c0_6] : memref<3x3x16x16xbf16, #tpu.memory_space<vmem>>, vector<1x1x16x16xbf16>
    %8 = vector.shape_cast %7 : vector<1x1x16x16xbf16> to vector<16x16xbf16>
    %cst = arith.constant dense<0.000000e+00> : vector<64x16xf32>
    %9 = tpu.matmul %6, %8, %cst {dimension_numbers = #tpu.dot_dimension_numbers<[1], [0], [0], [1], [0, 0, 1, 1], [], []>} : vector<64x16xbf16>, vector<16x16xbf16>, vector<64x16xf32> -> vector<64x16xf32>
    %c0_7 = arith.constant 0 : index
    %c0_8 = arith.constant 0 : index
    %10 = vector.load %arg6[%c0_7, %c0_8] : memref<64x16xf32, #tpu.memory_space<vmem>>, vector<64x16xf32>
    tpu.vector_store %arg6[%c0_7, %c0_8], %9 {strides = array<i32>} : memref<64x16xf32, #tpu.memory_space<vmem>>, vector<64x16xf32>,
    %11 = vector.extract_strided_slice %4 {offsets = [0, 1, 0], sizes = [8, 8, 16], strides = [1, 1, 1]} : vector<8x10x16xbf16> to vector<8x8x16xbf16>
    %12 = vector.shape_cast %11 : vector<8x8x16xbf16> to vector<64x16xbf16>
    %c0_9 = arith.constant 0 : index
    %c1 = arith.constant 1 : index
    %c0_10 = arith.constant 0 : index
    %c0_11 = arith.constant 0 : index
    %13 = vector.load %arg3[%c0_9, %c1, %c0_10, %c0_11] : memref<3x3x16x16xbf16, #tpu.memory_space<vmem>>, vector<1x1x16x16xbf16>
    %14 = vector.shape_cast %13 : vector<1x1x16x16xbf16> to vector<16x16xbf16>
    %cst_12 = arith.constant dense<0.000000e+00> : vector<64x16xf32>
    %15 = tpu.matmul %12, %14, %cst_12 {dimension_numbers = #tpu.dot_dimension_numbers<[1], [0], [0], [1], [0, 0, 1, 1], [], []>} : vector<64x16xbf16>, vector<16x16xbf16>, vector<64x16xf32> -> vector<64x16xf32>
    %c0_13 = arith.constant 0 : index
    %c0_14 = arith.constant 0 : index
    %16 = vector.load %arg6[%c0_13, %c0_14] : memref<64x16xf32, #tpu.memory_space<vmem>>, vector<64x16xf32>
    %17 = arith.addf %16, %15 : vector<64x16xf32>
    %c0_15 = arith.constant 0 : index
    %c0_16 = arith.constant 0 : index
    %18 = vector.load %arg6[%c0_15, %c0_16] : memref<64x16xf32, #tpu.memory_space<vmem>>, vector<64x16xf32>
    tpu.vector_store %arg6[%c0_15, %c0_16], %17 {strides = array<i32>} : memref<64x16xf32, #tpu.memory_space<vmem>>, vector<64x16xf32>,
    %19 = vector.extract_strided_slice %4 {offsets = [0, 2, 0], sizes = [8, 8, 16], strides = [1, 1, 1]} : vector<8x10x16xbf16> to vector<8x8x16xbf16>
    %20 = vector.shape_cast %19 : vector<8x8x16xbf16> to vector<64x16xbf16>
    %c0_17 = arith.constant 0 : index
    %c2 = arith.constant 2 : index
    %c0_18 = arith.constant 0 : index
    %c0_19 = arith.constant 0 : index
    %21 = vector.load %arg3[%c0_17, %c2, %c0_18, %c0_19] : memref<3x3x16x16xbf16, #tpu.memory_space<vmem>>, vector<1x1x16x16xbf16>
    %22 = vector.shape_cast %21 : vector<1x1x16x16xbf16> to vector<16x16xbf16>
    %cst_20 = arith.constant dense<0.000000e+00> : vector<64x16xf32>
    %23 = tpu.matmul %20, %22, %cst_20 {dimension_numbers = #tpu.dot_dimension_numbers<[1], [0], [0], [1], [0, 0, 1, 1], [], []>} : vector<64x16xbf16>, vector<16x16xbf16>, vector<64x16xf32> -> vector<64x16xf32>
    %c0_21 = arith.constant 0 : index
    %c0_22 = arith.constant 0 : index
    %24 = vector.load %arg6[%c0_21, %c0_22] : memref<64x16xf32, #tpu.memory_space<vmem>>, vector<64x16xf32>
    %25 = arith.addf %24, %23 : vector<64x16xf32>
    %c0_23 = arith.constant 0 : index
    %c0_24 = arith.constant 0 : index
    %26 = vector.load %arg6[%c0_23, %c0_24] : memref<64x16xf32, #tpu.memory_space<vmem>>, vector<64x16xf32>
    tpu.vector_store %arg6[%c0_23, %c0_24], %25 {strides = array<i32>} : memref<64x16xf32, #tpu.memory_space<vmem>>, vector<64x16xf32>,
    %c1_i32 = arith.constant 1 : i32
    %27 = arith.addi %0, %c1_i32 : i32
    %c0_25 = arith.constant 0 : index
    %c0_26 = arith.constant 0 : index
    %28 = arith.index_cast %27 : i32 to index
    %c0_27 = arith.constant 0 : index
    %c0_28 = arith.constant 0 : index
    %29 = vector.load %arg2[%c0_25, %c0_26, %28, %c0_27, %c0_28] : memref<1x1x10x10x16xbf16, #tpu.memory_space<vmem>>, vector<1x1x8x10x16xbf16>
    %30 = vector.shape_cast %29 : vector<1x1x8x10x16xbf16> to vector<8x10x16xbf16>
    %31 = vector.extract_strided_slice %30 {offsets = [0, 0, 0], sizes = [8, 8, 16], strides = [1, 1, 1]} : vector<8x10x16xbf16> to vector<8x8x16xbf16>
    %32 = vector.shape_cast %31 : vector<8x8x16xbf16> to vector<64x16xbf16>
    %c1_29 = arith.constant 1 : index
    %c0_30 = arith.constant 0 : index
    %c0_31 = arith.constant 0 : index
    %c0_32 = arith.constant 0 : index
    %33 = vector.load %arg3[%c1_29, %c0_30, %c0_31, %c0_32] : memref<3x3x16x16xbf16, #tpu.memory_space<vmem>>, vector<1x1x16x16xbf16>
    %34 = vector.shape_cast %33 : vector<1x1x16x16xbf16> to vector<16x16xbf16>
    %cst_33 = arith.constant dense<0.000000e+00> : vector<64x16xf32>
    %35 = tpu.matmul %32, %34, %cst_33 {dimension_numbers = #tpu.dot_dimension_numbers<[1], [0], [0], [1], [0, 0, 1, 1], [], []>} : vector<64x16xbf16>, vector<16x16xbf16>, vector<64x16xf32> -> vector<64x16xf32>
    %c0_34 = arith.constant 0 : index
    %c0_35 = arith.constant 0 : index
    %36 = vector.load %arg6[%c0_34, %c0_35] : memref<64x16xf32, #tpu.memory_space<vmem>>, vector<64x16xf32>
    %37 = arith.addf %36, %35 : vector<64x16xf32>
    %c0_36 = arith.constant 0 : index
    %c0_37 = arith.constant 0 : index
    %38 = vector.load %arg6[%c0_36, %c0_37] : memref<64x16xf32, #tpu.memory_space<vmem>>, vector<64x16xf32>
    tpu.vector_store %arg6[%c0_36, %c0_37], %37 {strides = array<i32>} : memref<64x16xf32, #tpu.memory_space<vmem>>, vector<64x16xf32>,
    %39 = vector.extract_strided_slice %30 {offsets = [0, 1, 0], sizes = [8, 8, 16], strides = [1, 1, 1]} : vector<8x10x16xbf16> to vector<8x8x16xbf16>
    %40 = vector.shape_cast %39 : vector<8x8x16xbf16> to vector<64x16xbf16>
    %c1_38 = arith.constant 1 : index
    %c1_39 = arith.constant 1 : index
    %c0_40 = arith.constant 0 : index
    %c0_41 = arith.constant 0 : index
    %41 = vector.load %arg3[%c1_38, %c1_39, %c0_40, %c0_41] : memref<3x3x16x16xbf16, #tpu.memory_space<vmem>>, vector<1x1x16x16xbf16>
    %42 = vector.shape_cast %41 : vector<1x1x16x16xbf16> to vector<16x16xbf16>
    %cst_42 = arith.constant dense<0.000000e+00> : vector<64x16xf32>
    %43 = tpu.matmul %40, %42, %cst_42 {dimension_numbers = #tpu.dot_dimension_numbers<[1], [0], [0], [1], [0, 0, 1, 1], [], []>} : vector<64x16xbf16>, vector<16x16xbf16>, vector<64x16xf32> -> vector<64x16xf32>
    %c0_43 = arith.constant 0 : index
    %c0_44 = arith.constant 0 : index
    %44 = vector.load %arg6[%c0_43, %c0_44] : memref<64x16xf32, #tpu.memory_space<vmem>>, vector<64x16xf32>
    %45 = arith.addf %44, %43 : vector<64x16xf32>
    %c0_45 = arith.constant 0 : index
    %c0_46 = arith.constant 0 : index
    %46 = vector.load %arg6[%c0_45, %c0_46] : memref<64x16xf32, #tpu.memory_space<vmem>>, vector<64x16xf32>
    tpu.vector_store %arg6[%c0_45, %c0_46], %45 {strides = array<i32>} : memref<64x16xf32, #tpu.memory_space<vmem>>, vector<64x16xf32>,
    %47 = vector.extract_strided_slice %30 {offsets = [0, 2, 0], sizes = [8, 8, 16], strides = [1, 1, 1]} : vector<8x10x16xbf16> to vector<8x8x16xbf16>
    %48 = vector.shape_cast %47 : vector<8x8x16xbf16> to vector<64x16xbf16>
    %c1_47 = arith.constant 1 : index
    %c2_48 = arith.constant 2 : index
    %c0_49 = arith.constant 0 : index
    %c0_50 = arith.constant 0 : index
    %49 = vector.load %arg3[%c1_47, %c2_48, %c0_49, %c0_50] : memref<3x3x16x16xbf16, #tpu.memory_space<vmem>>, vector<1x1x16x16xbf16>
    %50 = vector.shape_cast %49 : vector<1x1x16x16xbf16> to vector<16x16xbf16>
    %cst_51 = arith.constant dense<0.000000e+00> : vector<64x16xf32>
    %51 = tpu.matmul %48, %50, %cst_51 {dimension_numbers = #tpu.dot_dimension_numbers<[1], [0], [0], [1], [0, 0, 1, 1], [], []>} : vector<64x16xbf16>, vector<16x16xbf16>, vector<64x16xf32> -> vector<64x16xf32>
    %c0_52 = arith.constant 0 : index
    %c0_53 = arith.constant 0 : index
    %52 = vector.load %arg6[%c0_52, %c0_53] : memref<64x16xf32, #tpu.memory_space<vmem>>, vector<64x16xf32>
    %53 = arith.addf %52, %51 : vector<64x16xf32>
    %c0_54 = arith.constant 0 : index
    %c0_55 = arith.constant 0 : index
    %54 = vector.load %arg6[%c0_54, %c0_55] : memref<64x16xf32, #tpu.memory_space<vmem>>, vector<64x16xf32>
    tpu.vector_store %arg6[%c0_54, %c0_55], %53 {strides = array<i32>} : memref<64x16xf32, #tpu.memory_space<vmem>>, vector<64x16xf32>,
    %c2_i32 = arith.constant 2 : i32
    %55 = arith.addi %0, %c2_i32 : i32
    %c0_56 = arith.constant 0 : index
    %c0_57 = arith.constant 0 : index
    %56 = arith.index_cast %55 : i32 to index
    %c0_58 = arith.constant 0 : index
    %c0_59 = arith.constant 0 : index
    %57 = vector.load %arg2[%c0_56, %c0_57, %56, %c0_58, %c0_59] : memref<1x1x10x10x16xbf16, #tpu.memory_space<vmem>>, vector<1x1x8x10x16xbf16>
    %58 = vector.shape_cast %57 : vector<1x1x8x10x16xbf16> to vector<8x10x16xbf16>
    %59 = vector.extract_strided_slice %58 {offsets = [0, 0, 0], sizes = [8, 8, 16], strides = [1, 1, 1]} : vector<8x10x16xbf16> to vector<8x8x16xbf16>
    %60 = vector.shape_cast %59 : vector<8x8x16xbf16> to vector<64x16xbf16>
    %c2_60 = arith.constant 2 : index
    %c0_61 = arith.constant 0 : index
    %c0_62 = arith.constant 0 : index
    %c0_63 = arith.constant 0 : index
    %61 = vector.load %arg3[%c2_60, %c0_61, %c0_62, %c0_63] : memref<3x3x16x16xbf16, #tpu.memory_space<vmem>>, vector<1x1x16x16xbf16>
    %62 = vector.shape_cast %61 : vector<1x1x16x16xbf16> to vector<16x16xbf16>
    %cst_64 = arith.constant dense<0.000000e+00> : vector<64x16xf32>
    %63 = tpu.matmul %60, %62, %cst_64 {dimension_numbers = #tpu.dot_dimension_numbers<[1], [0], [0], [1], [0, 0, 1, 1], [], []>} : vector<64x16xbf16>, vector<16x16xbf16>, vector<64x16xf32> -> vector<64x16xf32>
    %c0_65 = arith.constant 0 : index
    %c0_66 = arith.constant 0 : index
    %64 = vector.load %arg6[%c0_65, %c0_66] : memref<64x16xf32, #tpu.memory_space<vmem>>, vector<64x16xf32>
    %65 = arith.addf %64, %63 : vector<64x16xf32>
    %c0_67 = arith.constant 0 : index
    %c0_68 = arith.constant 0 : index
    %66 = vector.load %arg6[%c0_67, %c0_68] : memref<64x16xf32, #tpu.memory_space<vmem>>, vector<64x16xf32>
    tpu.vector_store %arg6[%c0_67, %c0_68], %65 {strides = array<i32>} : memref<64x16xf32, #tpu.memory_space<vmem>>, vector<64x16xf32>,
    %67 = vector.extract_strided_slice %58 {offsets = [0, 1, 0], sizes = [8, 8, 16], strides = [1, 1, 1]} : vector<8x10x16xbf16> to vector<8x8x16xbf16>
    %68 = vector.shape_cast %67 : vector<8x8x16xbf16> to vector<64x16xbf16>
    %c2_69 = arith.constant 2 : index
    %c1_70 = arith.constant 1 : index
    %c0_71 = arith.constant 0 : index
    %c0_72 = arith.constant 0 : index
    %69 = vector.load %arg3[%c2_69, %c1_70, %c0_71, %c0_72] : memref<3x3x16x16xbf16, #tpu.memory_space<vmem>>, vector<1x1x16x16xbf16>
    %70 = vector.shape_cast %69 : vector<1x1x16x16xbf16> to vector<16x16xbf16>
    %cst_73 = arith.constant dense<0.000000e+00> : vector<64x16xf32>
    %71 = tpu.matmul %68, %70, %cst_73 {dimension_numbers = #tpu.dot_dimension_numbers<[1], [0], [0], [1], [0, 0, 1, 1], [], []>} : vector<64x16xbf16>, vector<16x16xbf16>, vector<64x16xf32> -> vector<64x16xf32>
    %c0_74 = arith.constant 0 : index
    %c0_75 = arith.constant 0 : index
    %72 = vector.load %arg6[%c0_74, %c0_75] : memref<64x16xf32, #tpu.memory_space<vmem>>, vector<64x16xf32>
    %73 = arith.addf %72, %71 : vector<64x16xf32>
    %c0_76 = arith.constant 0 : index
    %c0_77 = arith.constant 0 : index
    %74 = vector.load %arg6[%c0_76, %c0_77] : memref<64x16xf32, #tpu.memory_space<vmem>>, vector<64x16xf32>
    tpu.vector_store %arg6[%c0_76, %c0_77], %73 {strides = array<i32>} : memref<64x16xf32, #tpu.memory_space<vmem>>, vector<64x16xf32>,
    %75 = vector.extract_strided_slice %58 {offsets = [0, 2, 0], sizes = [8, 8, 16], strides = [1, 1, 1]} : vector<8x10x16xbf16> to vector<8x8x16xbf16>
    %76 = vector.shape_cast %75 : vector<8x8x16xbf16> to vector<64x16xbf16>
    %c2_78 = arith.constant 2 : index
    %c2_79 = arith.constant 2 : index
    %c0_80 = arith.constant 0 : index
    %c0_81 = arith.constant 0 : index
    %77 = vector.load %arg3[%c2_78, %c2_79, %c0_80, %c0_81] : memref<3x3x16x16xbf16, #tpu.memory_space<vmem>>, vector<1x1x16x16xbf16>
    %78 = vector.shape_cast %77 : vector<1x1x16x16xbf16> to vector<16x16xbf16>
    %cst_82 = arith.constant dense<0.000000e+00> : vector<64x16xf32>
    %79 = tpu.matmul %76, %78, %cst_82 {dimension_numbers = #tpu.dot_dimension_numbers<[1], [0], [0], [1], [0, 0, 1, 1], [], []>} : vector<64x16xbf16>, vector<16x16xbf16>, vector<64x16xf32> -> vector<64x16xf32>
    %c0_83 = arith.constant 0 : index
    %c0_84 = arith.constant 0 : index
    %80 = vector.load %arg6[%c0_83, %c0_84] : memref<64x16xf32, #tpu.memory_space<vmem>>, vector<64x16xf32>
    %81 = arith.addf %80, %79 : vector<64x16xf32>
    %c0_85 = arith.constant 0 : index
    %c0_86 = arith.constant 0 : index
    %82 = vector.load %arg6[%c0_85, %c0_86] : memref<64x16xf32, #tpu.memory_space<vmem>>, vector<64x16xf32>
    tpu.vector_store %arg6[%c0_85, %c0_86], %81 {strides = array<i32>} : memref<64x16xf32, #tpu.memory_space<vmem>>, vector<64x16xf32>,
    %c0_87 = arith.constant 0 : index
    %c0_88 = arith.constant 0 : index
    %83 = vector.load %arg6[%c0_87, %c0_88] : memref<64x16xf32, #tpu.memory_space<vmem>>, vector<64x16xf32>
    %c0_89 = arith.constant 0 : index
    %c0_90 = arith.constant 0 : index
    %84 = vector.load %arg4[%c0_89, %c0_90] : memref<1x16xf32, #tpu.memory_space<vmem>>, vector<1x16xf32>
    %85 = vector.broadcast %84 : vector<1x16xf32> to vector<64x16xf32>
    %86 = arith.addf %83, %85 : vector<64x16xf32>
    %cst_91 = arith.constant 0.000000e+00 : f32
    %87 = vector.broadcast %cst_91 : f32 to vector<64x16xf32>
    %88 = arith.maximumf %86, %87 : vector<64x16xf32>
    %89 = vector.shape_cast %88 : vector<64x16xf32> to vector<1x8x8x16xf32>
    %90 = arith.truncf %89 : vector<1x8x8x16xf32> to vector<1x8x8x16xbf16>
    %c0_92 = arith.constant 0 : index
    %c0_93 = arith.constant 0 : index
    %c0_94 = arith.constant 0 : index
    %c0_95 = arith.constant 0 : index
    %91 = vector.load %arg5[%c0_92, %c0_93, %c0_94, %c0_95] : memref<1x8x8x16xbf16, #tpu.memory_space<vmem>>, vector<1x8x8x16xbf16>
    tpu.vector_store %arg5[%c0_92, %c0_93, %c0_94, %c0_95], %90 {strides = array<i32>} : memref<1x8x8x16xbf16, #tpu.memory_space<vmem>>, vector<1x8x8x16xbf16>,
    return
  }
  func.func @transform_0(%arg0: i32, %arg1: i32) -> (i32, i32, i32, i32, i32) {
    %c0_i32 = arith.constant 0 : i32
    %c0_i32_0 = arith.constant 0 : i32
    %c0_i32_1 = arith.constant 0 : i32
    %c0_i32_2 = arith.constant 0 : i32
    %c0_i32_3 = arith.constant 0 : i32
    return %arg0, %c0_i32, %c0_i32_0, %c0_i32_1, %c0_i32_2 : i32, i32, i32, i32, i32
  }
  func.func @transform_1(%arg0: i32, %arg1: i32) -> (i32, i32, i32, i32) {
    %c0_i32 = arith.constant 0 : i32
    %c0_i32_0 = arith.constant 0 : i32
    %c0_i32_1 = arith.constant 0 : i32
    %c0_i32_2 = arith.constant 0 : i32
    %c0_i32_3 = arith.constant 0 : i32
    return %c0_i32, %c0_i32_0, %c0_i32_1, %c0_i32_2 : i32, i32, i32, i32
  }
  func.func @transform_2(%arg0: i32, %arg1: i32) -> (i32, i32) {
    %c0_i32 = arith.constant 0 : i32
    %c0_i32_0 = arith.constant 0 : i32
    %c0_i32_1 = arith.constant 0 : i32
    return %c0_i32, %c0_i32_0 : i32, i32
  }
  func.func @transform_3(%arg0: i32, %arg1: i32) -> (i32, i32, i32, i32) {
    %c0_i32 = arith.constant 0 : i32
    %c0_i32_0 = arith.constant 0 : i32
    %c0_i32_1 = arith.constant 0 : i32
    return %arg0, %arg1, %c0_i32, %c0_i32_0 : i32, i32, i32, i32
  }
}

module attributes {stable_mosaic.version = 11 : i64} {
  func.func @_conv3x3_kernel(%arg0: i32, %arg1: i32, %arg2: memref<1x1x10x10x16xbf16, #tpu.memory_space<vmem>>, %arg3: memref<3x3x16x32xbf16, #tpu.memory_space<vmem>>, %arg4: memref<1x32xf32, #tpu.memory_space<vmem>>, %arg5: memref<1x8x8x32xf32, #tpu.memory_space<vmem>>, %arg6: memref<64x32xf32, #tpu.memory_space<vmem>>) attributes {dimension_semantics = [#tpu.dimension_semantics<parallel>, #tpu.dimension_semantics<parallel>], iteration_bounds = array<i64: 2, 1>, scalar_prefetch = 0 : i64, scratch_operands = 1 : i64, tpu.core_type = #tpu.core_type<tc>, window_params = [{transform_indices = @transform_0, window_bounds = array<i64: 1, 1, 10, 10, 16>}, {pipeline_mode = #tpu.pipeline_mode<synchronous>, transform_indices = @transform_1, window_bounds = array<i64: 3, 3, 16, 32>}, {pipeline_mode = #tpu.pipeline_mode<synchronous>, transform_indices = @transform_2, window_bounds = array<i64: 1, 32>}, {transform_indices = @transform_3, window_bounds = array<i64: 1, 8, 8, 32>}]} {
    %c8_i32 = arith.constant 8 : i32
    %0 = arith.muli %arg1, %c8_i32 : i32
    %c0_i32 = arith.constant 0 : i32
    %1 = arith.addi %0, %c0_i32 : i32
    %c0 = arith.constant 0 : index
    %c0_0 = arith.constant 0 : index
    %2 = arith.index_cast %1 : i32 to index
    %c0_1 = arith.constant 0 : index
    %c0_2 = arith.constant 0 : index
    %3 = vector.load %arg2[%c0, %c0_0, %2, %c0_1, %c0_2] : memref<1x1x10x10x16xbf16, #tpu.memory_space<vmem>>, vector<1x1x8x10x16xbf16>
    %4 = vector.shape_cast %3 : vector<1x1x8x10x16xbf16> to vector<8x10x16xbf16>
    %5 = vector.extract_strided_slice %4 {offsets = [0, 0, 0], sizes = [8, 8, 16], strides = [1, 1, 1]} : vector<8x10x16xbf16> to vector<8x8x16xbf16>
    %6 = vector.shape_cast %5 : vector<8x8x16xbf16> to vector<64x16xbf16>
    %c0_3 = arith.constant 0 : index
    %c0_4 = arith.constant 0 : index
    %c0_5 = arith.constant 0 : index
    %c0_6 = arith.constant 0 : index
    %7 = vector.load %arg3[%c0_3, %c0_4, %c0_5, %c0_6] : memref<3x3x16x32xbf16, #tpu.memory_space<vmem>>, vector<1x1x16x32xbf16>
    %8 = vector.shape_cast %7 : vector<1x1x16x32xbf16> to vector<16x32xbf16>
    %cst = arith.constant dense<0.000000e+00> : vector<64x32xf32>
    %9 = tpu.matmul %6, %8, %cst {dimension_numbers = #tpu.dot_dimension_numbers<[1], [0], [0], [1], [0, 0, 1, 1], [], []>} : vector<64x16xbf16>, vector<16x32xbf16>, vector<64x32xf32> -> vector<64x32xf32>
    %c0_7 = arith.constant 0 : index
    %c0_8 = arith.constant 0 : index
    %10 = vector.load %arg6[%c0_7, %c0_8] : memref<64x32xf32, #tpu.memory_space<vmem>>, vector<64x32xf32>
    tpu.vector_store %arg6[%c0_7, %c0_8], %9 {strides = array<i32>} : memref<64x32xf32, #tpu.memory_space<vmem>>, vector<64x32xf32>,
    %11 = vector.extract_strided_slice %4 {offsets = [0, 1, 0], sizes = [8, 8, 16], strides = [1, 1, 1]} : vector<8x10x16xbf16> to vector<8x8x16xbf16>
    %12 = vector.shape_cast %11 : vector<8x8x16xbf16> to vector<64x16xbf16>
    %c0_9 = arith.constant 0 : index
    %c1 = arith.constant 1 : index
    %c0_10 = arith.constant 0 : index
    %c0_11 = arith.constant 0 : index
    %13 = vector.load %arg3[%c0_9, %c1, %c0_10, %c0_11] : memref<3x3x16x32xbf16, #tpu.memory_space<vmem>>, vector<1x1x16x32xbf16>
    %14 = vector.shape_cast %13 : vector<1x1x16x32xbf16> to vector<16x32xbf16>
    %cst_12 = arith.constant dense<0.000000e+00> : vector<64x32xf32>
    %15 = tpu.matmul %12, %14, %cst_12 {dimension_numbers = #tpu.dot_dimension_numbers<[1], [0], [0], [1], [0, 0, 1, 1], [], []>} : vector<64x16xbf16>, vector<16x32xbf16>, vector<64x32xf32> -> vector<64x32xf32>
    %c0_13 = arith.constant 0 : index
    %c0_14 = arith.constant 0 : index
    %16 = vector.load %arg6[%c0_13, %c0_14] : memref<64x32xf32, #tpu.memory_space<vmem>>, vector<64x32xf32>
    %17 = arith.addf %16, %15 : vector<64x32xf32>
    %c0_15 = arith.constant 0 : index
    %c0_16 = arith.constant 0 : index
    %18 = vector.load %arg6[%c0_15, %c0_16] : memref<64x32xf32, #tpu.memory_space<vmem>>, vector<64x32xf32>
    tpu.vector_store %arg6[%c0_15, %c0_16], %17 {strides = array<i32>} : memref<64x32xf32, #tpu.memory_space<vmem>>, vector<64x32xf32>,
    %19 = vector.extract_strided_slice %4 {offsets = [0, 2, 0], sizes = [8, 8, 16], strides = [1, 1, 1]} : vector<8x10x16xbf16> to vector<8x8x16xbf16>
    %20 = vector.shape_cast %19 : vector<8x8x16xbf16> to vector<64x16xbf16>
    %c0_17 = arith.constant 0 : index
    %c2 = arith.constant 2 : index
    %c0_18 = arith.constant 0 : index
    %c0_19 = arith.constant 0 : index
    %21 = vector.load %arg3[%c0_17, %c2, %c0_18, %c0_19] : memref<3x3x16x32xbf16, #tpu.memory_space<vmem>>, vector<1x1x16x32xbf16>
    %22 = vector.shape_cast %21 : vector<1x1x16x32xbf16> to vector<16x32xbf16>
    %cst_20 = arith.constant dense<0.000000e+00> : vector<64x32xf32>
    %23 = tpu.matmul %20, %22, %cst_20 {dimension_numbers = #tpu.dot_dimension_numbers<[1], [0], [0], [1], [0, 0, 1, 1], [], []>} : vector<64x16xbf16>, vector<16x32xbf16>, vector<64x32xf32> -> vector<64x32xf32>
    %c0_21 = arith.constant 0 : index
    %c0_22 = arith.constant 0 : index
    %24 = vector.load %arg6[%c0_21, %c0_22] : memref<64x32xf32, #tpu.memory_space<vmem>>, vector<64x32xf32>
    %25 = arith.addf %24, %23 : vector<64x32xf32>
    %c0_23 = arith.constant 0 : index
    %c0_24 = arith.constant 0 : index
    %26 = vector.load %arg6[%c0_23, %c0_24] : memref<64x32xf32, #tpu.memory_space<vmem>>, vector<64x32xf32>
    tpu.vector_store %arg6[%c0_23, %c0_24], %25 {strides = array<i32>} : memref<64x32xf32, #tpu.memory_space<vmem>>, vector<64x32xf32>,
    %c1_i32 = arith.constant 1 : i32
    %27 = arith.addi %0, %c1_i32 : i32
    %c0_25 = arith.constant 0 : index
    %c0_26 = arith.constant 0 : index
    %28 = arith.index_cast %27 : i32 to index
    %c0_27 = arith.constant 0 : index
    %c0_28 = arith.constant 0 : index
    %29 = vector.load %arg2[%c0_25, %c0_26, %28, %c0_27, %c0_28] : memref<1x1x10x10x16xbf16, #tpu.memory_space<vmem>>, vector<1x1x8x10x16xbf16>
    %30 = vector.shape_cast %29 : vector<1x1x8x10x16xbf16> to vector<8x10x16xbf16>
    %31 = vector.extract_strided_slice %30 {offsets = [0, 0, 0], sizes = [8, 8, 16], strides = [1, 1, 1]} : vector<8x10x16xbf16> to vector<8x8x16xbf16>
    %32 = vector.shape_cast %31 : vector<8x8x16xbf16> to vector<64x16xbf16>
    %c1_29 = arith.constant 1 : index
    %c0_30 = arith.constant 0 : index
    %c0_31 = arith.constant 0 : index
    %c0_32 = arith.constant 0 : index
    %33 = vector.load %arg3[%c1_29, %c0_30, %c0_31, %c0_32] : memref<3x3x16x32xbf16, #tpu.memory_space<vmem>>, vector<1x1x16x32xbf16>
    %34 = vector.shape_cast %33 : vector<1x1x16x32xbf16> to vector<16x32xbf16>
    %cst_33 = arith.constant dense<0.000000e+00> : vector<64x32xf32>
    %35 = tpu.matmul %32, %34, %cst_33 {dimension_numbers = #tpu.dot_dimension_numbers<[1], [0], [0], [1], [0, 0, 1, 1], [], []>} : vector<64x16xbf16>, vector<16x32xbf16>, vector<64x32xf32> -> vector<64x32xf32>
    %c0_34 = arith.constant 0 : index
    %c0_35 = arith.constant 0 : index
    %36 = vector.load %arg6[%c0_34, %c0_35] : memref<64x32xf32, #tpu.memory_space<vmem>>, vector<64x32xf32>
    %37 = arith.addf %36, %35 : vector<64x32xf32>
    %c0_36 = arith.constant 0 : index
    %c0_37 = arith.constant 0 : index
    %38 = vector.load %arg6[%c0_36, %c0_37] : memref<64x32xf32, #tpu.memory_space<vmem>>, vector<64x32xf32>
    tpu.vector_store %arg6[%c0_36, %c0_37], %37 {strides = array<i32>} : memref<64x32xf32, #tpu.memory_space<vmem>>, vector<64x32xf32>,
    %39 = vector.extract_strided_slice %30 {offsets = [0, 1, 0], sizes = [8, 8, 16], strides = [1, 1, 1]} : vector<8x10x16xbf16> to vector<8x8x16xbf16>
    %40 = vector.shape_cast %39 : vector<8x8x16xbf16> to vector<64x16xbf16>
    %c1_38 = arith.constant 1 : index
    %c1_39 = arith.constant 1 : index
    %c0_40 = arith.constant 0 : index
    %c0_41 = arith.constant 0 : index
    %41 = vector.load %arg3[%c1_38, %c1_39, %c0_40, %c0_41] : memref<3x3x16x32xbf16, #tpu.memory_space<vmem>>, vector<1x1x16x32xbf16>
    %42 = vector.shape_cast %41 : vector<1x1x16x32xbf16> to vector<16x32xbf16>
    %cst_42 = arith.constant dense<0.000000e+00> : vector<64x32xf32>
    %43 = tpu.matmul %40, %42, %cst_42 {dimension_numbers = #tpu.dot_dimension_numbers<[1], [0], [0], [1], [0, 0, 1, 1], [], []>} : vector<64x16xbf16>, vector<16x32xbf16>, vector<64x32xf32> -> vector<64x32xf32>
    %c0_43 = arith.constant 0 : index
    %c0_44 = arith.constant 0 : index
    %44 = vector.load %arg6[%c0_43, %c0_44] : memref<64x32xf32, #tpu.memory_space<vmem>>, vector<64x32xf32>
    %45 = arith.addf %44, %43 : vector<64x32xf32>
    %c0_45 = arith.constant 0 : index
    %c0_46 = arith.constant 0 : index
    %46 = vector.load %arg6[%c0_45, %c0_46] : memref<64x32xf32, #tpu.memory_space<vmem>>, vector<64x32xf32>
    tpu.vector_store %arg6[%c0_45, %c0_46], %45 {strides = array<i32>} : memref<64x32xf32, #tpu.memory_space<vmem>>, vector<64x32xf32>,
    %47 = vector.extract_strided_slice %30 {offsets = [0, 2, 0], sizes = [8, 8, 16], strides = [1, 1, 1]} : vector<8x10x16xbf16> to vector<8x8x16xbf16>
    %48 = vector.shape_cast %47 : vector<8x8x16xbf16> to vector<64x16xbf16>
    %c1_47 = arith.constant 1 : index
    %c2_48 = arith.constant 2 : index
    %c0_49 = arith.constant 0 : index
    %c0_50 = arith.constant 0 : index
    %49 = vector.load %arg3[%c1_47, %c2_48, %c0_49, %c0_50] : memref<3x3x16x32xbf16, #tpu.memory_space<vmem>>, vector<1x1x16x32xbf16>
    %50 = vector.shape_cast %49 : vector<1x1x16x32xbf16> to vector<16x32xbf16>
    %cst_51 = arith.constant dense<0.000000e+00> : vector<64x32xf32>
    %51 = tpu.matmul %48, %50, %cst_51 {dimension_numbers = #tpu.dot_dimension_numbers<[1], [0], [0], [1], [0, 0, 1, 1], [], []>} : vector<64x16xbf16>, vector<16x32xbf16>, vector<64x32xf32> -> vector<64x32xf32>
    %c0_52 = arith.constant 0 : index
    %c0_53 = arith.constant 0 : index
    %52 = vector.load %arg6[%c0_52, %c0_53] : memref<64x32xf32, #tpu.memory_space<vmem>>, vector<64x32xf32>
    %53 = arith.addf %52, %51 : vector<64x32xf32>
    %c0_54 = arith.constant 0 : index
    %c0_55 = arith.constant 0 : index
    %54 = vector.load %arg6[%c0_54, %c0_55] : memref<64x32xf32, #tpu.memory_space<vmem>>, vector<64x32xf32>
    tpu.vector_store %arg6[%c0_54, %c0_55], %53 {strides = array<i32>} : memref<64x32xf32, #tpu.memory_space<vmem>>, vector<64x32xf32>,
    %c2_i32 = arith.constant 2 : i32
    %55 = arith.addi %0, %c2_i32 : i32
    %c0_56 = arith.constant 0 : index
    %c0_57 = arith.constant 0 : index
    %56 = arith.index_cast %55 : i32 to index
    %c0_58 = arith.constant 0 : index
    %c0_59 = arith.constant 0 : index
    %57 = vector.load %arg2[%c0_56, %c0_57, %56, %c0_58, %c0_59] : memref<1x1x10x10x16xbf16, #tpu.memory_space<vmem>>, vector<1x1x8x10x16xbf16>
    %58 = vector.shape_cast %57 : vector<1x1x8x10x16xbf16> to vector<8x10x16xbf16>
    %59 = vector.extract_strided_slice %58 {offsets = [0, 0, 0], sizes = [8, 8, 16], strides = [1, 1, 1]} : vector<8x10x16xbf16> to vector<8x8x16xbf16>
    %60 = vector.shape_cast %59 : vector<8x8x16xbf16> to vector<64x16xbf16>
    %c2_60 = arith.constant 2 : index
    %c0_61 = arith.constant 0 : index
    %c0_62 = arith.constant 0 : index
    %c0_63 = arith.constant 0 : index
    %61 = vector.load %arg3[%c2_60, %c0_61, %c0_62, %c0_63] : memref<3x3x16x32xbf16, #tpu.memory_space<vmem>>, vector<1x1x16x32xbf16>
    %62 = vector.shape_cast %61 : vector<1x1x16x32xbf16> to vector<16x32xbf16>
    %cst_64 = arith.constant dense<0.000000e+00> : vector<64x32xf32>
    %63 = tpu.matmul %60, %62, %cst_64 {dimension_numbers = #tpu.dot_dimension_numbers<[1], [0], [0], [1], [0, 0, 1, 1], [], []>} : vector<64x16xbf16>, vector<16x32xbf16>, vector<64x32xf32> -> vector<64x32xf32>
    %c0_65 = arith.constant 0 : index
    %c0_66 = arith.constant 0 : index
    %64 = vector.load %arg6[%c0_65, %c0_66] : memref<64x32xf32, #tpu.memory_space<vmem>>, vector<64x32xf32>
    %65 = arith.addf %64, %63 : vector<64x32xf32>
    %c0_67 = arith.constant 0 : index
    %c0_68 = arith.constant 0 : index
    %66 = vector.load %arg6[%c0_67, %c0_68] : memref<64x32xf32, #tpu.memory_space<vmem>>, vector<64x32xf32>
    tpu.vector_store %arg6[%c0_67, %c0_68], %65 {strides = array<i32>} : memref<64x32xf32, #tpu.memory_space<vmem>>, vector<64x32xf32>,
    %67 = vector.extract_strided_slice %58 {offsets = [0, 1, 0], sizes = [8, 8, 16], strides = [1, 1, 1]} : vector<8x10x16xbf16> to vector<8x8x16xbf16>
    %68 = vector.shape_cast %67 : vector<8x8x16xbf16> to vector<64x16xbf16>
    %c2_69 = arith.constant 2 : index
    %c1_70 = arith.constant 1 : index
    %c0_71 = arith.constant 0 : index
    %c0_72 = arith.constant 0 : index
    %69 = vector.load %arg3[%c2_69, %c1_70, %c0_71, %c0_72] : memref<3x3x16x32xbf16, #tpu.memory_space<vmem>>, vector<1x1x16x32xbf16>
    %70 = vector.shape_cast %69 : vector<1x1x16x32xbf16> to vector<16x32xbf16>
    %cst_73 = arith.constant dense<0.000000e+00> : vector<64x32xf32>
    %71 = tpu.matmul %68, %70, %cst_73 {dimension_numbers = #tpu.dot_dimension_numbers<[1], [0], [0], [1], [0, 0, 1, 1], [], []>} : vector<64x16xbf16>, vector<16x32xbf16>, vector<64x32xf32> -> vector<64x32xf32>
    %c0_74 = arith.constant 0 : index
    %c0_75 = arith.constant 0 : index
    %72 = vector.load %arg6[%c0_74, %c0_75] : memref<64x32xf32, #tpu.memory_space<vmem>>, vector<64x32xf32>
    %73 = arith.addf %72, %71 : vector<64x32xf32>
    %c0_76 = arith.constant 0 : index
    %c0_77 = arith.constant 0 : index
    %74 = vector.load %arg6[%c0_76, %c0_77] : memref<64x32xf32, #tpu.memory_space<vmem>>, vector<64x32xf32>
    tpu.vector_store %arg6[%c0_76, %c0_77], %73 {strides = array<i32>} : memref<64x32xf32, #tpu.memory_space<vmem>>, vector<64x32xf32>,
    %75 = vector.extract_strided_slice %58 {offsets = [0, 2, 0], sizes = [8, 8, 16], strides = [1, 1, 1]} : vector<8x10x16xbf16> to vector<8x8x16xbf16>
    %76 = vector.shape_cast %75 : vector<8x8x16xbf16> to vector<64x16xbf16>
    %c2_78 = arith.constant 2 : index
    %c2_79 = arith.constant 2 : index
    %c0_80 = arith.constant 0 : index
    %c0_81 = arith.constant 0 : index
    %77 = vector.load %arg3[%c2_78, %c2_79, %c0_80, %c0_81] : memref<3x3x16x32xbf16, #tpu.memory_space<vmem>>, vector<1x1x16x32xbf16>
    %78 = vector.shape_cast %77 : vector<1x1x16x32xbf16> to vector<16x32xbf16>
    %cst_82 = arith.constant dense<0.000000e+00> : vector<64x32xf32>
    %79 = tpu.matmul %76, %78, %cst_82 {dimension_numbers = #tpu.dot_dimension_numbers<[1], [0], [0], [1], [0, 0, 1, 1], [], []>} : vector<64x16xbf16>, vector<16x32xbf16>, vector<64x32xf32> -> vector<64x32xf32>
    %c0_83 = arith.constant 0 : index
    %c0_84 = arith.constant 0 : index
    %80 = vector.load %arg6[%c0_83, %c0_84] : memref<64x32xf32, #tpu.memory_space<vmem>>, vector<64x32xf32>
    %81 = arith.addf %80, %79 : vector<64x32xf32>
    %c0_85 = arith.constant 0 : index
    %c0_86 = arith.constant 0 : index
    %82 = vector.load %arg6[%c0_85, %c0_86] : memref<64x32xf32, #tpu.memory_space<vmem>>, vector<64x32xf32>
    tpu.vector_store %arg6[%c0_85, %c0_86], %81 {strides = array<i32>} : memref<64x32xf32, #tpu.memory_space<vmem>>, vector<64x32xf32>,
    %c0_87 = arith.constant 0 : index
    %c0_88 = arith.constant 0 : index
    %83 = vector.load %arg6[%c0_87, %c0_88] : memref<64x32xf32, #tpu.memory_space<vmem>>, vector<64x32xf32>
    %c0_89 = arith.constant 0 : index
    %c0_90 = arith.constant 0 : index
    %84 = vector.load %arg4[%c0_89, %c0_90] : memref<1x32xf32, #tpu.memory_space<vmem>>, vector<1x32xf32>
    %85 = vector.broadcast %84 : vector<1x32xf32> to vector<64x32xf32>
    %86 = arith.addf %83, %85 : vector<64x32xf32>
    %cst_91 = arith.constant 0.000000e+00 : f32
    %87 = vector.broadcast %cst_91 : f32 to vector<64x32xf32>
    %88 = arith.maximumf %86, %87 : vector<64x32xf32>
    %89 = vector.shape_cast %88 : vector<64x32xf32> to vector<1x8x8x32xf32>
    %c0_92 = arith.constant 0 : index
    %c0_93 = arith.constant 0 : index
    %c0_94 = arith.constant 0 : index
    %c0_95 = arith.constant 0 : index
    %90 = vector.load %arg5[%c0_92, %c0_93, %c0_94, %c0_95] : memref<1x8x8x32xf32, #tpu.memory_space<vmem>>, vector<1x8x8x32xf32>
    tpu.vector_store %arg5[%c0_92, %c0_93, %c0_94, %c0_95], %89 {strides = array<i32>} : memref<1x8x8x32xf32, #tpu.memory_space<vmem>>, vector<1x8x8x32xf32>,
    return
  }
  func.func @transform_0(%arg0: i32, %arg1: i32) -> (i32, i32, i32, i32, i32) {
    %c0_i32 = arith.constant 0 : i32
    %c0_i32_0 = arith.constant 0 : i32
    %c0_i32_1 = arith.constant 0 : i32
    %c0_i32_2 = arith.constant 0 : i32
    %c0_i32_3 = arith.constant 0 : i32
    return %arg0, %c0_i32, %c0_i32_0, %c0_i32_1, %c0_i32_2 : i32, i32, i32, i32, i32
  }
  func.func @transform_1(%arg0: i32, %arg1: i32) -> (i32, i32, i32, i32) {
    %c0_i32 = arith.constant 0 : i32
    %c0_i32_0 = arith.constant 0 : i32
    %c0_i32_1 = arith.constant 0 : i32
    %c0_i32_2 = arith.constant 0 : i32
    %c0_i32_3 = arith.constant 0 : i32
    return %c0_i32, %c0_i32_0, %c0_i32_1, %c0_i32_2 : i32, i32, i32, i32
  }
  func.func @transform_2(%arg0: i32, %arg1: i32) -> (i32, i32) {
    %c0_i32 = arith.constant 0 : i32
    %c0_i32_0 = arith.constant 0 : i32
    %c0_i32_1 = arith.constant 0 : i32
    return %c0_i32, %c0_i32_0 : i32, i32
  }
  func.func @transform_3(%arg0: i32, %arg1: i32) -> (i32, i32, i32, i32) {
    %c0_i32 = arith.constant 0 : i32
    %c0_i32_0 = arith.constant 0 : i32
    %c0_i32_1 = arith.constant 0 : i32
    return %arg0, %arg1, %c0_i32, %c0_i32_0 : i32, i32, i32, i32
  }
}

module attributes {stable_mosaic.version = 11 : i64} {
  func.func @_maxpool3x3_kernel(%arg0: i32, %arg1: i32, %arg2: memref<1x4x5x5x32xf32, #tpu.memory_space<vmem>>, %arg3: memref<1x4x4x32xf32, #tpu.memory_space<vmem>>) attributes {dimension_semantics = [#tpu.dimension_semantics<parallel>, #tpu.dimension_semantics<parallel>], iteration_bounds = array<i64: 2, 1>, scalar_prefetch = 0 : i64, scratch_operands = 0 : i64, tpu.core_type = #tpu.core_type<tc>, window_params = [{transform_indices = @transform_0, window_bounds = array<i64: 1, 4, 5, 5, 32>}, {transform_indices = @transform_1, window_bounds = array<i64: 1, 4, 4, 32>}]} {
    %c4_i32 = arith.constant 4 : i32
    %0 = arith.muli %arg1, %c4_i32 : i32
    %c0_i32 = arith.constant 0 : i32
    %1 = arith.addi %0, %c0_i32 : i32
    %c0 = arith.constant 0 : index
    %c0_0 = arith.constant 0 : index
    %2 = arith.index_cast %1 : i32 to index
    %c0_1 = arith.constant 0 : index
    %c0_2 = arith.constant 0 : index
    %3 = vector.load %arg2[%c0, %c0_0, %2, %c0_1, %c0_2] : memref<1x4x5x5x32xf32, #tpu.memory_space<vmem>>, vector<1x1x4x5x32xf32>
    %4 = vector.shape_cast %3 : vector<1x1x4x5x32xf32> to vector<4x5x32xf32>
    %c0_i32_3 = arith.constant 0 : i32
    %5 = arith.addi %0, %c0_i32_3 : i32
    %c0_4 = arith.constant 0 : index
    %c1 = arith.constant 1 : index
    %6 = arith.index_cast %5 : i32 to index
    %c0_5 = arith.constant 0 : index
    %c0_6 = arith.constant 0 : index
    %7 = vector.load %arg2[%c0_4, %c1, %6, %c0_5, %c0_6] : memref<1x4x5x5x32xf32, #tpu.memory_space<vmem>>, vector<1x1x4x5x32xf32>
    %8 = vector.shape_cast %7 : vector<1x1x4x5x32xf32> to vector<4x5x32xf32>
    %9 = vector.extract_strided_slice %4 {offsets = [0, 0, 0], sizes = [4, 4, 32], strides = [1, 1, 1]} : vector<4x5x32xf32> to vector<4x4x32xf32>
    %10 = vector.extract_strided_slice %8 {offsets = [0, 0, 0], sizes = [4, 4, 32], strides = [1, 1, 1]} : vector<4x5x32xf32> to vector<4x4x32xf32>
    %11 = arith.maximumf %9, %10 : vector<4x4x32xf32>
    %12 = vector.extract_strided_slice %4 {offsets = [0, 1, 0], sizes = [4, 4, 32], strides = [1, 1, 1]} : vector<4x5x32xf32> to vector<4x4x32xf32>
    %13 = arith.maximumf %11, %12 : vector<4x4x32xf32>
    %c0_i32_7 = arith.constant 0 : i32
    %14 = arith.addi %0, %c0_i32_7 : i32
    %c0_8 = arith.constant 0 : index
    %c2 = arith.constant 2 : index
    %15 = arith.index_cast %14 : i32 to index
    %c0_9 = arith.constant 0 : index
    %c0_10 = arith.constant 0 : index
    %16 = vector.load %arg2[%c0_8, %c2, %15, %c0_9, %c0_10] : memref<1x4x5x5x32xf32, #tpu.memory_space<vmem>>, vector<1x1x4x5x32xf32>
    %17 = vector.shape_cast %16 : vector<1x1x4x5x32xf32> to vector<4x5x32xf32>
    %c0_i32_11 = arith.constant 0 : i32
    %18 = arith.addi %0, %c0_i32_11 : i32
    %c0_12 = arith.constant 0 : index
    %c3 = arith.constant 3 : index
    %19 = arith.index_cast %18 : i32 to index
    %c0_13 = arith.constant 0 : index
    %c0_14 = arith.constant 0 : index
    %20 = vector.load %arg2[%c0_12, %c3, %19, %c0_13, %c0_14] : memref<1x4x5x5x32xf32, #tpu.memory_space<vmem>>, vector<1x1x4x5x32xf32>
    %21 = vector.shape_cast %20 : vector<1x1x4x5x32xf32> to vector<4x5x32xf32>
    %22 = vector.extract_strided_slice %17 {offsets = [0, 0, 0], sizes = [4, 4, 32], strides = [1, 1, 1]} : vector<4x5x32xf32> to vector<4x4x32xf32>
    %23 = arith.maximumf %13, %22 : vector<4x4x32xf32>
    %24 = vector.extract_strided_slice %21 {offsets = [0, 0, 0], sizes = [4, 4, 32], strides = [1, 1, 1]} : vector<4x5x32xf32> to vector<4x4x32xf32>
    %25 = arith.maximumf %23, %24 : vector<4x4x32xf32>
    %26 = vector.extract_strided_slice %17 {offsets = [0, 1, 0], sizes = [4, 4, 32], strides = [1, 1, 1]} : vector<4x5x32xf32> to vector<4x4x32xf32>
    %27 = arith.maximumf %25, %26 : vector<4x4x32xf32>
    %c1_i32 = arith.constant 1 : i32
    %28 = arith.addi %0, %c1_i32 : i32
    %c0_15 = arith.constant 0 : index
    %c0_16 = arith.constant 0 : index
    %29 = arith.index_cast %28 : i32 to index
    %c0_17 = arith.constant 0 : index
    %c0_18 = arith.constant 0 : index
    %30 = vector.load %arg2[%c0_15, %c0_16, %29, %c0_17, %c0_18] : memref<1x4x5x5x32xf32, #tpu.memory_space<vmem>>, vector<1x1x4x5x32xf32>
    %31 = vector.shape_cast %30 : vector<1x1x4x5x32xf32> to vector<4x5x32xf32>
    %c1_i32_19 = arith.constant 1 : i32
    %32 = arith.addi %0, %c1_i32_19 : i32
    %c0_20 = arith.constant 0 : index
    %c1_21 = arith.constant 1 : index
    %33 = arith.index_cast %32 : i32 to index
    %c0_22 = arith.constant 0 : index
    %c0_23 = arith.constant 0 : index
    %34 = vector.load %arg2[%c0_20, %c1_21, %33, %c0_22, %c0_23] : memref<1x4x5x5x32xf32, #tpu.memory_space<vmem>>, vector<1x1x4x5x32xf32>
    %35 = vector.shape_cast %34 : vector<1x1x4x5x32xf32> to vector<4x5x32xf32>
    %36 = vector.extract_strided_slice %31 {offsets = [0, 0, 0], sizes = [4, 4, 32], strides = [1, 1, 1]} : vector<4x5x32xf32> to vector<4x4x32xf32>
    %37 = arith.maximumf %27, %36 : vector<4x4x32xf32>
    %38 = vector.extract_strided_slice %35 {offsets = [0, 0, 0], sizes = [4, 4, 32], strides = [1, 1, 1]} : vector<4x5x32xf32> to vector<4x4x32xf32>
    %39 = arith.maximumf %37, %38 : vector<4x4x32xf32>
    %40 = vector.extract_strided_slice %31 {offsets = [0, 1, 0], sizes = [4, 4, 32], strides = [1, 1, 1]} : vector<4x5x32xf32> to vector<4x4x32xf32>
    %41 = arith.maximumf %39, %40 : vector<4x4x32xf32>
    %42 = vector.shape_cast %41 : vector<4x4x32xf32> to vector<1x4x4x32xf32>
    %c0_24 = arith.constant 0 : index
    %c0_25 = arith.constant 0 : index
    %c0_26 = arith.constant 0 : index
    %c0_27 = arith.constant 0 : index
    %43 = vector.load %arg3[%c0_24, %c0_25, %c0_26, %c0_27] : memref<1x4x4x32xf32, #tpu.memory_space<vmem>>, vector<1x4x4x32xf32>
    tpu.vector_store %arg3[%c0_24, %c0_25, %c0_26, %c0_27], %42 {strides = array<i32>} : memref<1x4x4x32xf32, #tpu.memory_space<vmem>>, vector<1x4x4x32xf32>,
    return
  }
  func.func @transform_0(%arg0: i32, %arg1: i32) -> (i32, i32, i32, i32, i32) {
    %c0_i32 = arith.constant 0 : i32
    %c0_i32_0 = arith.constant 0 : i32
    %c0_i32_1 = arith.constant 0 : i32
    %c0_i32_2 = arith.constant 0 : i32
    %c0_i32_3 = arith.constant 0 : i32
    return %arg0, %c0_i32, %c0_i32_0, %c0_i32_1, %c0_i32_2 : i32, i32, i32, i32, i32
  }
  func.func @transform_1(%arg0: i32, %arg1: i32) -> (i32, i32, i32, i32) {
    %c0_i32 = arith.constant 0 : i32
    %c0_i32_0 = arith.constant 0 : i32
    %c0_i32_1 = arith.constant 0 : i32
    return %arg0, %arg1, %c0_i32, %c0_i32_0 : i32, i32, i32, i32
  }
}

</mosaic_0001>

<bundles_post_ra>
// kernel: rtdetr_resnet_embeddings.4
= control target key start
LH: loop header
LB: loop body
LE: loop exit
PB: predicated region body
PF: predicated region fallthrough
CT: control target
= control target key end

     0   :  { %s2262_s12 = smov 0   ;;  %s2264_s13 = smov 0   ;;  %s2659_s0 = inlined_call_operand.vmem [shape: bf16[2,4,9,9,8], index: 0, kind: input, shape index: {}]   ;;  %s2660_s1 = inlined_call_operand.vmem [shape: bf16[3,3,8,16], index: 1, kind: input, shape index: {}]   ;;  %s2661_s2 = inlined_call_operand.vmem [shape: f32[1,16], index: 2, kind: input, shape index: {}]   ;;  %s2662_s3 = inlined_call_operand.vmem [shape: bf16[2,8,8,16], index: 3, kind: output, shape index: {}]  }
   0x1   :  { %s2266_s14 = smov 0  }
   0x2 LB: > { %s25_s15 = sadd.s32 1, %s2236_s13  ;;  %p1878_p0 = scmp.ge.s32.totalorder %s2240_s14, 1  ;;  %s2240_s14 = sphi %s2266_s14, %s13_s14   ;;  %s2236_s13 = sphi %s2264_s13, %s2666_s13   ;;  %s2232_s12 = sphi %s2262_s12, %s2665_s12  }
   0x3   : > { %p27_p1 = scmp.ge.s32.totalorder %s25_s15, 2  ;;  %p151_p2 = scmp.lt.s32.totalorder %s2240_s14, 3 }
   0x5   : > { %s2668_s15 = smov (%p27_p1, %s25_s15), 0  ;;  %p152_p3 = pnand %p1878_p0, %p151_p2 }
   0x6   : > { %p179_p4 = scmp.lt.s32.totalorder (!%p152_p3), %s2232_s12, 1 }
   0x7   : > { %155 = sbr.rel (%p152_p3) target bundleno = 331 (0x14b), region = 32 }
   0xc   : > { %v226_v0 = vld [vmem:[%s2660_s1] sm:$0xf]  ;;  %vm260_vm0 = vcmask 1043456   ;;  %v1898_v2 = vld [vmem:[%s2660_s1 + $0x4] sm:$0xf]  ;;  %s2670_s12 = smov (!%p179_p4, %s2232_s12), 1 }
   0xd   : > { %2160 = vmatprep.subr.msk.bf16.mxu1 %vm260_vm0, %v226_v0  ;;  %2159 = vmatprep.subr.msk.bf16.mxu0 %vm260_vm0, %v226_v0  ;;  %v262_v1 = vsel %vm260_vm0, %v226_v0, 0  ;;  %v1907_v3 = vld [vmem:[%s2660_s1 + $0x8] sm:$0xf]  ;;  %v2299_v4 = vld [vmem:[%s2660_s1 + $0xc] sm:$0xf]  ;;  %s2169_s26 = smul.u32 288, %s2670_s12 }
   0xe   : > { %2158 = vmatpush3.bf16.msra.mxu1 %v262_v1  ;;  %2068 = vmatpush3.bf16.msra.mxu0 %v262_v1  ;;  %v1949_v5 = vld [vmem:[%s2660_s1 + $0x10] sm:$0xf]  ;;  %v2308_v6 = vld [vmem:[%s2660_s1 + $0x14] sm:$0xf]  ;;  %vm247_vm1 = vcmask 64512   ;;  %v2311_v7 = vsel %vm260_vm0, %v1898_v2, 0 }
   0xf   : > { %2161 = vmatprep.subr.msk.bf16.mxu1 %vm260_vm0, %v1898_v2  ;;  %2162 = vmatprep.subr.msk.bf16.mxu0 %vm260_vm0, %v1907_v3  ;;  %s2316_s4 = scalar_lea.vmem %s2659_s0, %s2169_s26  ;;  %v606_v8 = vsel %vm260_vm0, %v1907_v3, 0  ;;  %v2321_v9 = vsel %vm260_vm0, %v2299_v4, 0  ;;  %v2324_v10 = vsel %vm260_vm0, %v1949_v5, 0  ;;  %v2328_v11 = vsel %vm260_vm0, %v2308_v6, 0  ;;  %v2338_v25 = vld [vmem:[%s2660_s1 + $0x18] sm:$0xf] }
  0x10   : > { %v199_v12 = vld [vmem:[%s2316_s4] sm:$0xf]  ;;  %v201_v13 = vld [vmem:[%s2316_s4 + $0x8] sm:$0xf]  ;;  %vm464_vm2 = vsmask.f32 3328 }
  0x11   : > { %v207_v14 = vld [vmem:[%s2316_s4 + $0x20] sm:$0xf]  ;;  %v1890_v15 = vcombine.low %v199_v12, %v201_v13  ;;  %v468_v16 = vshrl.u32 %v199_v12, 16  ;;  %v471_v17 = vshll.u32 %v199_v12, 16  ;;  %v482_v18 = vshrl.u32 %v201_v13, 16  ;;  %s2021_s17 = sshll.u32 %s2670_s12, 5 }
  0x12   : > { %v209_v19 = vld [vmem:[%s2316_s4 + $0x28] sm:$0xf]  ;;  %vm465_vm3 = vsmask.f32 7440  ;;  %v485_v20 = vshll.u32 %v201_v13, 16  ;;  %v524_v22 = vshrl.u32 %v207_v14, 16  ;;  %s2630_s20 = scalar_lea.vmem %s2662_s3, %s2021_s17 }
  0x13   : > { %v1892_v21 = vcombine.low %v207_v14, %v209_v19  ;;  %v527_v23 = vshll.u32 %v207_v14, 16  ;;  %v203_v24 = vld [vmem:[%s2316_s4 + $0x10] sm:$0xf]  ;;  %2069 = vmatprep.mubr.msk.bf16.mxu0 %vm247_vm1, %v1890_v15  ;;  %v470_v26 = vrot.slane %v468_v16, 4  ;;  %v473_v27 = vrot.slane %v471_v17, 5  ;;  %vm2361_vm4 = vmor %vm464_vm2, %vm465_vm3 }
  0x14   : > { %v484_v28 = vrot.slane %v482_v18, 4  ;;  %v538_v29 = vshrl.u32 %v209_v19, 16  ;;  %v205_v30 = vld [vmem:[%s2316_s4 + $0x18] sm:$0xf]  ;;  %v487_v31 = vrot.slane %v485_v20, 5  ;;  %v526_v32 = vrot.slane %v524_v22, 4 }
  0x15   : > { %2073 = vmatprep.mubr.msk.bf16.mxu1 %vm247_vm1, %v1892_v21  ;;  %v529_v33 = vrot.slane %v527_v23, 5  ;;  %v541_v34 = vshll.u32 %v209_v19, 16  ;;  %v211_v35 = vld [vmem:[%s2316_s4 + $0x30] sm:$0xf]  ;;  %v474_v36 = vor.u32 %v473_v27, %v470_v26  ;;  %v1891_v38 = vcombine.low %v203_v24, %v205_v30  ;;  %v213_v40 = vld [vmem:[%s2316_s4 + $0x38] sm:$0xf] }
  0x16   : > { %v540_v37 = vrot.slane %v538_v29, 4  ;;  %v496_v39 = vshrl.u32 %v203_v24, 16  ;;  %v488_v41 = vor.u32 %v487_v31, %v484_v28  ;;  %v499_v44 = vshll.u32 %v203_v24, 16  ;;  %v2198_v45 = vld [vmem:[%s2316_s4 + $0x48] ss:$8 sps:$4 sm:$0xff]  }
  0x17   : > { %v530_v42 = vor.u32 %v529_v33, %v526_v32  ;;  %v543_v43 = vrot.slane %v541_v34, 5  ;;  %2070 = vmatmul.mubr.msk.bf16.vlgmr.msra.gmra.mxu0 %vm247_vm1, %v1891_v38  ;;  %v510_v47 = vshrl.u32 %v205_v30, 16  ;;  %v513_v48 = vshll.u32 %v205_v30, 16  ;;  %v200_v62 = vld [vmem:[%s2316_s4 + $0x4] sm:$0x1] }
  0x18   : > { %v498_v46 = vrot.slane %v496_v39, 4  ;;  %v2349_v49 = vsel %vm260_vm0, %v2338_v25, 0  ;;  %v475_v50 = vrot.slane %v474_v36, 4  ;;  %v489_v51 = vrot.slane %v488_v41, 4  ;;  %2088 = vmatpush3.bf16.msra.mxu0 %v606_v8  ;;  %v202_v2 = vld [vmem:[%s2316_s4 + $0xc] sm:$0x1] }
  0x19   : > { %v2351_v52 = vrot.slane %v530_v42, 4  ;;  %v501_v53 = vrot.slane %v499_v44, 5  ;;  %v512_v54 = vrot.slane %v510_v47, 4  ;;  %v515_v55 = vrot.slane %v513_v48, 5  ;;  %2164 = vmatprep.subr.msk.bf16.mxu0 %vm260_vm0, %v1949_v5  ;;  %v204_v15 = vld [vmem:[%s2316_s4 + $0x14] sm:$0x1] }
  0x1a   : > { %v1893_v56 = vcombine.low %v211_v35, %v213_v40  ;;  %v552_v57 = vshrl.u32 %v211_v35, 16  ;;  %v544_v58 = vor.u32 %v543_v43, %v540_v37  ;;  %v555_v60 = vshll.u32 %v211_v35, 16  ;;  %v206_v19 = vld [vmem:[%s2316_s4 + $0x1c] sm:$0x1]  ;;  %v2199_v26 = vld [vmem:[%s2316_s4 + $0x58] ss:$8 sps:$4 sm:$0xff]  }
  0x1b   : > { %v502_v59 = vor.u32 %v501_v53, %v498_v46  ;;  %v566_v61 = vshrl.u32 %v213_v40, 16  ;;  %v516_v63 = vor.u32 %v515_v55, %v512_v54  ;;  %v569_v1 = vshll.u32 %v213_v40, 16  ;;  %v2372_v23 = vld [vmem:[%s2660_s1 + $0x1c] sm:$0xf]  ;;  %v2380_v29 = vld [vmem:[%s2660_s1 + $0x20] sm:$0xf] }
  0x1c   : > { %2074 = vmatmul.mubr.msk.bf16.vlgmr.msra.gmra.mxu1 %vm247_vm1, %v1893_v56  ;;  %v554_v0 = vrot.slane %v552_v57, 4  ;;  %v477_v3 = vshll.u32 %v200_v62, 16  ;;  %v557_v12 = vrot.slane %v555_v60, 5  ;;  %v491_v14 = vshll.u32 %v202_v2, 16  ;;  %v2200_v32 = vld [vmem:[%s2316_s4 + $0x68] ss:$8 sps:$4 sm:$0xff]  }
  0x1d   : > { %v503_v8 = vrot.slane %v502_v59, 4  ;;  %v568_v13 = vrot.slane %v566_v61, 4  ;;  %2078 = vmatpush3.bf16.msra.mxu1 %v2311_v7  ;;  %2079 = vmatprep.mubr.msk.bf16.mxu1 %vm247_vm1, %v2198_v45  ;;  %v517_v16 = vrot.slane %v516_v63, 4  ;;  %v571_v17 = vrot.slane %v569_v1, 5  ;;  %v208_v36 = vld [vmem:[%s2316_s4 + $0x24] sm:$0x1] }
  0x1e   : > { %v479_v18 = vrot.slane %v477_v3, 5  ;;  %2163 = vmatprep.subr.msk.bf16.mxu1 %vm260_vm0, %v2299_v4  ;;  %v505_v7 = vshll.u32 %v204_v15, 16  ;;  %v493_v20 = vrot.slane %v491_v14, 5  ;;  %v519_v21 = vshll.u32 %v206_v19, 16  ;;  %v210_v37 = vld [vmem:[%s2316_s4 + $0x2c] sm:$0x1] }
  0x1f   : > { %v558_v22 = vor.u32 %v557_v12, %v554_v0  ;;  %v545_v24 = vrot.slane %v544_v58, 4  ;;  %v572_v28 = vor.u32 %v571_v17, %v568_v13  ;;  %v212_v38 = vld [vmem:[%s2316_s4 + $0x34] sm:$0x1]  ;;  %v533_v40 = vshll.u32 %v208_v36, 16  ;;  %v214_v42 = vld [vmem:[%s2316_s4 + $0x3c] sm:$0x1] }
  0x20   : > { %v480_v27 = vsel %vm2361_vm4, %v475_v50, %v479_v18  ;;  %v507_v4 = vrot.slane %v505_v7, 5  ;;  %v494_v30 = vsel %vm2361_vm4, %v489_v51, %v493_v20  ;;  %v521_v31 = vrot.slane %v519_v21, 5  ;;  %v1916_v47 = vld [vmem:[%s2316_s4 + $0x90] sm:$0xf]  ;;  %v1918_v54 = vld [vmem:[%s2316_s4 + $0x98] sm:$0xf] }
  0x21   : > { %v559_v33 = vrot.slane %v558_v22, 4  ;;  %v1908_v34 = vcombine.low %v480_v27, %v494_v30  ;;  %v547_v41 = vshll.u32 %v210_v37, 16  ;;  %v561_v43 = vshll.u32 %v212_v38, 16  ;;  %v2201_v56 = vld [vmem:[%s2316_s4 + $0x78] ss:$8 sps:$4 sm:$0xff]  }
  0x22   : > { %v508_v35 = vsel %vm2361_vm4, %v503_v8, %v507_v4  ;;  %v522_v39 = vsel %vm2361_vm4, %v517_v16, %v521_v31  ;;  %v573_v45 = vrot.slane %v572_v28, 4  ;;  %v575_v46 = vshll.u32 %v214_v42, 16  ;;  %v2423_v1 = vld [vmem:[%s2316_s4 + $0xa8] sm:$0xf]  ;;  %v2426_v2 = vld [vmem:[%s2316_s4 + $0xb0] sm:$0xf] }
  0x23   : > { %2089 = vmatprep.mubr.msk.bf16.mxu0 %vm247_vm1, %v1908_v34  ;;  %v1909_v44 = vcombine.low %v508_v35, %v522_v39  ;;  %v2398_v48 = vsel %vm260_vm0, %v2372_v23, 0  ;;  %v535_v50 = vrot.slane %v533_v40, 5  ;;  %v549_v51 = vrot.slane %v547_v41, 5  ;;  %v1926_v15 = vld [vmem:[%s2316_s4 + $0xb8] sm:$0xf] }
  0x24   : > { %2080 = vmatmul.mubr.msk.bf16.vlgmr.msra.gmra.mxu1 %vm247_vm1, %v2199_v26  ;;  %v563_v53 = vrot.slane %v561_v43, 5  ;;  %v2405_v55 = vsel %vm260_vm0, %v2380_v29, 0  ;;  %v577_v57 = vrot.slane %v575_v46, 5  ;;  %v980_v58 = vshrl.u32 %v1916_v47, 16  ;;  %v2205_v7 = vld [vmem:[%s2316_s4 + $0xd8] ss:$8 sps:$4 sm:$0xff]  }
  0x25   : > { %2098 = vmatpush3.bf16.msra.mxu1 %v2321_v9  ;;  %2083 = vmatprep.mubr.msk.bf16.mxu1 %vm247_vm1, %v2200_v32  ;;  %v983_v59 = vshll.u32 %v1916_v47, 16  ;;  %v994_v60 = vshrl.u32 %v1918_v54, 16  ;;  %v2410_v9 = vld [vmem:[%s2316_s4 + $0xa0] sm:$0xf]  ;;  %v536_v61 = vsel %vm2361_vm4, %v2351_v52, %v535_v50  ;;  %v550_v62 = vsel %vm2361_vm4, %v545_v24, %v549_v51  ;;  %v2450_v34 = vld [vmem:[%s2316_s4 + $0xc8] sm:$0xf] }
  0x26   : > { %2090 = vmatmul.mubr.msk.bf16.vlgmr.msra.gmra.mxu0 %vm247_vm1, %v1909_v44  ;;  %2165 = vmatprep.subr.msk.bf16.mxu1 %vm260_vm0, %v2308_v6  ;;  %v564_v63 = vsel %vm2361_vm4, %v559_v33, %v563_v53  ;;  %v997_v0 = vshll.u32 %v1918_v54, 16  ;;  %v1910_v6 = vcombine.low %v536_v61, %v550_v62  ;;  %v578_v3 = vsel %vm2361_vm4, %v573_v45, %v577_v57  ;;  %v2444_v24 = vld [vmem:[%s2316_s4 + $0xc0] sm:$0xf]  ;;  %v2207_v46 = vld [vmem:[%s2316_s4 + $0xe8] ss:$8 sps:$4 sm:$0xff]  }
  0x27   : > { %2108 = vmatpush3.bf16.msra.mxu0 %v2324_v10  ;;  %v1941_v52 = vcombine.low %v1916_v47, %v1918_v54  ;;  %v982_v8 = vrot.slane %v980_v58, 4  ;;  %v1911_v12 = vcombine.low %v564_v63, %v578_v3  ;;  %v985_v13 = vrot.slane %v983_v59, 5  ;;  %v2208_v51 = vld [vmem:[%s2316_s4 + $0xf8] ss:$8 sps:$4 sm:$0xff]   ;;  %v1917_v57 = vld [vmem:[%s2316_s4 + $0x94] sm:$0x1] }
  0x28   : > { %2166 = vmatprep.subr.msk.bf16.mxu0 %vm260_vm0, %v2338_v25  ;;  %v996_v14 = vrot.slane %v994_v60, 4  ;;  %v999_v10 = vrot.slane %v997_v0, 5  ;;  %2093 = vmatprep.mubr.msk.bf16.mxu0 %vm247_vm1, %v1910_v6  ;;  %v1008_v16 = vshrl.u32 %v2410_v9, 16  ;;  %v1011_v17 = vshll.u32 %v2410_v9, 16  ;;  %v1919_v58 = vld [vmem:[%s2316_s4 + $0x9c] sm:$0x1] }
  0x29   : > { %v1022_v18 = vshrl.u32 %v2423_v1, 16  ;;  %v1025_v19 = vshll.u32 %v2423_v1, 16  ;;  %v1942_v25 = vcombine.low %v2410_v9, %v2423_v1  ;;  %v1036_v20 = vshrl.u32 %v2426_v2, 16  ;;  %v1921_v63 = vld [vmem:[%s2316_s4 + $0xa4] sm:$0x1] }
  0x2a   : > { %v1039_v21 = vshll.u32 %v2426_v2, 16  ;;  %v1050_v22 = vshrl.u32 %v1926_v15, 16  ;;  %v1010_v26 = vrot.slane %v1008_v16, 4  ;;  %v1013_v27 = vrot.slane %v1011_v17, 5  ;;  %v1923_v0 = vld [vmem:[%s2316_s4 + $0xac] sm:$0x1] }
  0x2b   : > { %v1024_v4 = vrot.slane %v1022_v18, 4  ;;  %v1943_v28 = vcombine.low %v2426_v2, %v1926_v15  ;;  %v1027_v30 = vrot.slane %v1025_v19, 5  ;;  %v1038_v31 = vrot.slane %v1036_v20, 4 }
  0x2c   : > { %2084 = vmatmul.mubr.msk.bf16.gmra.mxu1 %vm247_vm1, %v2201_v56  ;;  %v1041_v32 = vrot.slane %v1039_v21, 5  ;;  %v1053_v33 = vshll.u32 %v1926_v15, 16  ;;  %v1052_v35 = vrot.slane %v1050_v22, 4  ;;  %v1064_v36 = vshrl.u32 %v2444_v24, 16  ;;  %v1931_v21 = vld [vmem:[%s2316_s4 + $0xcc] sm:$0x1] }
  0x2d   : > { %2099 = vmatprep.mubr.msk.bf16.mxu1 %vm247_vm1, %v1941_v52  ;;  %v1067_v37 = vshll.u32 %v2444_v24, 16  ;;  %v1078_v38 = vshrl.u32 %v2450_v34, 16  ;;  %v1081_v40 = vshll.u32 %v2450_v34, 16  ;;  %v986_v41 = vor.u32 %v985_v13, %v982_v8  ;;  %v1925_v52 = vld [vmem:[%s2316_s4 + $0xb4] sm:$0x1] }
  0x2e   : > { %2094 = vmatmul.mubr.msk.bf16.gmra.mxu0 %vm247_vm1, %v1911_v12  ;;  %v1055_v39 = vrot.slane %v1053_v33, 5  ;;  %v1000_v42 = vor.u32 %v999_v10, %v996_v14  ;;  %v1066_v43 = vrot.slane %v1064_v36, 4  ;;  %v1014_v47 = vor.u32 %v1013_v27, %v1010_v26  ;;  %v1927_v14 = vld [vmem:[%s2316_s4 + $0xbc] sm:$0x1]  ;;  %v2209_v33 = vld [vmem:[%s2316_s4 + $0x108] ss:$8 sps:$4 sm:$0xff]  }
  0x2f   : > { %2109 = vmatprep.mubr.msk.bf16.mxu0 %vm247_vm1, %v2205_v7  ;;  %v1069_v44 = vrot.slane %v1067_v37, 5  ;;  %v1080_v45 = vrot.slane %v1078_v38, 4  ;;  %v1083_v50 = vrot.slane %v1081_v40, 5  ;;  %v987_v53 = vrot.slane %v986_v41, 4  ;;  %v1929_v7 = vld [vmem:[%s2316_s4 + $0xc4] sm:$0x1] }
  0x30   : > { %v1028_v54 = vor.u32 %v1027_v30, %v1024_v4  ;;  %v1042_v56 = vor.u32 %v1041_v32, %v1038_v31  ;;  %v1001_v59 = vrot.slane %v1000_v42, 4  ;;  %v1015_v60 = vrot.slane %v1014_v47, 4  ;;  %v1971_v42 = vld [vmem:[%s2316_s4 + $0x18] sm:$0xf] }
  0x31   : > { %v1056_v9 = vor.u32 %v1055_v39, %v1052_v35  ;;  %v989_v61 = vshll.u32 %v1917_v57, 16  ;;  %v1003_v62 = vshll.u32 %v1919_v58, 16  ;;  %v1070_v1 = vor.u32 %v1069_v44, %v1066_v43  ;;  %v1977_v57 = vld [vmem:[%s2316_s4 + $0x30] sm:$0xf] }
  0x32   : > { %v1017_v2 = vshll.u32 %v1921_v63, 16  ;;  %v1029_v6 = vrot.slane %v1028_v54, 4  ;;  %v1031_v3 = vshll.u32 %v1923_v0, 16  ;;  %v1084_v8 = vor.u32 %v1083_v50, %v1080_v45  ;;  %v1973_v45 = vld [vmem:[%s2316_s4 + $0x20] sm:$0xf] }
  0x33   : > { %v991_v12 = vrot.slane %v989_v61, 5  ;;  %v1005_v13 = vrot.slane %v1003_v62, 5  ;;  %v1043_v10 = vrot.slane %v1042_v56, 4  ;;  %v1045_v15 = vshll.u32 %v1925_v52, 16  ;;  %v1975_v50 = vld [vmem:[%s2316_s4 + $0x28] sm:$0xf] }
  0x34   : > { %2100 = vmatmul.mubr.msk.bf16.vlgmr.msra.gmra.mxu1 %vm247_vm1, %v1942_v25  ;;  %v1019_v16 = vrot.slane %v1017_v2, 5  ;;  %v1033_v17 = vrot.slane %v1031_v3, 5  ;;  %v1057_v18 = vrot.slane %v1056_v9, 4  ;;  %v1059_v19 = vshll.u32 %v1927_v14, 16  ;;  %v1979_v14 = vld [vmem:[%s2316_s4 + $0x38] sm:$0xf] }
  0x35   : > { %2103 = vmatprep.mubr.msk.bf16.mxu1 %vm247_vm1, %v1943_v28  ;;  %2118 = vmatpush3.bf16.msra.mxu1 %v2328_v11  ;;  %v992_v11 = vsel %vm2361_vm4, %v987_v53, %v991_v12  ;;  %v1006_v25 = vsel %vm2361_vm4, %v1001_v59, %v1005_v13  ;;  %v1047_v20 = vrot.slane %v1045_v15, 5  ;;  %v1073_v22 = vshll.u32 %v1929_v7, 16  ;;  %v1969_v28 = vld [vmem:[%s2316_s4 + $0x10] sm:$0xf] }
  0x36   : > { %2110 = vmatmul.mubr.msk.bf16.vlgmr.msra.gmra.mxu0 %vm247_vm1, %v2207_v46  ;;  %2167 = vmatprep.subr.msk.bf16.mxu1 %vm260_vm0, %v2372_v23  ;;  %v1944_v26 = vcombine.low %v2444_v24, %v2450_v34  ;;  %v1061_v27 = vrot.slane %v1059_v19, 5  ;;  %v1071_v4 = vrot.slane %v1070_v1, 4  ;;  %v1967_v23 = vld [vmem:[%s2316_s4 + $0x8] sm:$0xf]  ;;  %v1959_v30 = vcombine.low %v992_v11, %v1006_v25 }
  0x37   : > { %2113 = vmatprep.mubr.msk.bf16.mxu0 %vm247_vm1, %v2208_v51  ;;  %2128 = vmatpush3.bf16.msra.mxu0 %v2349_v49  ;;  %v1020_v31 = vsel %vm2361_vm4, %v1015_v60, %v1019_v16  ;;  %v1034_v49 = vsel %vm2361_vm4, %v1029_v6, %v1033_v17  ;;  %v1048_v32 = vsel %vm2361_vm4, %v1043_v10, %v1047_v20  ;;  %v1075_v34 = vrot.slane %v1073_v22, 5  ;;  %v1981_v10 = vld [vmem:[%s2316_s4 + $0x40] sm:$0xf]  ;;  %v1970_v22 = vld [vmem:[%s2316_s4 + $0x14] sm:$0x1] }
  0x38   : > { %2168 = vmatprep.subr.msk.bf16.mxu0 %vm260_vm0, %v2380_v29  ;;  %v1062_v24 = vsel %vm2361_vm4, %v1057_v18, %v1061_v27  ;;  %v1087_v35 = vshll.u32 %v1931_v21, 16  ;;  %v1493_v29 = vshrl.u32 %v1967_v23, 16  ;;  %v1085_v36 = vrot.slane %v1084_v8, 4  ;;  %v1968_v21 = vld [vmem:[%s2316_s4 + $0xc] sm:$0x1] }
  0x39   : > { %v1992_v37 = vcombine.low %v1967_v23, %v1969_v28  ;;  %v1496_v38 = vshll.u32 %v1967_v23, 16  ;;  %v1507_v39 = vshrl.u32 %v1969_v28, 16  ;;  %v1510_v41 = vshll.u32 %v1969_v28, 16 }
  0x3a   : > { %v1089_v40 = vrot.slane %v1087_v35, 5  ;;  %v1960_v43 = vcombine.low %v1020_v31, %v1034_v49  ;;  %v1961_v44 = vcombine.low %v1048_v32, %v1062_v24  ;;  %v1521_v46 = vshrl.u32 %v1971_v42, 16  ;;  %v1972_v49 = vld [vmem:[%s2316_s4 + $0x1c] sm:$0x1]  ;;  %v2214_v24 = vld [vmem:[%s2316_s4 + $0x50] ss:$8 sps:$4 sm:$0xff]  }
  0x3b   : > { %v1524_v47 = vshll.u32 %v1971_v42, 16  ;;  %v1076_v51 = vsel %vm2361_vm4, %v1071_v4, %v1075_v34  ;;  %v1495_v53 = vrot.slane %v1493_v29, 4  ;;  %v1535_v54 = vshrl.u32 %v1973_v45, 16  ;;  %v1974_v34 = vld [vmem:[%s2316_s4 + $0x24] sm:$0x1] }
  0x3c   : > { %2104 = vmatmul.mubr.msk.bf16.gmra.mxu1 %vm247_vm1, %v1944_v26  ;;  %v1538_v56 = vshll.u32 %v1973_v45, 16  ;;  %v1090_v58 = vsel %vm2361_vm4, %v1085_v36, %v1089_v40  ;;  %v1498_v59 = vrot.slane %v1496_v38, 5  ;;  %v1509_v60 = vrot.slane %v1507_v39, 4  ;;  %v1976_v38 = vld [vmem:[%s2316_s4 + $0x2c] sm:$0x1] }
  0x3d   : > { %2119 = vmatprep.mubr.msk.bf16.mxu1 %vm247_vm1, %v1959_v30  ;;  %v1512_v9 = vrot.slane %v1510_v41, 5  ;;  %v1523_v61 = vrot.slane %v1521_v46, 4  ;;  %v1526_v62 = vrot.slane %v1524_v47, 5  ;;  %v1549_v63 = vshrl.u32 %v1975_v50, 16 }
  0x3e   : > { %2114 = vmatmul.mubr.msk.bf16.gmra.mxu0 %vm247_vm1, %v2209_v33  ;;  %v1552_v0 = vshll.u32 %v1975_v50, 16  ;;  %v1537_v1 = vrot.slane %v1535_v54, 4  ;;  %v1540_v2 = vrot.slane %v1538_v56, 5  ;;  %v1563_v6 = vshrl.u32 %v1977_v57, 16 }
  0x3f   : > { %2129 = vmatprep.mubr.msk.bf16.mxu0 %vm247_vm1, %v1992_v37  ;;  %v1566_v3 = vshll.u32 %v1977_v57, 16  ;;  %v1962_v52 = vcombine.low %v1076_v51, %v1090_v58  ;;  %v1993_v8 = vcombine.low %v1971_v42, %v1973_v45  ;;  %v1551_v12 = vrot.slane %v1549_v63, 4  ;;  %v1980_v58 = vld [vmem:[%s2316_s4 + $0x3c] sm:$0x1] }
  0x40   : > { %v1554_v13 = vrot.slane %v1552_v0, 5  ;;  %v1994_v15 = vcombine.low %v1975_v50, %v1977_v57  ;;  %v1577_v16 = vshrl.u32 %v1979_v14, 16  ;;  %v1580_v17 = vshll.u32 %v1979_v14, 16 }
  0x41   : > { %v1591_v18 = vshrl.u32 %v1981_v10, 16  ;;  %v1565_v19 = vrot.slane %v1563_v6, 4  ;;  %v1568_v7 = vrot.slane %v1566_v3, 5  ;;  %v1499_v11 = vor.u32 %v1498_v59, %v1495_v53  ;;  %v1982_v59 = vld [vmem:[%s2316_s4 + $0x44] sm:$0x1] }
  0x42   : > { %v1513_v25 = vor.u32 %v1512_v9, %v1509_v60  ;;  %v1594_v20 = vshll.u32 %v1981_v10, 16  ;;  %v1527_v26 = vor.u32 %v1526_v62, %v1523_v61  ;;  %v1541_v27 = vor.u32 %v1540_v2, %v1537_v1  ;;  %v2215_v2 = vld [vmem:[%s2316_s4 + $0x60] ss:$8 sps:$4 sm:$0xff]  }
  0x43   : > { %v1555_v4 = vor.u32 %v1554_v13, %v1551_v12  ;;  %v1500_v23 = vrot.slane %v1499_v11, 4  ;;  %v1502_v28 = vshll.u32 %v1968_v21, 16  ;;  %v1516_v31 = vshll.u32 %v1970_v22, 16 }
  0x44   : > { %2120 = vmatmul.mubr.msk.bf16.vlgmr.msra.gmra.mxu1 %vm247_vm1, %v1960_v43  ;;  %v1514_v30 = vrot.slane %v1513_v25, 4  ;;  %v1579_v32 = vrot.slane %v1577_v16, 4  ;;  %v1582_v33 = vrot.slane %v1580_v17, 5  ;;  %v1530_v35 = vshll.u32 %v1972_v49, 16  ;;  %v1978_v43 = vld [vmem:[%s2316_s4 + $0x34] sm:$0x1] }
  0x45   : > { %2123 = vmatprep.mubr.msk.bf16.mxu1 %vm247_vm1, %v1961_v44  ;;  %2138 = vmatpush3.bf16.msra.mxu1 %v2398_v48  ;;  %v1995_v48 = vcombine.low %v1979_v14, %v1981_v10  ;;  %v1504_v29 = vrot.slane %v1502_v28, 5  ;;  %v1518_v36 = vrot.slane %v1516_v31, 5  ;;  %v1544_v37 = vshll.u32 %v1974_v34, 16 }
  0x46   : > { %2130 = vmatmul.mubr.msk.bf16.vlgmr.msra.gmra.mxu0 %vm247_vm1, %v1993_v8  ;;  %v1569_v39 = vor.u32 %v1568_v7, %v1565_v19  ;;  %v1593_v40 = vrot.slane %v1591_v18, 4  ;;  %v1596_v41 = vrot.slane %v1594_v20, 5  ;;  %v1528_v42 = vrot.slane %v1527_v26, 4  ;;  %v2217_v18 = vld [vmem:[%s2316_s4 + $0x80] ss:$8 sps:$4 sm:$0xff]  }
  0x47   : > { %2133 = vmatprep.mubr.msk.bf16.mxu0 %vm247_vm1, %v1994_v15  ;;  %2148 = vmatpush3.bf16.msra.mxu0 %v2405_v55  ;;  %v1558_v44 = vshll.u32 %v1976_v38, 16  ;;  %v1505_v45 = vsel %vm2361_vm4, %v1500_v23, %v1504_v29  ;;  %v1519_v55 = vsel %vm2361_vm4, %v1514_v30, %v1518_v36  ;;  %v1542_v46 = vrot.slane %v1541_v27, 4 }
  0x48   : > { %v1556_v47 = vrot.slane %v1555_v4, 4  ;;  %v2010_v50 = vcombine.low %v1505_v45, %v1519_v55  ;;  %v1532_v51 = vrot.slane %v1530_v35, 5  ;;  %v1546_v53 = vrot.slane %v1544_v37, 5 }
  0x49   : > { %v1572_v54 = vshll.u32 %v1978_v43, 16  ;;  %v1560_v56 = vrot.slane %v1558_v44, 5  ;;  %v1570_v57 = vrot.slane %v1569_v39, 4  ;;  %v1583_v9 = vor.u32 %v1582_v33, %v1579_v32 }
  0x4a   : > { %v1597_v61 = vor.u32 %v1596_v41, %v1593_v40  ;;  %v1533_v62 = vsel %vm2361_vm4, %v1528_v42, %v1532_v51  ;;  %v1547_v63 = vsel %vm2361_vm4, %v1542_v46, %v1546_v53  ;;  %v1586_v0 = vshll.u32 %v1980_v58, 16 }
  0x4b   : > { %v1574_v60 = vrot.slane %v1572_v54, 5  ;;  %v1600_v1 = vshll.u32 %v1982_v59, 16  ;;  %v1561_v6 = vsel %vm2361_vm4, %v1556_v47, %v1560_v56  ;;  %v2011_v8 = vcombine.low %v1533_v62, %v1547_v63 }
  0x4c   : > { %2124 = vmatmul.mubr.msk.bf16.gmra.mxu1 %vm247_vm1, %v1962_v52  ;;  %v2216_v52 = vld [vmem:[%s2316_s4 + $0x70] ss:$8 sps:$4 sm:$0xff]   ;;  %v1584_v12 = vrot.slane %v1583_v9, 4  ;;  %v1588_v14 = vrot.slane %v1586_v0, 5  ;;  %v1598_v10 = vrot.slane %v1597_v61, 4  ;;  %vm329_vm5 = vcmask 130048  }
  0x4d   : > { %2139 = vmatprep.mubr.msk.bf16.mxu1 %vm247_vm1, %v2214_v24  ;;  %v1575_v3 = vsel %vm2361_vm4, %v1570_v57, %v1574_v60  ;;  %v1602_v15 = vrot.slane %v1600_v1, 5  ;;  %vm1761_vm6 = vcmask 125952  }
  0x4e   : > { %2134 = vmatmul.mubr.msk.bf16.gmra.mxu0 %vm247_vm1, %v1995_v48  ;;  %v2012_v13 = vcombine.low %v1561_v6, %v1575_v3  ;;  %v1589_v16 = vsel %vm2361_vm4, %v1584_v12, %v1588_v14 }
  0x4f   : > { %2149 = vmatprep.mubr.msk.bf16.mxu0 %vm247_vm1, %v2010_v50  ;;  %v1603_v17 = vsel %vm2361_vm4, %v1598_v10, %v1602_v15 }
  0x50   : > { %v2013_v19 = vcombine.low %v1589_v16, %v1603_v17 }
  0x54   : > { %2140 = vmatmul.mubr.msk.bf16.vlgmr.msra.gmra.mxu1 %vm247_vm1, %v2215_v2 }
  0x55   : > { %2143 = vmatprep.mubr.msk.bf16.mxu1 %vm247_vm1, %v2216_v52 }
  0x56   : > { %2150 = vmatmul.mubr.msk.bf16.vlgmr.msra.gmra.mxu0 %vm247_vm1, %v2011_v8 }
  0x57   : > { %2153 = vmatprep.mubr.msk.bf16.mxu0 %vm247_vm1, %v2012_v13 }
  0x5c   : > { %2144 = vmatmul.mubr.msk.bf16.gmra.mxu1 %vm247_vm1, %v2217_v18 }
  0x5e   : > { %2154 = vmatmul.mubr.msk.bf16.gmra.mxu0 %vm247_vm1, %v2013_v19 }
  0xd7   : > { %v2071_v7 = vpop.f32.mrf.mxu0 }
  0xd8   : > { %332 = vst.msk [vmem:[#allocation2 + $0x10] sm:$0xff] %vm329_vm5, %v2071_v7 }
  0xd9   : > { %v298_v11 = vpop.f32.mrf.mxu0 }
  0xda   : > { %330 = vst.msk [vmem:[#allocation2] sm:$0xff] %vm329_vm5, %v298_v11 }
  0xdb   : > { %v2072_v20 = vpop.f32.mrf.mxu0 }
  0xdc   : > { %v2075_v25 = vpop.f32.mrf.mxu1  ;;  %333 = vst.msk [vmem:[#allocation2 + $0x18] sm:$0xff] %vm329_vm5, %v2072_v20 }
  0xdd   : > { %336 = vst.msk [vmem:[#allocation2 + $0x30] sm:$0xff] %vm329_vm5, %v2075_v25  ;;  %v301_v21 = vpop.f32.mrf.mxu0 }
  0xde   : > { %v314_v5 = vpop.f32.mrf.mxu1  ;;  %331 = vst.msk [vmem:[#allocation2 + $0x8] sm:$0xff] %vm329_vm5, %v301_v21 }
  0xdf   : > { %334 = vst.msk [vmem:[#allocation2 + $0x20] sm:$0xff] %vm329_vm5, %v314_v5  ;;  %v442_v27 = vld [vmem:[#allocation2 + $0x10] sm:$0xff] }
  0xe0   : > { %v2076_v22 = vpop.f32.mrf.mxu1 }
  0xe1   : > { %337 = vst.msk [vmem:[#allocation2 + $0x38] sm:$0xff] %vm329_vm5, %v2076_v22  ;;  %v440_v23 = vld [vmem:[#allocation2] sm:$0xff] }
  0xe2   : > { %v317_v26 = vpop.f32.mrf.mxu1 }
  0xe3   : > { %335 = vst.msk [vmem:[#allocation2 + $0x28] sm:$0xff] %vm329_vm5, %v317_v26  ;;  %v443_v31 = vld [vmem:[#allocation2 + $0x18] sm:$0xff] }
  0xe4   : > { %v2081_v4 = vpop.f32.mrf.mxu1  ;;  %v446_v38 = vld [vmem:[#allocation2 + $0x30] sm:$0xff] }
  0xe5   : > { %v450_v28 = vadd.f32 %v2081_v4, %v442_v27  ;;  %v441_v33 = vld [vmem:[#allocation2 + $0x8] sm:$0xff] }
  0xe6   : > { %v409_v30 = vpop.f32.mrf.mxu1  ;;  %v2091_v49 = vpop.f32.mrf.mxu0  ;;  %v444_v43 = vld [vmem:[#allocation2 + $0x20] sm:$0xff] }
  0xe7   : > { %458 = vst.msk [vmem:[#allocation2 + $0x10] sm:$0xff] %vm329_vm5, %v450_v28  ;;  %v448_v48 = vadd.f32 %v440_v23, %v409_v30 }
  0xe8   : > { %v2082_v32 = vpop.f32.mrf.mxu1  ;;  %v642_v24 = vpop.f32.mrf.mxu0  ;;  %v447_v50 = vld [vmem:[#allocation2 + $0x38] sm:$0xff] }
  0xe9   : > { %456 = vst.msk [vmem:[#allocation2] sm:$0xff] %vm329_vm5, %v448_v48  ;;  %v451_v34 = vadd.f32 %v2082_v32, %v443_v31 }
  0xea   : > { %v412_v35 = vpop.f32.mrf.mxu1  ;;  %v2092_v29 = vpop.f32.mrf.mxu0  ;;  %v445_v58 = vld [vmem:[#allocation2 + $0x28] sm:$0xff] }
  0xeb   : > { %459 = vst.msk [vmem:[#allocation2 + $0x18] sm:$0xff] %vm329_vm5, %v451_v34  ;;  %v449_v36 = vadd.f32 %v441_v33, %v412_v35 }
  0xec   : > { %v2085_v37 = vpop.f32.mrf.mxu1  ;;  %v645_v39 = vpop.f32.mrf.mxu0 }
  0xed   : > { %457 = vst.msk [vmem:[#allocation2 + $0x8] sm:$0xff] %vm329_vm5, %v449_v36  ;;  %v454_v40 = vadd.f32 %v2085_v37, %v446_v38 }
  0xee   : > { %v675_v41 = vld [vmem:[#allocation2 + $0x10] sm:$0xff]  ;;  %v425_v42 = vpop.f32.mrf.mxu1  ;;  %v2095_v44 = vpop.f32.mrf.mxu0 }
  0xef   : > { %v683_v45 = vadd.f32 %v2091_v49, %v675_v41  ;;  %462 = vst.msk [vmem:[#allocation2 + $0x30] sm:$0xff] %vm329_vm5, %v454_v40  ;;  %v452_v55 = vadd.f32 %v444_v43, %v425_v42 }
  0xf0   : > { %v673_v46 = vld [vmem:[#allocation2] sm:$0xff]  ;;  %v2086_v47 = vpop.f32.mrf.mxu1  ;;  %v658_v51 = vpop.f32.mrf.mxu0 }
  0xf1   : > { %691 = vst.msk [vmem:[#allocation2 + $0x10] sm:$0xff] %vm329_vm5, %v683_v45  ;;  %v681_v53 = vadd.f32 %v673_v46, %v642_v24  ;;  %460 = vst.msk [vmem:[#allocation2 + $0x20] sm:$0xff] %vm329_vm5, %v452_v55  ;;  %v455_v54 = vadd.f32 %v2086_v47, %v447_v50 }
  0xf2   : > { %v676_v56 = vld [vmem:[#allocation2 + $0x18] sm:$0xff]  ;;  %v428_v57 = vpop.f32.mrf.mxu1  ;;  %v2096_v59 = vpop.f32.mrf.mxu0 }
  0xf3   : > { %689 = vst.msk [vmem:[#allocation2] sm:$0xff] %vm329_vm5, %v681_v53  ;;  %v684_v60 = vadd.f32 %v2092_v29, %v676_v56  ;;  %463 = vst.msk [vmem:[#allocation2 + $0x38] sm:$0xff] %vm329_vm5, %v455_v54  ;;  %v453_v9 = vadd.f32 %v445_v58, %v428_v57 }
  0xf4   : > { %v674_v61 = vld [vmem:[#allocation2 + $0x8] sm:$0xff]  ;;  %v2101_v62 = vpop.f32.mrf.mxu1  ;;  %v661_v63 = vpop.f32.mrf.mxu0 }
  0xf5   : > { %692 = vst.msk [vmem:[#allocation2 + $0x18] sm:$0xff] %vm329_vm5, %v684_v60  ;;  %v682_v0 = vadd.f32 %v674_v61, %v645_v39  ;;  %461 = vst.msk [vmem:[#allocation2 + $0x28] sm:$0xff] %vm329_vm5, %v453_v9 }
  0xf6   : > { %v679_v1 = vld [vmem:[#allocation2 + $0x30] sm:$0xff]  ;;  %v798_v2 = vpop.f32.mrf.mxu1  ;;  %v2111_v6 = vpop.f32.mrf.mxu0 }
  0xf7   : > { %690 = vst.msk [vmem:[#allocation2 + $0x8] sm:$0xff] %vm329_vm5, %v682_v0  ;;  %v687_v3 = vadd.f32 %v2095_v44, %v679_v1 }
  0xf8   : > { %v677_v52 = vld [vmem:[#allocation2 + $0x20] sm:$0xff]  ;;  %v831_v8 = vld [vmem:[#allocation2 + $0x10] sm:$0xff]  ;;  %v2102_v12 = vpop.f32.mrf.mxu1  ;;  %v924_v13 = vpop.f32.mrf.mxu0 }
  0xf9   : > { %695 = vst.msk [vmem:[#allocation2 + $0x30] sm:$0xff] %vm329_vm5, %v687_v3  ;;  %v685_v14 = vadd.f32 %v677_v52, %v658_v51  ;;  %v839_v10 = vadd.f32 %v2101_v62, %v831_v8 }
  0xfa   : > { %v680_v15 = vld [vmem:[#allocation2 + $0x38] sm:$0xff]  ;;  %v829_v16 = vld [vmem:[#allocation2] sm:$0xff]  ;;  %v801_v17 = vpop.f32.mrf.mxu1  ;;  %v2112_v18 = vpop.f32.mrf.mxu0 }
  0xfb   : > { %693 = vst.msk [vmem:[#allocation2 + $0x20] sm:$0xff] %vm329_vm5, %v685_v14  ;;  %v688_v19 = vadd.f32 %v2096_v59, %v680_v15  ;;  %847 = vst.msk [vmem:[#allocation2 + $0x10] sm:$0xff] %vm329_vm5, %v839_v10  ;;  %v837_v7 = vadd.f32 %v829_v16, %v798_v2 }
  0xfc   : > { %v678_v11 = vld [vmem:[#allocation2 + $0x28] sm:$0xff]  ;;  %v832_v25 = vld [vmem:[#allocation2 + $0x18] sm:$0xff]  ;;  %v2105_v20 = vpop.f32.mrf.mxu1  ;;  %v927_v5 = vpop.f32.mrf.mxu0 }
  0xfd   : > { %696 = vst.msk [vmem:[#allocation2 + $0x38] sm:$0xff] %vm329_vm5, %v688_v19  ;;  %v686_v21 = vadd.f32 %v678_v11, %v661_v63  ;;  %845 = vst.msk [vmem:[#allocation2] sm:$0xff] %vm329_vm5, %v837_v7  ;;  %v840_v22 = vadd.f32 %v2102_v12, %v832_v25 }
  0xfe   : > { %v830_v26 = vld [vmem:[#allocation2 + $0x8] sm:$0xff]  ;;  %v814_v27 = vpop.f32.mrf.mxu1  ;;  %v2115_v4 = vpop.f32.mrf.mxu0 }
  0xff   : > { %694 = vst.msk [vmem:[#allocation2 + $0x28] sm:$0xff] %vm329_vm5, %v686_v21  ;;  %848 = vst.msk [vmem:[#allocation2 + $0x18] sm:$0xff] %vm329_vm5, %v840_v22  ;;  %v838_v23 = vadd.f32 %v830_v26, %v801_v17 }
 0x100   : > { %v835_v28 = vld [vmem:[#allocation2 + $0x30] sm:$0xff]  ;;  %v2106_v30 = vpop.f32.mrf.mxu1  ;;  %v940_v31 = vpop.f32.mrf.mxu0 }
 0x101   : > { %846 = vst.msk [vmem:[#allocation2 + $0x8] sm:$0xff] %vm329_vm5, %v838_v23  ;;  %v843_v49 = vadd.f32 %v2105_v20, %v835_v28 }
 0x102   : > { %v957_v48 = vld [vmem:[#allocation2 + $0x10] sm:$0xff]  ;;  %v833_v32 = vld [vmem:[#allocation2 + $0x20] sm:$0xff]  ;;  %v817_v33 = vpop.f32.mrf.mxu1  ;;  %v2116_v24 = vpop.f32.mrf.mxu0 }
 0x103   : > { %851 = vst.msk [vmem:[#allocation2 + $0x30] sm:$0xff] %vm329_vm5, %v843_v49  ;;  %v965_v34 = vadd.f32 %v2111_v6, %v957_v48  ;;  %v841_v35 = vadd.f32 %v833_v32, %v814_v27 }
 0x104   : > { %v955_v29 = vld [vmem:[#allocation2] sm:$0xff]  ;;  %v836_v36 = vld [vmem:[#allocation2 + $0x38] sm:$0xff]  ;;  %v2121_v37 = vpop.f32.mrf.mxu1  ;;  %v943_v38 = vpop.f32.mrf.mxu0 }
 0x105   : > { %973 = vst.msk [vmem:[#allocation2 + $0x10] sm:$0xff] %vm329_vm5, %v965_v34  ;;  %849 = vst.msk [vmem:[#allocation2 + $0x20] sm:$0xff] %vm329_vm5, %v841_v35  ;;  %v963_v39 = vadd.f32 %v955_v29, %v924_v13  ;;  %v844_v40 = vadd.f32 %v2106_v30, %v836_v36 }
 0x106   : > { %v958_v41 = vld [vmem:[#allocation2 + $0x18] sm:$0xff]  ;;  %v834_v42 = vld [vmem:[#allocation2 + $0x28] sm:$0xff]  ;;  %v1154_v43 = vpop.f32.mrf.mxu1  ;;  %v2131_v44 = vpop.f32.mrf.mxu0 }
 0x107   : > { %971 = vst.msk [vmem:[#allocation2] sm:$0xff] %vm329_vm5, %v963_v39  ;;  %852 = vst.msk [vmem:[#allocation2 + $0x38] sm:$0xff] %vm329_vm5, %v844_v40  ;;  %v966_v45 = vadd.f32 %v2112_v18, %v958_v41  ;;  %v842_v55 = vadd.f32 %v834_v42, %v817_v33 }
 0x108   : > { %v956_v46 = vld [vmem:[#allocation2 + $0x8] sm:$0xff]  ;;  %v2122_v47 = vpop.f32.mrf.mxu1  ;;  %v1311_v50 = vpop.f32.mrf.mxu0 }
 0x109   : > { %974 = vst.msk [vmem:[#allocation2 + $0x18] sm:$0xff] %vm329_vm5, %v966_v45  ;;  %850 = vst.msk [vmem:[#allocation2 + $0x28] sm:$0xff] %vm329_vm5, %v842_v55  ;;  %v964_v51 = vadd.f32 %v956_v46, %v927_v5 }
 0x10a   : > { %v961_v53 = vld [vmem:[#allocation2 + $0x30] sm:$0xff]  ;;  %v1157_v54 = vpop.f32.mrf.mxu1  ;;  %v2132_v56 = vpop.f32.mrf.mxu0 }
 0x10b   : > { %972 = vst.msk [vmem:[#allocation2 + $0x8] sm:$0xff] %vm329_vm5, %v964_v51  ;;  %v969_v57 = vadd.f32 %v2115_v4, %v961_v53 }
 0x10c   : > { %v959_v58 = vld [vmem:[#allocation2 + $0x20] sm:$0xff]  ;;  %v1187_v59 = vld [vmem:[#allocation2 + $0x10] sm:$0xff]  ;;  %v2125_v60 = vpop.f32.mrf.mxu1  ;;  %v1314_v9 = vpop.f32.mrf.mxu0 }
 0x10d   : > { %977 = vst.msk [vmem:[#allocation2 + $0x30] sm:$0xff] %vm329_vm5, %v969_v57  ;;  %v967_v61 = vadd.f32 %v959_v58, %v940_v31  ;;  %v1195_v62 = vadd.f32 %v2121_v37, %v1187_v59 }
 0x10e   : > { %v962_v63 = vld [vmem:[#allocation2 + $0x38] sm:$0xff]  ;;  %v1185_v0 = vld [vmem:[#allocation2] sm:$0xff]  ;;  %v1170_v1 = vpop.f32.mrf.mxu1  ;;  %v2135_v2 = vpop.f32.mrf.mxu0 }
 0x10f   : > { %975 = vst.msk [vmem:[#allocation2 + $0x20] sm:$0xff] %vm329_vm5, %v967_v61  ;;  %1203 = vst.msk [vmem:[#allocation2 + $0x10] sm:$0xff] %vm329_vm5, %v1195_v62  ;;  %v970_v6 = vadd.f32 %v2116_v24, %v962_v63  ;;  %v1193_v3 = vadd.f32 %v1185_v0, %v1154_v43 }
 0x110   : > { %v960_v52 = vld [vmem:[#allocation2 + $0x28] sm:$0xff]  ;;  %v1188_v8 = vld [vmem:[#allocation2 + $0x18] sm:$0xff]  ;;  %v2126_v12 = vpop.f32.mrf.mxu1  ;;  %v1327_v16 = vpop.f32.mrf.mxu0 }
 0x111   : > { %978 = vst.msk [vmem:[#allocation2 + $0x38] sm:$0xff] %vm329_vm5, %v970_v6  ;;  %1201 = vst.msk [vmem:[#allocation2] sm:$0xff] %vm329_vm5, %v1193_v3  ;;  %v968_v13 = vadd.f32 %v960_v52, %v943_v38  ;;  %v1196_v14 = vadd.f32 %v2122_v47, %v1188_v8 }
 0x112   : > { %v1186_v10 = vld [vmem:[#allocation2 + $0x8] sm:$0xff]  ;;  %v1173_v15 = vpop.f32.mrf.mxu1  ;;  %v2136_v20 = vpop.f32.mrf.mxu0 }
 0x113   : > { %976 = vst.msk [vmem:[#allocation2 + $0x28] sm:$0xff] %vm329_vm5, %v968_v13  ;;  %1204 = vst.msk [vmem:[#allocation2 + $0x18] sm:$0xff] %vm329_vm5, %v1196_v14  ;;  %v1194_v17 = vadd.f32 %v1186_v10, %v1157_v54 }
 0x114   : > { %v1191_v18 = vld [vmem:[#allocation2 + $0x30] sm:$0xff]  ;;  %v2141_v19 = vpop.f32.mrf.mxu1  ;;  %v1330_v31 = vpop.f32.mrf.mxu0 }
 0x115   : > { %1202 = vst.msk [vmem:[#allocation2 + $0x8] sm:$0xff] %vm329_vm5, %v1194_v17  ;;  %v1199_v7 = vadd.f32 %v2125_v60, %v1191_v18  ;;  %v2018_v18 = vld [vmem:[%s2661_s2] ss:$0 sm:$0xff] }
 0x116   : > { %v1189_v11 = vld [vmem:[#allocation2 + $0x20] sm:$0xff]  ;;  %v1344_v25 = vld [vmem:[#allocation2 + $0x10] sm:$0xff]  ;;  %v1437_v5 = vpop.f32.mrf.mxu1  ;;  %v2151_v24 = vpop.f32.mrf.mxu0 }
 0x117   : > { %1207 = vst.msk [vmem:[#allocation2 + $0x30] sm:$0xff] %vm329_vm5, %v1199_v7  ;;  %v1197_v21 = vadd.f32 %v1189_v11, %v1170_v1  ;;  %v1352_v22 = vadd.f32 %v2131_v44, %v1344_v25 }
 0x118   : > { %v1192_v26 = vld [vmem:[#allocation2 + $0x38] sm:$0xff]  ;;  %v1342_v27 = vld [vmem:[#allocation2] sm:$0xff]  ;;  %v2142_v49 = vpop.f32.mrf.mxu1  ;;  %v1667_v39 = vpop.f32.mrf.mxu0 }
 0x119   : > { %1205 = vst.msk [vmem:[#allocation2 + $0x20] sm:$0xff] %vm329_vm5, %v1197_v21  ;;  %1360 = vst.msk [vmem:[#allocation2 + $0x10] sm:$0xff] %vm329_vm5, %v1352_v22  ;;  %v1200_v4 = vadd.f32 %v2126_v12, %v1192_v26  ;;  %v1350_v23 = vadd.f32 %v1342_v27, %v1311_v50 }
 0x11a   : > { %v1190_v28 = vld [vmem:[#allocation2 + $0x28] sm:$0xff]  ;;  %v1345_v30 = vld [vmem:[#allocation2 + $0x18] sm:$0xff]  ;;  %v1440_v29 = vpop.f32.mrf.mxu1  ;;  %v2152_v50 = vpop.f32.mrf.mxu0 }
 0x11b   : > { %1208 = vst.msk [vmem:[#allocation2 + $0x38] sm:$0xff] %vm329_vm5, %v1200_v4  ;;  %1358 = vst.msk [vmem:[#allocation2] sm:$0xff] %vm329_vm5, %v1350_v23  ;;  %v1198_v48 = vadd.f32 %v1190_v28, %v1173_v15  ;;  %v1353_v32 = vadd.f32 %v2132_v56, %v1345_v30 }
 0x11c   : > { %v1343_v33 = vld [vmem:[#allocation2 + $0x8] sm:$0xff]  ;;  %v2145_v44 = vpop.f32.mrf.mxu1  ;;  %v1670_v59 = vpop.f32.mrf.mxu0 }
 0x11d   : > { %1206 = vst.msk [vmem:[#allocation2 + $0x28] sm:$0xff] %vm329_vm5, %v1198_v48  ;;  %1361 = vst.msk [vmem:[#allocation2 + $0x18] sm:$0xff] %vm329_vm5, %v1353_v32  ;;  %v1351_v34 = vadd.f32 %v1343_v33, %v1314_v9 }
 0x11e   : > { %v1348_v35 = vld [vmem:[#allocation2 + $0x30] sm:$0xff]  ;;  %v1453_v56 = vpop.f32.mrf.mxu1  ;;  %v2155_v6 = vpop.f32.mrf.mxu0 }
 0x11f   : > { %1359 = vst.msk [vmem:[#allocation2 + $0x8] sm:$0xff] %vm329_vm5, %v1351_v34  ;;  %v1356_v36 = vadd.f32 %v2135_v2, %v1348_v35 }
 0x120   : > { %v1346_v37 = vld [vmem:[#allocation2 + $0x20] sm:$0xff]  ;;  %v1470_v38 = vld [vmem:[#allocation2 + $0x10] sm:$0xff]  ;;  %v2146_v62 = vpop.f32.mrf.mxu1 }
 0x121   : > { %1364 = vst.msk [vmem:[#allocation2 + $0x30] sm:$0xff] %vm329_vm5, %v1356_v36  ;;  %v1354_v40 = vadd.f32 %v1346_v37, %v1327_v16  ;;  %v1478_v41 = vadd.f32 %v2141_v19, %v1470_v38  ;;  %v1683_v16 = vpop.f32.mrf.mxu0 }
 0x122   : > { %v1349_v42 = vld [vmem:[#allocation2 + $0x38] sm:$0xff]  ;;  %v1468_v43 = vld [vmem:[#allocation2] sm:$0xff]  ;;  %v1456_v8 = vpop.f32.mrf.mxu1 }
 0x123   : > { %1362 = vst.msk [vmem:[#allocation2 + $0x20] sm:$0xff] %vm329_vm5, %v1354_v40  ;;  %1486 = vst.msk [vmem:[#allocation2 + $0x10] sm:$0xff] %vm329_vm5, %v1478_v41  ;;  %v1357_v45 = vadd.f32 %v2136_v20, %v1349_v42  ;;  %v1476_v55 = vadd.f32 %v1468_v43, %v1437_v5  ;;  %v2156_v20 = vpop.f32.mrf.mxu0 }
 0x124   : > { %v1347_v46 = vld [vmem:[#allocation2 + $0x28] sm:$0xff]  ;;  %v1471_v47 = vld [vmem:[#allocation2 + $0x18] sm:$0xff] }
 0x125   : > { %1365 = vst.msk [vmem:[#allocation2 + $0x38] sm:$0xff] %vm329_vm5, %v1357_v45  ;;  %1484 = vst.msk [vmem:[#allocation2] sm:$0xff] %vm329_vm5, %v1476_v55  ;;  %v1355_v51 = vadd.f32 %v1347_v46, %v1330_v31  ;;  %v1479_v53 = vadd.f32 %v2142_v49, %v1471_v47  ;;  %v1686_v30 = vpop.f32.mrf.mxu0 }
 0x126   : > { %v1469_v54 = vld [vmem:[#allocation2 + $0x8] sm:$0xff] }
 0x127   : > { %1363 = vst.msk [vmem:[#allocation2 + $0x28] sm:$0xff] %vm329_vm5, %v1355_v51  ;;  %1487 = vst.msk [vmem:[#allocation2 + $0x18] sm:$0xff] %vm329_vm5, %v1479_v53  ;;  %v1477_v57 = vadd.f32 %v1469_v54, %v1440_v29 }
 0x128   : > { %v1474_v58 = vld [vmem:[#allocation2 + $0x30] sm:$0xff] }
 0x129   : > { %1485 = vst.msk [vmem:[#allocation2 + $0x8] sm:$0xff] %vm329_vm5, %v1477_v57  ;;  %v1482_v60 = vadd.f32 %v2145_v44, %v1474_v58 }
 0x12a   : > { %v1472_v9 = vld [vmem:[#allocation2 + $0x20] sm:$0xff]  ;;  %v1700_v61 = vld [vmem:[#allocation2 + $0x10] sm:$0xff] }
 0x12b   : > { %1490 = vst.msk [vmem:[#allocation2 + $0x30] sm:$0xff] %vm329_vm5, %v1482_v60  ;;  %v1480_v63 = vadd.f32 %v1472_v9, %v1453_v56  ;;  %v1708_v0 = vadd.f32 %v2151_v24, %v1700_v61 }
 0x12c   : > { %v1475_v1 = vld [vmem:[#allocation2 + $0x38] sm:$0xff]  ;;  %v1698_v2 = vld [vmem:[#allocation2] sm:$0xff] }
 0x12d   : > { %1488 = vst.msk [vmem:[#allocation2 + $0x20] sm:$0xff] %vm329_vm5, %v1480_v63  ;;  %1716 = vst.msk [vmem:[#allocation2 + $0x10] sm:$0xff] %vm329_vm5, %v1708_v0  ;;  %v1483_v3 = vadd.f32 %v2146_v62, %v1475_v1  ;;  %v1706_v52 = vadd.f32 %v1698_v2, %v1667_v39 }
 0x12e   : > { %v1473_v12 = vld [vmem:[#allocation2 + $0x28] sm:$0xff]  ;;  %v1701_v13 = vld [vmem:[#allocation2 + $0x18] sm:$0xff] }
 0x12f   : > { %1491 = vst.msk [vmem:[#allocation2 + $0x38] sm:$0xff] %vm329_vm5, %v1483_v3  ;;  %1714 = vst.msk [vmem:[#allocation2] sm:$0xff] %vm329_vm5, %v1706_v52  ;;  %v1481_v14 = vadd.f32 %v1473_v12, %v1456_v8  ;;  %v1709_v10 = vadd.f32 %v2152_v50, %v1701_v13 }
 0x130   : > { %v1699_v15 = vld [vmem:[#allocation2 + $0x8] sm:$0xff] }
 0x131   : > { %1489 = vst.msk [vmem:[#allocation2 + $0x28] sm:$0xff] %vm329_vm5, %v1481_v14  ;;  %1717 = vst.msk [vmem:[#allocation2 + $0x18] sm:$0xff] %vm329_vm5, %v1709_v10  ;;  %v1707_v17 = vadd.f32 %v1699_v15, %v1670_v59 }
 0x132   : > { %v1704_v19 = vld [vmem:[#allocation2 + $0x30] sm:$0xff] }
 0x133   : > { %1715 = vst.msk [vmem:[#allocation2 + $0x8] sm:$0xff] %vm329_vm5, %v1707_v17  ;;  %v1712_v7 = vadd.f32 %v2155_v6, %v1704_v19 }
 0x134   : > { %v1724_v11 = vld [vmem:[#allocation2 + $0x10] sm:$0xff]  ;;  %v1702_v25 = vld [vmem:[#allocation2 + $0x20] sm:$0xff] }
 0x135   : > { %v1739_v5 = vadd.f32 %v2018_v18, %v1724_v11  ;;  %1720 = vst.msk [vmem:[#allocation2 + $0x30] sm:$0xff] %vm329_vm5, %v1712_v7  ;;  %v1710_v21 = vadd.f32 %v1702_v25, %v1683_v16 }
 0x136   : > { %v1722_v22 = vld [vmem:[#allocation2] sm:$0xff]  ;;  %v1705_v26 = vld [vmem:[#allocation2 + $0x38] sm:$0xff] }
 0x137   : > { %v1747_v27 = vmax.f32 %v1739_v5, 0.0  ;;  %v1737_v4 = vadd.f32 %v2018_v18, %v1722_v22  ;;  %1718 = vst.msk [vmem:[#allocation2 + $0x20] sm:$0xff] %vm329_vm5, %v1710_v21  ;;  %v1713_v23 = vadd.f32 %v2156_v20, %v1705_v26 }
 0x138   : > { %v1725_v28 = vld [vmem:[#allocation2 + $0x18] sm:$0xff]  ;;  %v1703_v31 = vld [vmem:[#allocation2 + $0x28] sm:$0xff] }
 0x139   : > { %v1755_v49 = vpack.c.bf16 %v1747_v27, %v1747_v27  ;;  %v1745_v48 = vmax.f32 %v1737_v4, 0.0  ;;  %v1740_v32 = vadd.f32 %v2018_v18, %v1725_v28  ;;  %1721 = vst.msk [vmem:[#allocation2 + $0x38] sm:$0xff] %vm329_vm5, %v1713_v23  ;;  %v1711_v33 = vadd.f32 %v1703_v31, %v1686_v30 }
 0x13a   : > { %v1723_v24 = vld [vmem:[#allocation2 + $0x8] sm:$0xff] }
 0x13b   : > { %1764 = vst.msk [vmem:[%s2630_s20 + $0x8] sm:$0xf] %vm1761_vm6, %v1755_v49  ;;  %v1753_v34 = vpack.c.bf16 %v1745_v48, %v1745_v48  ;;  %v1748_v35 = vmax.f32 %v1740_v32, 0.0  ;;  %v1738_v29 = vadd.f32 %v2018_v18, %v1723_v24 }
 0x13c   : > { %1719 = vst.msk [vmem:[#allocation2 + $0x28] sm:$0xff] %vm329_vm5, %v1711_v33  ;;  %v1728_v36 = vld [vmem:[#allocation2 + $0x30] sm:$0xff] }
 0x13d   : > { %1762 = vst.msk [vmem:[%s2630_s20] sm:$0xf] %vm1761_vm6, %v1753_v34  ;;  %v1756_v37 = vpack.c.bf16 %v1748_v35, %v1748_v35  ;;  %v1746_v38 = vmax.f32 %v1738_v29, 0.0  ;;  %v1743_v39 = vadd.f32 %v2018_v18, %v1728_v36 }
 0x13e   : > { %v1726_v40 = vld [vmem:[#allocation2 + $0x20] sm:$0xff] }
 0x13f   : > { %1765 = vst.msk [vmem:[%s2630_s20 + $0xc] sm:$0xf] %vm1761_vm6, %v1756_v37  ;;  %v1754_v41 = vpack.c.bf16 %v1746_v38, %v1746_v38  ;;  %v1751_v42 = vmax.f32 %v1743_v39, 0.0  ;;  %v1741_v43 = vadd.f32 %v2018_v18, %v1726_v40 }
 0x140   : > { %v1729_v44 = vld [vmem:[#allocation2 + $0x38] sm:$0xff] }
 0x141   : > { %1763 = vst.msk [vmem:[%s2630_s20 + $0x4] sm:$0xf] %vm1761_vm6, %v1754_v41  ;;  %v1759_v45 = vpack.c.bf16 %v1751_v42, %v1751_v42  ;;  %v1749_v55 = vmax.f32 %v1741_v43, 0.0  ;;  %v1744_v46 = vadd.f32 %v2018_v18, %v1729_v44 }
 0x143   : > { %v1727_v47 = vld [vmem:[#allocation2 + $0x28] sm:$0xff]  ;;  %1768 = vst.msk [vmem:[%s2630_s20 + $0x18] sm:$0xf] %vm1761_vm6, %v1759_v45  ;;  %v1757_v50 = vpack.c.bf16 %v1749_v55, %v1749_v55  ;;  %v1752_v51 = vmax.f32 %v1744_v46, 0.0 }
 0x144   : > { %v1742_v53 = vadd.f32 %v2018_v18, %v1727_v47 }
 0x145   : > { %1766 = vst.msk [vmem:[%s2630_s20 + $0x10] sm:$0xf] %vm1761_vm6, %v1757_v50  ;;  %v1760_v54 = vpack.c.bf16 %v1752_v51, %v1752_v51 }
 0x146   : > { %v1750_v56 = vmax.f32 %v1742_v53, 0.0 }
 0x147   : > { %1769 = vst.msk [vmem:[%s2630_s20 + $0x1c] sm:$0xf] %vm1761_vm6, %v1760_v54 }
 0x148   : > { %v1758_v57 = vpack.c.bf16 %v1750_v56, %v1750_v56 }
 0x14a   : > { %1767 = vst.msk [vmem:[%s2630_s20 + $0x14] sm:$0xf] %vm1761_vm6, %v1758_v57 }
 0x14b PF: > { %s13_s14 = sadd.s32 1, %s2240_s14   ;;  %s2665_s12 = smov %s2236_s13 }
 0x14c   : > { %p10_p5 = scmp.ge.s32.totalorder %s13_s14, 4   ;;  %s2666_s13 = smov %s2668_s15 }
 0x14e   :  { %12 = sbr.rel (!%p10_p5) target bundleno = 2 (0x2), region = 76 }

// kernel: rtdetr_resnet_embeddings.5
= control target key start
LH: loop header
LB: loop body
LE: loop exit
PB: predicated region body
PF: predicated region fallthrough
CT: control target
= control target key end

     0   :  { %s2354_s12 = smov 0   ;;  %s2356_s13 = smov 0   ;;  %s2964_s0 = inlined_call_operand.vmem [shape: bf16[2,1,10,10,16], index: 0, kind: input, shape index: {}]   ;;  %s2965_s1 = inlined_call_operand.vmem [shape: bf16[3,3,16,16], index: 1, kind: input, shape index: {}]   ;;  %s2966_s2 = inlined_call_operand.vmem [shape: f32[1,16], index: 2, kind: input, shape index: {}]   ;;  %s2967_s3 = inlined_call_operand.vmem [shape: bf16[2,8,8,16], index: 3, kind: output, shape index: {}]  }
   0x1   :  { %s2358_s14 = smov 0  }
   0x2 LB: > { %s25_s15 = sadd.s32 1, %s2328_s13  ;;  %p1966_p0 = scmp.ge.s32.totalorder %s2332_s14, 1  ;;  %s2332_s14 = sphi %s2358_s14, %s13_s14   ;;  %s2328_s13 = sphi %s2356_s13, %s2973_s13   ;;  %s2324_s12 = sphi %s2354_s12, %s2972_s12  }
   0x3   : > { %p27_p1 = scmp.ge.s32.totalorder %s25_s15, 2  ;;  %p151_p2 = scmp.lt.s32.totalorder %s2332_s14, 3 }
   0x5   : > { %s2975_s15 = smov (%p27_p1, %s25_s15), 0  ;;  %p152_p3 = pnand %p1966_p0, %p151_p2 }
   0x6   : > { %p179_p4 = scmp.lt.s32.totalorder (!%p152_p3), %s2324_s12, 1 }
   0x7   : > { %155 = sbr.rel (%p152_p3) target bundleno = 332 (0x14c), region = 32 }
   0xc   : > { %v2289_v0 = vld [vmem:[%s2965_s1] sm:$0xff]   ;;  %v2378_v1 = vld [vmem:[%s2965_s1 + $0x8] sm:$0xff]   ;;  %s2977_s12 = smov (!%p179_p4, %s2324_s12), 1  ;;  %v2385_v2 = vld [vmem:[%s2965_s1 + $0x10] sm:$0xff]   ;;  %vm243_vm0 = vcmask 130048   ;;  %vm574_vm1 = vcmask 1042432  }
   0xd   : > { %2262 = vmatprep.subr.bf16.mxu1 %v2289_v0  ;;  %2172 = vmatprep.subr.bf16.mxu0 %v2289_v0  ;;  %s2264_s22 = smul.u32 80, %s2977_s12  ;;  %vm575_vm2 = vcmask 1046532   ;;  %vm329_vm3 = vsmask.f32 3328  ;;  %vm330_vm4 = vsmask.f32 7440 }
   0xe   : > { %2263 = vmatpush3.bf16.msra.mxu1 %v2289_v0  ;;  %2173 = vmatpush3.bf16.msra.mxu0 %v2289_v0  ;;  %v2446_v39 = vld [vmem:[%s2965_s1 + $0x18] sm:$0xff]   ;;  %v2463_v51 = vld [vmem:[%s2965_s1 + $0x20] sm:$0xff]   ;;  %vm2476_vm5 = vmor %vm574_vm1, %vm575_vm2  ;;  %s2126_s17 = sshll.u32 %s2977_s12, 5  ;;  %vm1862_vm7 = vcmask 125952  }
   0xf   : > { %2182 = vmatprep.subr.bf16.mxu1 %v2378_v1  ;;  %2192 = vmatprep.subr.bf16.mxu0 %v2385_v2  ;;  %s2393_s25 = scalar_lea.vmem %s2964_s0, %s2264_s22  ;;  %vm2482_vm6 = vmor %vm329_vm3, %vm330_vm4  ;;  %s2934_s20 = scalar_lea.vmem %s2967_s3, %s2126_s17 }
  0x10   : > { %v2396_v3 = vld [vmem:[%s2393_s25 + $0x20] sm:$0xf]  ;;  %v2399_v4 = vld [vmem:[%s2393_s25 + $0x28] sm:$0xf]  ;;  %v2420_v19 = vld [vmem:[%s2393_s25 + $0x30] sm:$0xf] }
  0x11   : > { %v2402_v5 = vld [vmem:[%s2393_s25] sm:$0xf]  ;;  %v1972_v6 = vcombine.low %v2396_v3, %v2399_v4  ;;  %v389_v7 = vshrl.u32 %v2396_v3, 16  ;;  %v392_v8 = vshll.u32 %v2396_v3, 16  ;;  %v403_v9 = vshrl.u32 %v2399_v4, 16 }
  0x12   : > { %v2410_v10 = vld [vmem:[%s2393_s25 + $0x8] sm:$0xf]  ;;  %v406_v11 = vshll.u32 %v2399_v4, 16  ;;  %v1994_v12 = vrot.slane %v2396_v3, 9  ;;  %v1995_v13 = vrot.slane %v2399_v4, 9  ;;  %v333_v18 = vshrl.u32 %v2402_v5, 16 }
  0x13   : > { %v1970_v14 = vcombine.low %v2402_v5, %v2410_v10  ;;  %2178 = vmatprep.mubr.msk.bf16.mxu1 %vm243_vm0, %v1972_v6  ;;  %v391_v15 = vrot.slane %v389_v7, 4  ;;  %v394_v16 = vrot.slane %v392_v8, 5  ;;  %v405_v17 = vrot.slane %v403_v9, 4  ;;  %v2427_v24 = vld [vmem:[%s2393_s25 + $0x38] sm:$0xf] }
  0x14   : > { %v408_v20 = vrot.slane %v406_v11, 5  ;;  %v336_v21 = vshll.u32 %v2402_v5, 16  ;;  %v347_v22 = vshrl.u32 %v2410_v10, 16  ;;  %v350_v23 = vshll.u32 %v2410_v10, 16  ;;  %v2432_v29 = vld [vmem:[%s2393_s25 + $0x10] sm:$0xf] }
  0x15   : > { %2174 = vmatprep.mubr.msk.bf16.mxu0 %vm243_vm0, %v1970_v14  ;;  %v395_v25 = vor.u32 %v394_v16, %v391_v15  ;;  %v335_v26 = vrot.slane %v333_v18, 4  ;;  %v1990_v27 = vrot.slane %v2402_v5, 9  ;;  %v1991_v28 = vrot.slane %v2410_v10, 9  ;;  %v2435_v34 = vld [vmem:[%s2393_s25 + $0x18] sm:$0xf] }
  0x16   : > { %v409_v30 = vor.u32 %v408_v20, %v405_v17  ;;  %v338_v31 = vrot.slane %v336_v21, 5  ;;  %v349_v32 = vrot.slane %v347_v22, 4  ;;  %v352_v33 = vrot.slane %v350_v23, 5  ;;  %v200_v44 = vld [vmem:[%s2393_s25 + $0x4] sm:$0x1] }
  0x17   : > { %v2437_v35 = vrot.slane %v395_v25, 4  ;;  %v1973_v36 = vcombine.low %v2420_v19, %v2427_v24  ;;  %v417_v37 = vshrl.u32 %v2420_v19, 16  ;;  %v420_v38 = vshll.u32 %v2420_v19, 16  ;;  %v202_v45 = vld [vmem:[%s2393_s25 + $0xc] sm:$0x1] }
  0x18   : > { %v2448_v40 = vrot.slane %v409_v30, 4  ;;  %v339_v41 = vor.u32 %v338_v31, %v335_v26  ;;  %v353_v42 = vor.u32 %v352_v33, %v349_v32  ;;  %v431_v43 = vshrl.u32 %v2427_v24, 16  ;;  %v204_v50 = vld [vmem:[%s2393_s25 + $0x14] sm:$0x1]  ;;  %v206_v56 = vld [vmem:[%s2393_s25 + $0x1c] sm:$0x1] }
  0x19   : > { %2179 = vmatmul.mubr.msk.bf16.vlgmr.msra.gmra.mxu1 %vm243_vm0, %v1973_v36  ;;  %v434_v46 = vshll.u32 %v2427_v24, 16  ;;  %v1971_v47 = vcombine.low %v2432_v29, %v2435_v34  ;;  %v361_v48 = vshrl.u32 %v2432_v29, 16  ;;  %v364_v49 = vshll.u32 %v2432_v29, 16  ;;  %v208_v16 = vld [vmem:[%s2393_s25 + $0x24] sm:$0x1] }
  0x1a   : > { %v340_v52 = vrot.slane %v339_v41, 4  ;;  %v354_v53 = vrot.slane %v353_v42, 4  ;;  %v375_v54 = vshrl.u32 %v2435_v34, 16  ;;  %v378_v55 = vshll.u32 %v2435_v34, 16  ;;  %2183 = vmatpush3.bf16.msra.mxu1 %v2378_v1  ;;  %v210_v22 = vld [vmem:[%s2393_s25 + $0x2c] sm:$0x1] }
  0x1b   : > { %2175 = vmatmul.mubr.msk.bf16.vlgmr.msra.gmra.mxu0 %vm243_vm0, %v1971_v47  ;;  %v363_v57 = vrot.slane %v361_v48, 4  ;;  %v366_v58 = vrot.slane %v364_v49, 5  ;;  %v1992_v59 = vrot.slane %v2432_v29, 9  ;;  %v1993_v60 = vrot.slane %v2435_v34, 9  ;;  %2202 = vmatprep.subr.bf16.mxu1 %v2446_v39  ;;  %v212_v33 = vld [vmem:[%s2393_s25 + $0x34] sm:$0x1] }
  0x1c   : > { %v377_v61 = vrot.slane %v375_v54, 4  ;;  %v380_v62 = vrot.slane %v378_v55, 5  ;;  %v342_v63 = vshll.u32 %v200_v44, 16  ;;  %v356_v0 = vshll.u32 %v202_v45, 16  ;;  %2193 = vmatpush3.bf16.msra.mxu0 %v2385_v2  ;;  %v2516_v48 = vld [vmem:[%s2965_s1 + $0x28] sm:$0xff]  }
  0x1d   : > { %v367_v6 = vor.u32 %v366_v58, %v363_v57  ;;  %v370_v7 = vshll.u32 %v204_v50, 16  ;;  %v384_v8 = vshll.u32 %v206_v56, 16  ;;  %v579_v9 = vrot.slane %v200_v44, 5  ;;  %2212 = vmatprep.subr.bf16.mxu0 %v2463_v51 }
  0x1e   : > { %v344_v2 = vrot.slane %v342_v63, 5  ;;  %v358_v11 = vrot.slane %v356_v0, 5  ;;  %v381_v14 = vor.u32 %v380_v62, %v377_v61  ;;  %v583_v15 = vrot.slane %v202_v45, 5  ;;  %v2542_v63 = vld [vmem:[%s2393_s25 + $0x10] sm:$0xf] }
  0x1f   : > { %v368_v17 = vrot.slane %v367_v6, 4  ;;  %v372_v18 = vrot.slane %v370_v7, 5  ;;  %v386_v20 = vrot.slane %v384_v8, 5  ;;  %v580_v21 = vsel %vm2476_vm5, %v1990_v27, %v579_v9 }
  0x20   : > { %v345_v23 = vsel %vm2482_vm6, %v340_v52, %v344_v2  ;;  %v359_v25 = vsel %vm2482_vm6, %v354_v53, %v358_v11  ;;  %v382_v26 = vrot.slane %v381_v14, 4  ;;  %v584_v29 = vsel %vm2476_vm5, %v1991_v28, %v583_v15  ;;  %v214_v28 = vld [vmem:[%s2393_s25 + $0x3c] sm:$0x1]  ;;  %v2556_v11 = vld [vmem:[%s2393_s25 + $0x18] sm:$0xf] }
  0x21   : > { %v1981_v30 = vcombine.low %v345_v23, %v359_v25  ;;  %v373_v31 = vsel %vm2482_vm6, %v368_v17, %v372_v18  ;;  %v2000_v32 = vcombine.low %v580_v21, %v584_v29  ;;  %v587_v27 = vrot.slane %v204_v50, 5  ;;  %v2575_v17 = vld [vmem:[%s2393_s25 + $0x28] sm:$0xf]  ;;  %v2585_v23 = vld [vmem:[%s2393_s25 + $0xc] sm:$0x1] }
  0x22   : > { %v387_v34 = vsel %vm2482_vm6, %v382_v26, %v386_v20  ;;  %v591_v36 = vrot.slane %v206_v56, 5  ;;  %v398_v41 = vshll.u32 %v208_v16, 16  ;;  %v412_v42 = vshll.u32 %v210_v22, 16  ;;  %v2528_v56 = vld [vmem:[%s2965_s1 + $0x30] sm:$0xff]  }
  0x23   : > { %2184 = vmatprep.mubr.msk.bf16.mxu1 %vm243_vm0, %v1981_v30  ;;  %v1982_v44 = vcombine.low %v373_v31, %v387_v34  ;;  %2194 = vmatprep.mubr.msk.bf16.mxu0 %vm243_vm0, %v2000_v32  ;;  %v588_v10 = vsel %vm2476_vm5, %v1992_v59, %v587_v27  ;;  %v419_v45 = vrot.slane %v417_v37, 4  ;;  %v422_v47 = vrot.slane %v420_v38, 5  ;;  %v2593_v31 = vld [vmem:[%s2393_s25 + $0x14] sm:$0x1]  ;;  %v2596_v32 = vld [vmem:[%s2393_s25 + $0x38] sm:$0xf] }
  0x24   : > { %v592_v49 = vsel %vm2476_vm5, %v1993_v60, %v591_v36  ;;  %v400_v50 = vrot.slane %v398_v41, 5  ;;  %v414_v52 = vrot.slane %v412_v42, 5  ;;  %v426_v53 = vshll.u32 %v212_v33, 16  ;;  %v2538_v60 = vld [vmem:[%s2393_s25 + $0x8] sm:$0xf] }
  0x25   : > { %2185 = vmatmul.mubr.msk.bf16.vlgmr.msra.gmra.mxu1 %vm243_vm0, %v1982_v44  ;;  %v2001_v54 = vcombine.low %v588_v10, %v592_v49  ;;  %v423_v37 = vor.u32 %v422_v47, %v419_v45  ;;  %v433_v38 = vrot.slane %v431_v43, 4  ;;  %v436_v55 = vrot.slane %v434_v46, 5  ;;  %v2605_v41 = vld [vmem:[%s2393_s25 + $0x40] sm:$0xf]  ;;  %v2613_v45 = vld [vmem:[%s2393_s25 + $0x1c] sm:$0x1] }
  0x26   : > { %2203 = vmatpush3.bf16.msra.mxu1 %v2446_v39  ;;  %v401_v57 = vsel %vm2482_vm6, %v2437_v35, %v400_v50  ;;  %v415_v58 = vsel %vm2482_vm6, %v2448_v40, %v414_v52  ;;  %v428_v59 = vrot.slane %v426_v53, 5  ;;  %v440_v43 = vshll.u32 %v214_v28, 16 }
  0x27   : > { %2195 = vmatmul.mubr.msk.bf16.vlgmr.msra.gmra.mxu0 %vm243_vm0, %v2001_v54  ;;  %v1983_v46 = vcombine.low %v401_v57, %v415_v58  ;;  %v424_v61 = vrot.slane %v423_v37, 4  ;;  %v437_v62 = vor.u32 %v436_v55, %v433_v38  ;;  %v595_v39 = vrot.slane %v208_v16, 5  ;;  %2222 = vmatprep.subr.bf16.mxu1 %v2516_v48 }
  0x28   : > { %v442_v35 = vrot.slane %v440_v43, 5  ;;  %v599_v0 = vrot.slane %v210_v22, 5  ;;  %v1996_v40 = vrot.slane %v2420_v19, 9  ;;  %v603_v6 = vrot.slane %v212_v33, 5  ;;  %2213 = vmatpush3.bf16.msra.mxu0 %v2463_v51  ;;  %v2559_v19 = vld [vmem:[%s2393_s25 + $0x20] sm:$0xf] }
  0x29   : > { %2188 = vmatprep.mubr.msk.bf16.mxu1 %vm243_vm0, %v1983_v46  ;;  %v429_v7 = vsel %vm2482_vm6, %v424_v61, %v428_v59  ;;  %v438_v8 = vrot.slane %v437_v62, 4  ;;  %v596_v9 = vsel %vm2476_vm5, %v1994_v12, %v595_v39  ;;  %v1997_v2 = vrot.slane %v2427_v24, 9  ;;  %2232 = vmatprep.subr.bf16.mxu0 %v2528_v56  ;;  %v2623_v43 = vld [vmem:[%s2393_s25 + $0x24] sm:$0x1] }
  0x2a   : > { %v600_v51 = vsel %vm2476_vm5, %v1995_v13, %v599_v0  ;;  %v604_v3 = vsel %vm2476_vm5, %v1996_v40, %v603_v6  ;;  %v607_v14 = vrot.slane %v214_v28, 5  ;;  %v2027_v12 = vcombine.low %v2538_v60, %v2542_v63  ;;  %v2578_v13 = vld [vmem:[%s2393_s25 + $0x30] sm:$0xf] }
  0x2b   : > { %v443_v24 = vsel %vm2482_vm6, %v438_v8, %v442_v35  ;;  %v2002_v15 = vcombine.low %v596_v9, %v600_v51  ;;  %v882_v16 = vshrl.u32 %v2538_v60, 16  ;;  %v885_v4 = vshll.u32 %v2538_v60, 16  ;;  %v2634_v51 = vld [vmem:[%s2393_s25 + $0x2c] sm:$0x1] }
  0x2c   : > { %v1984_v18 = vcombine.low %v429_v7, %v443_v24  ;;  %v608_v20 = vsel %vm2476_vm5, %v1997_v2, %v607_v14  ;;  %v896_v21 = vshrl.u32 %v2542_v63, 16  ;;  %v899_v22 = vshll.u32 %v2542_v63, 16  ;;  %v2630_v7 = vld [vmem:[%s2965_s1 + $0x38] sm:$0xff]  }
  0x2d   : > { %2198 = vmatprep.mubr.msk.bf16.mxu0 %vm243_vm0, %v2002_v15  ;;  %v2003_v25 = vcombine.low %v604_v3, %v608_v20  ;;  %v2028_v26 = vcombine.low %v2556_v11, %v2559_v19  ;;  %v910_v29 = vshrl.u32 %v2556_v11, 16  ;;  %v913_v30 = vshll.u32 %v2556_v11, 16  ;;  %v2642_v15 = vld [vmem:[%s2393_s25 + $0x34] sm:$0x1] }
  0x2e   : > { %2189 = vmatmul.mubr.msk.bf16.gmra.mxu1 %vm243_vm0, %v1984_v18  ;;  %v924_v27 = vshrl.u32 %v2559_v19, 16  ;;  %v927_v33 = vshll.u32 %v2559_v19, 16  ;;  %v2029_v34 = vcombine.low %v2575_v17, %v2578_v13  ;;  %v938_v36 = vshrl.u32 %v2575_v17, 16 }
  0x2f   : > { %2199 = vmatmul.mubr.msk.bf16.gmra.mxu0 %vm243_vm0, %v2003_v25  ;;  %2204 = vmatprep.mubr.msk.bf16.mxu1 %vm243_vm0, %v2027_v12  ;;  %v941_v42 = vshll.u32 %v2575_v17, 16  ;;  %v952_v44 = vshrl.u32 %v2578_v13, 16  ;;  %v955_v10 = vshll.u32 %v2578_v13, 16  ;;  %v884_v28 = vrot.slane %v882_v16, 4 }
  0x30   : > { %v887_v47 = vrot.slane %v885_v4, 5  ;;  %v891_v49 = vshll.u32 %v2585_v23, 16  ;;  %v898_v50 = vrot.slane %v896_v21, 4  ;;  %v901_v52 = vrot.slane %v899_v22, 5 }
  0x31   : > { %v905_v53 = vshll.u32 %v2593_v31, 16  ;;  %v2030_v54 = vcombine.low %v2596_v32, %v2605_v41  ;;  %v966_v37 = vshrl.u32 %v2596_v32, 16  ;;  %v969_v38 = vshll.u32 %v2596_v32, 16 }
  0x32   : > { %v888_v55 = vor.u32 %v887_v47, %v884_v28  ;;  %v893_v57 = vrot.slane %v891_v49, 5  ;;  %v902_v58 = vor.u32 %v901_v52, %v898_v50  ;;  %v980_v59 = vshrl.u32 %v2605_v41, 16  ;;  %v2656_v47 = vld [vmem:[%s2393_s25 + $0x44] sm:$0x1] }
  0x33   : > { %v907_v46 = vrot.slane %v905_v53, 5  ;;  %v983_v61 = vshll.u32 %v2605_v41, 16  ;;  %v912_v62 = vrot.slane %v910_v29, 4  ;;  %v915_v39 = vrot.slane %v913_v30, 5  ;;  %v2648_v30 = vld [vmem:[%s2393_s25 + $0x3c] sm:$0x1] }
  0x34   : > { %v889_v35 = vrot.slane %v888_v55, 4  ;;  %v903_v0 = vrot.slane %v902_v58, 4  ;;  %v919_v40 = vshll.u32 %v2613_v45, 16  ;;  %v926_v6 = vrot.slane %v924_v27, 4 }
  0x35   : > { %v916_v8 = vor.u32 %v915_v39, %v912_v62  ;;  %v929_v9 = vrot.slane %v927_v33, 5  ;;  %v933_v2 = vshll.u32 %v2623_v43, 16  ;;  %v940_v3 = vrot.slane %v938_v36, 4 }
  0x36   : > { %2205 = vmatmul.mubr.msk.bf16.vlgmr.msra.gmra.mxu1 %vm243_vm0, %v2028_v26  ;;  %v894_v14 = vsel %vm2482_vm6, %v889_v35, %v893_v57  ;;  %v908_v12 = vsel %vm2482_vm6, %v903_v0, %v907_v46  ;;  %v921_v24 = vrot.slane %v919_v40, 5  ;;  %v943_v16 = vrot.slane %v941_v42, 5 }
  0x37   : > { %2208 = vmatprep.mubr.msk.bf16.mxu1 %vm243_vm0, %v2029_v34  ;;  %v2038_v4 = vcombine.low %v894_v14, %v908_v12  ;;  %v917_v18 = vrot.slane %v916_v8, 4  ;;  %v930_v20 = vor.u32 %v929_v9, %v926_v6  ;;  %v935_v21 = vrot.slane %v933_v2, 5  ;;  %2223 = vmatpush3.bf16.msra.mxu1 %v2516_v48 }
  0x38   : > { %v944_v22 = vor.u32 %v943_v16, %v940_v3  ;;  %v947_v25 = vshll.u32 %v2634_v51, 16  ;;  %v954_v26 = vrot.slane %v952_v44, 4  ;;  %v957_v29 = vrot.slane %v955_v10, 5  ;;  %2242 = vmatprep.subr.bf16.mxu1 %v2630_v7 }
  0x39   : > { %2214 = vmatprep.mubr.msk.bf16.mxu0 %vm243_vm0, %v2038_v4  ;;  %v922_v27 = vsel %vm2482_vm6, %v917_v18, %v921_v24  ;;  %v931_v33 = vrot.slane %v930_v20, 4  ;;  %v961_v34 = vshll.u32 %v2642_v15, 16  ;;  %v968_v36 = vrot.slane %v966_v37, 4  ;;  %v2666_v37 = vld [vmem:[%s2965_s1 + $0x40] sm:$0xff]   ;;  %v2704_v4 = vld [vmem:[%s2393_s25 + $0x10] sm:$0xf] }
  0x3a   : > { %v945_v42 = vrot.slane %v944_v22, 4  ;;  %v949_v48 = vrot.slane %v947_v25, 5  ;;  %v958_v28 = vor.u32 %v957_v29, %v954_v26  ;;  %v971_v44 = vrot.slane %v969_v38, 5  ;;  %v2707_v18 = vld [vmem:[%s2393_s25 + $0x18] sm:$0xf] }
  0x3b   : > { %v936_v10 = vsel %vm2482_vm6, %v931_v33, %v935_v21  ;;  %v963_v49 = vrot.slane %v961_v34, 5  ;;  %v975_v50 = vshll.u32 %v2648_v30, 16  ;;  %v982_v52 = vrot.slane %v980_v59, 4  ;;  %v2714_v22 = vld [vmem:[%s2393_s25 + $0x20] sm:$0xf] }
  0x3c   : > { %v2039_v53 = vcombine.low %v922_v27, %v936_v10  ;;  %v950_v55 = vsel %vm2482_vm6, %v945_v42, %v949_v48  ;;  %v959_v57 = vrot.slane %v958_v28, 4  ;;  %v972_v58 = vor.u32 %v971_v44, %v968_v36  ;;  %v2722_v29 = vld [vmem:[%s2393_s25 + $0x28] sm:$0xf]  ;;  %v2731_v34 = vld [vmem:[%s2393_s25 + $0x30] sm:$0xf] }
  0x3d   : > { %v977_v46 = vrot.slane %v975_v50, 5  ;;  %v985_v38 = vrot.slane %v983_v61, 5  ;;  %v989_v62 = vshll.u32 %v2656_v47, 16  ;;  %v2047_v39 = vrot.slane %v2538_v60, 9  ;;  %v2747_v44 = vld [vmem:[%s2393_s25 + $0x48] sm:$0xf] }
  0x3e   : > { %2209 = vmatmul.mubr.msk.bf16.gmra.mxu1 %vm243_vm0, %v2030_v54  ;;  %2215 = vmatmul.mubr.msk.bf16.vlgmr.msra.gmra.mxu0 %vm243_vm0, %v2039_v53  ;;  %v964_v59 = vsel %vm2482_vm6, %v959_v57, %v963_v49  ;;  %v973_v35 = vrot.slane %v972_v58, 4  ;;  %v1125_v0 = vrot.slane %v2585_v23, 5  ;;  %v2048_v40 = vrot.slane %v2542_v63, 9  ;;  %v2761_v58 = vld [vmem:[%s2393_s25 + $0x14] sm:$0x1] }
  0x3f   : > { %v2040_v61 = vcombine.low %v950_v55, %v964_v59  ;;  %v986_v6 = vor.u32 %v985_v38, %v982_v52  ;;  %v991_v8 = vrot.slane %v989_v62, 5  ;;  %v1129_v60 = vrot.slane %v2593_v31, 5  ;;  %2233 = vmatpush3.bf16.msra.mxu0 %v2528_v56  ;;  %v2769_v59 = vld [vmem:[%s2393_s25 + $0x1c] sm:$0x1] }
  0x40   : > { %v978_v54 = vsel %vm2482_vm6, %v973_v35, %v977_v46  ;;  %v1126_v9 = vsel %vm2476_vm5, %v2047_v39, %v1125_v0  ;;  %v2049_v2 = vrot.slane %v2556_v11, 9  ;;  %v1133_v23 = vrot.slane %v2613_v45, 5  ;;  %2252 = vmatprep.subr.bf16.mxu0 %v2666_v37 }
  0x41   : > { %2218 = vmatprep.mubr.msk.bf16.mxu0 %vm243_vm0, %v2040_v61  ;;  %v987_v63 = vrot.slane %v986_v6, 4  ;;  %v1130_v56 = vsel %vm2476_vm5, %v2048_v40, %v1129_v60  ;;  %v2050_v31 = vrot.slane %v2559_v19, 9  ;;  %v1137_v3 = vrot.slane %v2623_v43, 5  ;;  %v2776_v6 = vld [vmem:[%s2393_s25 + $0x24] sm:$0x1] }
  0x42   : > { %v2057_v14 = vcombine.low %v1126_v9, %v1130_v56  ;;  %v1134_v11 = vsel %vm2476_vm5, %v2049_v2, %v1133_v23  ;;  %v2051_v45 = vrot.slane %v2575_v17, 9  ;;  %v1141_v12 = vrot.slane %v2634_v51, 5 }
  0x43   : > { %v992_v24 = vsel %vm2482_vm6, %v987_v63, %v991_v8  ;;  %v1138_v16 = vsel %vm2476_vm5, %v2050_v31, %v1137_v3  ;;  %v2052_v19 = vrot.slane %v2578_v13, 9  ;;  %v1145_v43 = vrot.slane %v2642_v15, 5  ;;  %v2781_v63 = vld [vmem:[%s2393_s25 + $0x2c] sm:$0x1] }
  0x44   : > { %v2041_v20 = vcombine.low %v978_v54, %v992_v24  ;;  %2224 = vmatprep.mubr.msk.bf16.mxu1 %vm243_vm0, %v2057_v14  ;;  %v2058_v17 = vcombine.low %v1134_v11, %v1138_v16  ;;  %v1142_v51 = vsel %vm2476_vm5, %v2051_v45, %v1141_v12  ;;  %v2053_v21 = vrot.slane %v2596_v32, 9 }
  0x45   : > { %v1146_v13 = vsel %vm2476_vm5, %v2052_v19, %v1145_v43  ;;  %v1149_v15 = vrot.slane %v2648_v30, 5  ;;  %v2054_v25 = vrot.slane %v2605_v41, 9  ;;  %v1153_v26 = vrot.slane %v2656_v47, 5  ;;  %v2734_v41 = vld [vmem:[%s2393_s25 + $0x38] sm:$0xf] }
  0x46   : > { %2219 = vmatmul.mubr.msk.bf16.gmra.mxu0 %vm243_vm0, %v2041_v20  ;;  %2225 = vmatmul.mubr.msk.bf16.vlgmr.msra.gmra.mxu1 %vm243_vm0, %v2058_v17  ;;  %v2059_v32 = vcombine.low %v1142_v51, %v1146_v13  ;;  %v2084_v27 = vcombine.low %v2704_v4, %v2707_v18  ;;  %v1428_v33 = vshrl.u32 %v2704_v4, 16  ;;  %v1431_v30 = vshll.u32 %v2704_v4, 16  ;;  %v2744_v47 = vld [vmem:[%s2393_s25 + $0x40] sm:$0xf]  ;;  %v2789_v43 = vld [vmem:[%s2393_s25 + $0x34] sm:$0x1] }
  0x47   : > { %v1150_v36 = vsel %vm2476_vm5, %v2053_v21, %v1149_v15  ;;  %v1154_v42 = vsel %vm2476_vm5, %v2054_v25, %v1153_v26  ;;  %v1442_v48 = vshrl.u32 %v2707_v18, 16  ;;  %v1445_v28 = vshll.u32 %v2707_v18, 16  ;;  %2243 = vmatpush3.bf16.msra.mxu1 %v2630_v7  ;;  %v2793_v26 = vld [vmem:[%s2393_s25 + $0x3c] sm:$0x1] }
  0x48   : > { %2228 = vmatprep.mubr.msk.bf16.mxu1 %vm243_vm0, %v2059_v32  ;;  %v2060_v10 = vcombine.low %v1150_v36, %v1154_v42  ;;  %2234 = vmatprep.mubr.msk.bf16.mxu0 %vm243_vm0, %v2084_v27  ;;  %v2085_v49 = vcombine.low %v2714_v22, %v2722_v29  ;;  %v1456_v50 = vshrl.u32 %v2714_v22, 16  ;;  %v1459_v52 = vshll.u32 %v2714_v22, 16 }
  0x49   : > { %v1470_v7 = vshrl.u32 %v2722_v29, 16  ;;  %v1473_v53 = vshll.u32 %v2722_v29, 16  ;;  %v2086_v55 = vcombine.low %v2731_v34, %v2734_v41  ;;  %v1484_v57 = vshrl.u32 %v2731_v34, 16 }
  0x4a   : > { %v1487_v46 = vshll.u32 %v2731_v34, 16  ;;  %v1498_v38 = vshrl.u32 %v2734_v41, 16  ;;  %v1501_v62 = vshll.u32 %v2734_v41, 16  ;;  %v2087_v39 = vcombine.low %v2744_v47, %v2747_v44 }
  0x4b   : > { %v1512_v35 = vshrl.u32 %v2744_v47, 16  ;;  %v1515_v0 = vshll.u32 %v2744_v47, 16  ;;  %v1526_v40 = vshrl.u32 %v2747_v44, 16  ;;  %v1529_v61 = vshll.u32 %v2747_v44, 16 }
  0x4c   : > { %v1430_v8 = vrot.slane %v1428_v33, 4  ;;  %v1433_v60 = vrot.slane %v1431_v30, 5  ;;  %v1437_v54 = vshll.u32 %v2761_v58, 16  ;;  %v1444_v9 = vrot.slane %v1442_v48, 4 }
  0x4d   : > { %v1447_v2 = vrot.slane %v1445_v28, 5  ;;  %v1451_v23 = vshll.u32 %v2769_v59, 16  ;;  %v1458_v56 = vrot.slane %v1456_v50, 4  ;;  %v1461_v31 = vrot.slane %v1459_v52, 5 }
  0x4e   : > { %2229 = vmatmul.mubr.msk.bf16.gmra.mxu1 %vm243_vm0, %v2060_v10  ;;  %2235 = vmatmul.mubr.msk.bf16.vlgmr.msra.gmra.mxu0 %vm243_vm0, %v2085_v49  ;;  %v1434_v3 = vor.u32 %v1433_v60, %v1430_v8  ;;  %v1439_v14 = vrot.slane %v1437_v54, 5  ;;  %v1465_v11 = vshll.u32 %v2776_v6, 16  ;;  %v1472_v45 = vrot.slane %v1470_v7, 4  ;;  %v2803_v10 = vld [vmem:[%s2393_s25 + $0x44] sm:$0x1] }
  0x4f   : > { %2238 = vmatprep.mubr.msk.bf16.mxu0 %vm243_vm0, %v2086_v55  ;;  %v1448_v12 = vor.u32 %v1447_v2, %v1444_v9  ;;  %v1453_v24 = vrot.slane %v1451_v23, 5  ;;  %v1462_v16 = vor.u32 %v1461_v31, %v1458_v56  ;;  %v1475_v19 = vrot.slane %v1473_v53, 5  ;;  %2253 = vmatpush3.bf16.msra.mxu0 %v2666_v37 }
  0x50   : > { %v1435_v20 = vrot.slane %v1434_v3, 4  ;;  %v1467_v17 = vrot.slane %v1465_v11, 5  ;;  %v1479_v51 = vshll.u32 %v2781_v63, 16  ;;  %v1486_v21 = vrot.slane %v1484_v57, 4  ;;  %v2081_v57 = vld [vmem:[%s2393_s25 + $0x4c] sm:$0x1] }
  0x51   : > { %v1449_v13 = vrot.slane %v1448_v12, 4  ;;  %v1463_v15 = vrot.slane %v1462_v16, 4  ;;  %v1476_v25 = vor.u32 %v1475_v19, %v1472_v45  ;;  %v1489_v32 = vrot.slane %v1487_v46, 5 }
  0x52   : > { %v1440_v27 = vsel %vm2482_vm6, %v1435_v20, %v1439_v14  ;;  %v1481_v33 = vrot.slane %v1479_v51, 5  ;;  %v1493_v37 = vshll.u32 %v2789_v43, 16  ;;  %v1500_v30 = vrot.slane %v1498_v38, 4 }
  0x53   : > { %v1454_v36 = vsel %vm2482_vm6, %v1449_v13, %v1453_v24  ;;  %v1468_v42 = vsel %vm2482_vm6, %v1463_v15, %v1467_v17  ;;  %v1477_v48 = vrot.slane %v1476_v25, 4  ;;  %v1490_v28 = vor.u32 %v1489_v32, %v1486_v21 }
  0x54   : > { %v2095_v49 = vcombine.low %v1440_v27, %v1454_v36  ;;  %v1495_v50 = vrot.slane %v1493_v37, 5  ;;  %v1503_v52 = vrot.slane %v1501_v62, 5  ;;  %v1507_v7 = vshll.u32 %v2793_v26, 16 }
  0x55   : > { %v1482_v53 = vsel %vm2482_vm6, %v1477_v48, %v1481_v33  ;;  %v1491_v55 = vrot.slane %v1490_v28, 4  ;;  %v1514_v46 = vrot.slane %v1512_v35, 4  ;;  %v1517_v38 = vrot.slane %v1515_v0, 5 }
  0x56   : > { %2239 = vmatmul.mubr.msk.bf16.gmra.mxu0 %vm243_vm0, %v2087_v39  ;;  %2244 = vmatprep.mubr.msk.bf16.mxu1 %vm243_vm0, %v2095_v49  ;;  %v2096_v8 = vcombine.low %v1468_v42, %v1482_v53  ;;  %v1504_v60 = vor.u32 %v1503_v52, %v1500_v30  ;;  %v1509_v54 = vrot.slane %v1507_v7, 5  ;;  %v1521_v9 = vshll.u32 %v2803_v10, 16 }
  0x57   : > { %v1496_v62 = vsel %vm2482_vm6, %v1491_v55, %v1495_v50  ;;  %v1518_v2 = vor.u32 %v1517_v38, %v1514_v46  ;;  %v1528_v23 = vrot.slane %v1526_v40, 4  ;;  %v1531_v56 = vrot.slane %v1529_v61, 5 }
  0x58   : > { %2245 = vmatmul.mubr.msk.bf16.vlgmr.msra.gmra.mxu1 %vm243_vm0, %v2096_v8  ;;  %v1505_v31 = vrot.slane %v1504_v60, 4  ;;  %v1523_v35 = vrot.slane %v1521_v9, 5  ;;  %v1535_v0 = vshll.u32 %v2081_v57, 16  ;;  %v2104_v39 = vrot.slane %v2704_v4, 9 }
  0x59   : > { %v1519_v3 = vrot.slane %v1518_v2, 4  ;;  %v1532_v14 = vor.u32 %v1531_v56, %v1528_v23  ;;  %v1671_v11 = vrot.slane %v2761_v58, 5  ;;  %v2105_v45 = vrot.slane %v2707_v18, 9 }
  0x5a   : > { %v1510_v12 = vsel %vm2482_vm6, %v1505_v31, %v1509_v54  ;;  %v1537_v24 = vrot.slane %v1535_v0, 5  ;;  %v1675_v40 = vrot.slane %v2769_v59, 5  ;;  %v2106_v61 = vrot.slane %v2714_v22, 9 }
  0x5b   : > { %v2097_v16 = vcombine.low %v1496_v62, %v1510_v12  ;;  %v1524_v19 = vsel %vm2482_vm6, %v1519_v3, %v1523_v35  ;;  %v1533_v20 = vrot.slane %v1532_v14, 4  ;;  %v1672_v4 = vsel %vm2476_vm5, %v2104_v39, %v1671_v11 }
  0x5c   : > { %v1676_v58 = vsel %vm2476_vm5, %v2105_v45, %v1675_v40  ;;  %v1679_v18 = vrot.slane %v2776_v6, 5  ;;  %v2107_v17 = vrot.slane %v2722_v29, 9  ;;  %v1683_v51 = vrot.slane %v2781_v63, 5 }
  0x5d   : > { %2248 = vmatprep.mubr.msk.bf16.mxu1 %vm243_vm0, %v2097_v16  ;;  %v1538_v22 = vsel %vm2482_vm6, %v1533_v20, %v1537_v24  ;;  %v2114_v59 = vcombine.low %v1672_v4, %v1676_v58  ;;  %v2108_v21 = vrot.slane %v2731_v34, 9  ;;  %v1687_v13 = vrot.slane %v2789_v43, 5 }
  0x5e   : > { %v2098_v15 = vcombine.low %v1524_v19, %v1538_v22  ;;  %v1680_v25 = vsel %vm2476_vm5, %v2106_v61, %v1679_v18  ;;  %v1684_v6 = vsel %vm2476_vm5, %v2107_v17, %v1683_v51  ;;  %v2109_v29 = vrot.slane %v2734_v41, 9 }
  0x5f   : > { %2254 = vmatprep.mubr.msk.bf16.mxu0 %vm243_vm0, %v2114_v59  ;;  %v2115_v63 = vcombine.low %v1680_v25, %v1684_v6  ;;  %v1688_v5 = vsel %vm2476_vm5, %v2108_v21, %v1687_v13  ;;  %v1691_v32 = vrot.slane %v2793_v26, 5  ;;  %v2110_v34 = vrot.slane %v2744_v47, 9 }
  0x60   : > { %2249 = vmatmul.mubr.msk.bf16.gmra.mxu1 %vm243_vm0, %v2098_v15  ;;  %v1695_v43 = vrot.slane %v2803_v10, 5  ;;  %v2111_v27 = vrot.slane %v2747_v44, 9  ;;  %v1699_v33 = vrot.slane %v2081_v57, 5 }
  0x61   : > { %2255 = vmatmul.mubr.msk.bf16.vlgmr.msra.gmra.mxu0 %vm243_vm0, %v2115_v63  ;;  %v1692_v41 = vsel %vm2476_vm5, %v2109_v29, %v1691_v32 }
  0x62   : > { %v2116_v37 = vcombine.low %v1688_v5, %v1692_v41  ;;  %v1696_v30 = vsel %vm2476_vm5, %v2110_v34, %v1695_v43  ;;  %v1700_v26 = vsel %vm2476_vm5, %v2111_v27, %v1699_v33 }
  0x63   : > { %v2117_v47 = vcombine.low %v1696_v30, %v1700_v26 }
  0x64   : > { %2258 = vmatprep.mubr.msk.bf16.mxu0 %vm243_vm0, %v2116_v37 }
  0x69   : > { %2259 = vmatmul.mubr.msk.bf16.gmra.mxu0 %vm243_vm0, %v2117_v47 }
  0xd9   : > { %v2180_v36 = vpop.f32.mrf.mxu1 }
  0xda   : > { %327 = vst.msk [vmem:[#allocation2 + $0x30] sm:$0xff] %vm243_vm0, %v2180_v36 }
  0xdb   : > { %v2176_v44 = vpop.f32.mrf.mxu0  ;;  %v306_v42 = vpop.f32.mrf.mxu1 }
  0xdc   : > { %323 = vst.msk [vmem:[#allocation2 + $0x10] sm:$0xff] %vm243_vm0, %v2176_v44  ;;  %325 = vst.msk [vmem:[#allocation2 + $0x20] sm:$0xff] %vm243_vm0, %v306_v42 }
  0xdd   : > { %v290_v48 = vpop.f32.mrf.mxu0  ;;  %v2181_v28 = vpop.f32.mrf.mxu1 }
  0xde   : > { %321 = vst.msk [vmem:[#allocation2] sm:$0xff] %vm243_vm0, %v290_v48  ;;  %328 = vst.msk [vmem:[#allocation2 + $0x38] sm:$0xff] %vm243_vm0, %v2181_v28 }
  0xdf   : > { %v2177_v1 = vpop.f32.mrf.mxu0  ;;  %v309_v10 = vpop.f32.mrf.mxu1 }
  0xe0   : > { %324 = vst.msk [vmem:[#allocation2 + $0x18] sm:$0xff] %vm243_vm0, %v2177_v1  ;;  %326 = vst.msk [vmem:[#allocation2 + $0x28] sm:$0xff] %vm243_vm0, %v309_v10 }
  0xe1   : > { %v293_v49 = vpop.f32.mrf.mxu0  ;;  %v548_v35 = vld [vmem:[#allocation2 + $0x30] sm:$0xff] }
  0xe2   : > { %322 = vst.msk [vmem:[#allocation2 + $0x8] sm:$0xff] %vm243_vm0, %v293_v49 }
  0xe3   : > { %v544_v50 = vld [vmem:[#allocation2 + $0x10] sm:$0xff]  ;;  %v546_v11 = vld [vmem:[#allocation2 + $0x20] sm:$0xff] }
  0xe5   : > { %v2186_v52 = vpop.f32.mrf.mxu1  ;;  %v542_v7 = vld [vmem:[#allocation2] sm:$0xff]  ;;  %v549_v16 = vld [vmem:[#allocation2 + $0x38] sm:$0xff] }
  0xe6   : > { %v552_v53 = vadd.f32 %v2186_v52, %v544_v50 }
  0xe7   : > { %v511_v55 = vpop.f32.mrf.mxu1  ;;  %v545_v57 = vld [vmem:[#allocation2 + $0x18] sm:$0xff]  ;;  %v2196_v46 = vpop.f32.mrf.mxu0  ;;  %v547_v18 = vld [vmem:[#allocation2 + $0x28] sm:$0xff] }
  0xe8   : > { %560 = vst.msk [vmem:[#allocation2 + $0x10] sm:$0xff] %vm243_vm0, %v552_v53  ;;  %v550_v38 = vadd.f32 %v542_v7, %v511_v55 }
  0xe9   : > { %v2187_v8 = vpop.f32.mrf.mxu1  ;;  %v543_v60 = vld [vmem:[#allocation2 + $0x8] sm:$0xff]  ;;  %v676_v54 = vpop.f32.mrf.mxu0 }
  0xea   : > { %558 = vst.msk [vmem:[#allocation2] sm:$0xff] %vm243_vm0, %v550_v38  ;;  %v553_v9 = vadd.f32 %v2187_v8, %v545_v57 }
  0xeb   : > { %v514_v62 = vpop.f32.mrf.mxu1  ;;  %v2197_v2 = vpop.f32.mrf.mxu0 }
  0xec   : > { %561 = vst.msk [vmem:[#allocation2 + $0x18] sm:$0xff] %vm243_vm0, %v553_v9  ;;  %v551_v23 = vadd.f32 %v543_v60, %v514_v62 }
  0xed   : > { %v679_v56 = vpop.f32.mrf.mxu0 }
  0xee   : > { %559 = vst.msk [vmem:[#allocation2 + $0x8] sm:$0xff] %vm243_vm0, %v551_v23  ;;  %v2190_v31 = vpop.f32.mrf.mxu1 }
  0xef   : > { %v709_v0 = vld [vmem:[#allocation2 + $0x10] sm:$0xff]  ;;  %v556_v39 = vadd.f32 %v2190_v31, %v548_v35  ;;  %v2200_v45 = vpop.f32.mrf.mxu0 }
  0xf0   : > { %v717_v3 = vadd.f32 %v2196_v46, %v709_v0  ;;  %v527_v14 = vpop.f32.mrf.mxu1 }
  0xf1   : > { %v707_v12 = vld [vmem:[#allocation2] sm:$0xff]  ;;  %564 = vst.msk [vmem:[#allocation2 + $0x30] sm:$0xff] %vm243_vm0, %v556_v39  ;;  %v554_v24 = vadd.f32 %v546_v11, %v527_v14  ;;  %v692_v17 = vpop.f32.mrf.mxu0 }
  0xf2   : > { %725 = vst.msk [vmem:[#allocation2 + $0x10] sm:$0xff] %vm243_vm0, %v717_v3  ;;  %v715_v40 = vadd.f32 %v707_v12, %v676_v54  ;;  %v2191_v61 = vpop.f32.mrf.mxu1 }
  0xf3   : > { %v710_v19 = vld [vmem:[#allocation2 + $0x18] sm:$0xff]  ;;  %562 = vst.msk [vmem:[#allocation2 + $0x20] sm:$0xff] %vm243_vm0, %v554_v24  ;;  %v557_v20 = vadd.f32 %v2191_v61, %v549_v16  ;;  %v2201_v15 = vpop.f32.mrf.mxu0 }
  0xf4   : > { %723 = vst.msk [vmem:[#allocation2] sm:$0xff] %vm243_vm0, %v715_v40  ;;  %v718_v4 = vadd.f32 %v2197_v2, %v710_v19  ;;  %v530_v58 = vpop.f32.mrf.mxu1 }
  0xf5   : > { %v708_v51 = vld [vmem:[#allocation2 + $0x8] sm:$0xff]  ;;  %565 = vst.msk [vmem:[#allocation2 + $0x38] sm:$0xff] %vm243_vm0, %v557_v20  ;;  %v555_v22 = vadd.f32 %v547_v18, %v530_v58  ;;  %v695_v33 = vpop.f32.mrf.mxu0 }
  0xf6   : > { %726 = vst.msk [vmem:[#allocation2 + $0x18] sm:$0xff] %vm243_vm0, %v718_v4  ;;  %v716_v59 = vadd.f32 %v708_v51, %v679_v56  ;;  %v2206_v21 = vpop.f32.mrf.mxu1 }
  0xf7   : > { %563 = vst.msk [vmem:[#allocation2 + $0x28] sm:$0xff] %vm243_vm0, %v555_v22 }
  0xf8   : > { %724 = vst.msk [vmem:[#allocation2 + $0x8] sm:$0xff] %vm243_vm0, %v716_v59  ;;  %v713_v13 = vld [vmem:[#allocation2 + $0x30] sm:$0xff]  ;;  %v826_v25 = vpop.f32.mrf.mxu1 }
  0xf9   : > { %v721_v6 = vadd.f32 %v2200_v45, %v713_v13  ;;  %v859_v29 = vld [vmem:[#allocation2 + $0x10] sm:$0xff] }
  0xfa   : > { %v711_v63 = vld [vmem:[#allocation2 + $0x20] sm:$0xff]  ;;  %v867_v5 = vadd.f32 %v2206_v21, %v859_v29  ;;  %v2207_v32 = vpop.f32.mrf.mxu1 }
  0xfb   : > { %729 = vst.msk [vmem:[#allocation2 + $0x30] sm:$0xff] %vm243_vm0, %v721_v6  ;;  %v719_v34 = vadd.f32 %v711_v63, %v692_v17  ;;  %v857_v43 = vld [vmem:[#allocation2] sm:$0xff] }
  0xfc   : > { %v714_v27 = vld [vmem:[#allocation2 + $0x38] sm:$0xff]  ;;  %875 = vst.msk [vmem:[#allocation2 + $0x10] sm:$0xff] %vm243_vm0, %v867_v5  ;;  %v865_v41 = vadd.f32 %v857_v43, %v826_v25  ;;  %v829_v37 = vpop.f32.mrf.mxu1 }
  0xfd   : > { %727 = vst.msk [vmem:[#allocation2 + $0x20] sm:$0xff] %vm243_vm0, %v719_v34  ;;  %v722_v30 = vadd.f32 %v2201_v15, %v714_v27  ;;  %v860_v26 = vld [vmem:[#allocation2 + $0x18] sm:$0xff] }
  0xfe   : > { %v712_v47 = vld [vmem:[#allocation2 + $0x28] sm:$0xff]  ;;  %873 = vst.msk [vmem:[#allocation2] sm:$0xff] %vm243_vm0, %v865_v41  ;;  %v868_v36 = vadd.f32 %v2207_v32, %v860_v26  ;;  %v2210_v44 = vpop.f32.mrf.mxu1  ;;  %v2216_v42 = vpop.f32.mrf.mxu0 }
  0xff   : > { %730 = vst.msk [vmem:[#allocation2 + $0x38] sm:$0xff] %vm243_vm0, %v722_v30  ;;  %v720_v48 = vadd.f32 %v712_v47, %v695_v33  ;;  %v858_v28 = vld [vmem:[#allocation2 + $0x8] sm:$0xff] }
 0x100   : > { %876 = vst.msk [vmem:[#allocation2 + $0x18] sm:$0xff] %vm243_vm0, %v868_v36  ;;  %v866_v1 = vadd.f32 %v858_v28, %v829_v37  ;;  %v842_v10 = vpop.f32.mrf.mxu1  ;;  %v1060_v49 = vpop.f32.mrf.mxu0 }
 0x101   : > { %728 = vst.msk [vmem:[#allocation2 + $0x28] sm:$0xff] %vm243_vm0, %v720_v48 }
 0x102   : > { %874 = vst.msk [vmem:[#allocation2 + $0x8] sm:$0xff] %vm243_vm0, %v866_v1  ;;  %v863_v50 = vld [vmem:[#allocation2 + $0x30] sm:$0xff]  ;;  %v2211_v52 = vpop.f32.mrf.mxu1  ;;  %v2217_v7 = vpop.f32.mrf.mxu0 }
 0x103   : > { %v871_v53 = vadd.f32 %v2210_v44, %v863_v50  ;;  %v1093_v55 = vld [vmem:[#allocation2 + $0x10] sm:$0xff] }
 0x104   : > { %v1101_v57 = vadd.f32 %v2216_v42, %v1093_v55  ;;  %v861_v46 = vld [vmem:[#allocation2 + $0x20] sm:$0xff]  ;;  %v845_v38 = vpop.f32.mrf.mxu1  ;;  %v1063_v8 = vpop.f32.mrf.mxu0 }
 0x105   : > { %879 = vst.msk [vmem:[#allocation2 + $0x30] sm:$0xff] %vm243_vm0, %v871_v53  ;;  %v869_v60 = vadd.f32 %v861_v46, %v842_v10  ;;  %v1091_v54 = vld [vmem:[#allocation2] sm:$0xff] }
 0x106   : > { %1109 = vst.msk [vmem:[#allocation2 + $0x10] sm:$0xff] %vm243_vm0, %v1101_v57  ;;  %v1099_v9 = vadd.f32 %v1091_v54, %v1060_v49  ;;  %v864_v62 = vld [vmem:[#allocation2 + $0x38] sm:$0xff]  ;;  %v2220_v2 = vpop.f32.mrf.mxu0  ;;  %v2226_v23 = vpop.f32.mrf.mxu1 }
 0x107   : > { %877 = vst.msk [vmem:[#allocation2 + $0x20] sm:$0xff] %vm243_vm0, %v869_v60  ;;  %v872_v56 = vadd.f32 %v2211_v52, %v864_v62  ;;  %v1094_v31 = vld [vmem:[#allocation2 + $0x18] sm:$0xff] }
 0x108   : > { %1107 = vst.msk [vmem:[#allocation2] sm:$0xff] %vm243_vm0, %v1099_v9  ;;  %v1102_v35 = vadd.f32 %v2217_v7, %v1094_v31  ;;  %v862_v0 = vld [vmem:[#allocation2 + $0x28] sm:$0xff]  ;;  %v1076_v39 = vpop.f32.mrf.mxu0  ;;  %v1222_v3 = vpop.f32.mrf.mxu1 }
 0x109   : > { %880 = vst.msk [vmem:[#allocation2 + $0x38] sm:$0xff] %vm243_vm0, %v872_v56  ;;  %v870_v14 = vadd.f32 %v862_v0, %v845_v38  ;;  %v1092_v11 = vld [vmem:[#allocation2 + $0x8] sm:$0xff] }
 0x10a   : > { %1110 = vst.msk [vmem:[#allocation2 + $0x18] sm:$0xff] %vm243_vm0, %v1102_v35  ;;  %v1100_v45 = vadd.f32 %v1092_v11, %v1063_v8  ;;  %v2221_v12 = vpop.f32.mrf.mxu0  ;;  %v2227_v24 = vpop.f32.mrf.mxu1 }
 0x10b   : > { %878 = vst.msk [vmem:[#allocation2 + $0x28] sm:$0xff] %vm243_vm0, %v870_v14 }
 0x10c   : > { %1108 = vst.msk [vmem:[#allocation2 + $0x8] sm:$0xff] %vm243_vm0, %v1100_v45  ;;  %v1097_v40 = vld [vmem:[#allocation2 + $0x30] sm:$0xff]  ;;  %v1079_v61 = vpop.f32.mrf.mxu0  ;;  %v1225_v16 = vpop.f32.mrf.mxu1 }
 0x10d   : > { %v1105_v19 = vadd.f32 %v2220_v2, %v1097_v40  ;;  %v1255_v20 = vld [vmem:[#allocation2 + $0x10] sm:$0xff] }
 0x10e   : > { %v1095_v4 = vld [vmem:[#allocation2 + $0x20] sm:$0xff]  ;;  %v1263_v58 = vadd.f32 %v2226_v23, %v1255_v20  ;;  %v2230_v18 = vpop.f32.mrf.mxu1  ;;  %v2236_v17 = vpop.f32.mrf.mxu0 }
 0x10f   : > { %1113 = vst.msk [vmem:[#allocation2 + $0x30] sm:$0xff] %vm243_vm0, %v1105_v19  ;;  %v1103_v51 = vadd.f32 %v1095_v4, %v1076_v39  ;;  %v1253_v22 = vld [vmem:[#allocation2] sm:$0xff] }
 0x110   : > { %1271 = vst.msk [vmem:[#allocation2 + $0x10] sm:$0xff] %vm243_vm0, %v1263_v58  ;;  %v1098_v59 = vld [vmem:[#allocation2 + $0x38] sm:$0xff]  ;;  %v1261_v21 = vadd.f32 %v1253_v22, %v1222_v3  ;;  %v1238_v13 = vpop.f32.mrf.mxu1  ;;  %v1372_v15 = vpop.f32.mrf.mxu0 }
 0x111   : > { %1111 = vst.msk [vmem:[#allocation2 + $0x20] sm:$0xff] %vm243_vm0, %v1103_v51  ;;  %v1106_v25 = vadd.f32 %v2221_v12, %v1098_v59  ;;  %v1256_v6 = vld [vmem:[#allocation2 + $0x18] sm:$0xff] }
 0x112   : > { %1269 = vst.msk [vmem:[#allocation2] sm:$0xff] %vm243_vm0, %v1261_v21  ;;  %v1096_v29 = vld [vmem:[#allocation2 + $0x28] sm:$0xff]  ;;  %v1264_v63 = vadd.f32 %v2227_v24, %v1256_v6  ;;  %v2231_v5 = vpop.f32.mrf.mxu1  ;;  %v2237_v32 = vpop.f32.mrf.mxu0 }
 0x113   : > { %1114 = vst.msk [vmem:[#allocation2 + $0x38] sm:$0xff] %vm243_vm0, %v1106_v25  ;;  %v1104_v34 = vadd.f32 %v1096_v29, %v1079_v61  ;;  %v1254_v43 = vld [vmem:[#allocation2 + $0x8] sm:$0xff] }
 0x114   : > { %1272 = vst.msk [vmem:[#allocation2 + $0x18] sm:$0xff] %vm243_vm0, %v1264_v63  ;;  %v1262_v27 = vadd.f32 %v1254_v43, %v1225_v16  ;;  %v1375_v33 = vpop.f32.mrf.mxu0  ;;  %v1241_v37 = vpop.f32.mrf.mxu1 }
 0x115   : > { %1112 = vst.msk [vmem:[#allocation2 + $0x28] sm:$0xff] %vm243_vm0, %v1104_v34 }
 0x116   : > { %1270 = vst.msk [vmem:[#allocation2 + $0x8] sm:$0xff] %vm243_vm0, %v1262_v27  ;;  %v1259_v41 = vld [vmem:[#allocation2 + $0x30] sm:$0xff]  ;;  %v2240_v30 = vpop.f32.mrf.mxu0 }
 0x117   : > { %v1267_v26 = vadd.f32 %v2230_v18, %v1259_v41  ;;  %v1405_v47 = vld [vmem:[#allocation2 + $0x10] sm:$0xff] }
 0x118   : > { %v1257_v36 = vld [vmem:[#allocation2 + $0x20] sm:$0xff]  ;;  %v1413_v44 = vadd.f32 %v2236_v17, %v1405_v47  ;;  %v1388_v42 = vpop.f32.mrf.mxu0  ;;  %v2246_v48 = vpop.f32.mrf.mxu1 }
 0x119   : > { %1275 = vst.msk [vmem:[#allocation2 + $0x30] sm:$0xff] %vm243_vm0, %v1267_v26  ;;  %v1265_v28 = vadd.f32 %v1257_v36, %v1238_v13  ;;  %v1403_v1 = vld [vmem:[#allocation2] sm:$0xff] }
 0x11a   : > { %1421 = vst.msk [vmem:[#allocation2 + $0x10] sm:$0xff] %vm243_vm0, %v1413_v44  ;;  %v1260_v10 = vld [vmem:[#allocation2 + $0x38] sm:$0xff]  ;;  %v1411_v49 = vadd.f32 %v1403_v1, %v1372_v15  ;;  %v1606_v50 = vpop.f32.mrf.mxu1  ;;  %v2241_v53 = vpop.f32.mrf.mxu0  ;;  %v2123_v26 = vld [vmem:[%s2966_s2] ss:$0 sm:$0xff] }
 0x11b   : > { %1273 = vst.msk [vmem:[#allocation2 + $0x20] sm:$0xff] %vm243_vm0, %v1265_v28  ;;  %v1268_v52 = vadd.f32 %v2231_v5, %v1260_v10  ;;  %v1406_v7 = vld [vmem:[#allocation2 + $0x18] sm:$0xff] }
 0x11c   : > { %1419 = vst.msk [vmem:[#allocation2] sm:$0xff] %vm243_vm0, %v1411_v49  ;;  %v1258_v55 = vld [vmem:[#allocation2 + $0x28] sm:$0xff]  ;;  %v1414_v57 = vadd.f32 %v2237_v32, %v1406_v7  ;;  %v2247_v46 = vpop.f32.mrf.mxu1  ;;  %v1391_v54 = vpop.f32.mrf.mxu0 }
 0x11d   : > { %1276 = vst.msk [vmem:[#allocation2 + $0x38] sm:$0xff] %vm243_vm0, %v1268_v52  ;;  %v1266_v38 = vadd.f32 %v1258_v55, %v1241_v37  ;;  %v1404_v8 = vld [vmem:[#allocation2 + $0x8] sm:$0xff] }
 0x11e   : > { %1422 = vst.msk [vmem:[#allocation2 + $0x18] sm:$0xff] %vm243_vm0, %v1414_v57  ;;  %v1412_v60 = vadd.f32 %v1404_v8, %v1375_v33  ;;  %v1609_v62 = vpop.f32.mrf.mxu1 }
 0x11f   : > { %1274 = vst.msk [vmem:[#allocation2 + $0x28] sm:$0xff] %vm243_vm0, %v1266_v38 }
 0x120   : > { %1420 = vst.msk [vmem:[#allocation2 + $0x8] sm:$0xff] %vm243_vm0, %v1412_v60  ;;  %v1409_v9 = vld [vmem:[#allocation2 + $0x30] sm:$0xff]  ;;  %v2250_v45 = vpop.f32.mrf.mxu1 }
 0x121   : > { %v1417_v2 = vadd.f32 %v2240_v30, %v1409_v9  ;;  %v1639_v23 = vld [vmem:[#allocation2 + $0x10] sm:$0xff]  ;;  %v2256_v56 = vpop.f32.mrf.mxu0 }
 0x122   : > { %v1407_v31 = vld [vmem:[#allocation2 + $0x20] sm:$0xff]  ;;  %v1647_v35 = vadd.f32 %v2246_v48, %v1639_v23  ;;  %v1622_v58 = vpop.f32.mrf.mxu1 }
 0x123   : > { %1425 = vst.msk [vmem:[#allocation2 + $0x30] sm:$0xff] %vm243_vm0, %v1417_v2  ;;  %v1415_v0 = vadd.f32 %v1407_v31, %v1388_v42  ;;  %v1637_v39 = vld [vmem:[#allocation2] sm:$0xff]  ;;  %v1768_v3 = vpop.f32.mrf.mxu0 }
 0x124   : > { %1655 = vst.msk [vmem:[#allocation2 + $0x10] sm:$0xff] %vm243_vm0, %v1647_v35  ;;  %v1410_v14 = vld [vmem:[#allocation2 + $0x38] sm:$0xff]  ;;  %v1645_v11 = vadd.f32 %v1637_v39, %v1606_v50  ;;  %v2251_v13 = vpop.f32.mrf.mxu1 }
 0x125   : > { %1423 = vst.msk [vmem:[#allocation2 + $0x20] sm:$0xff] %vm243_vm0, %v1415_v0  ;;  %v1418_v12 = vadd.f32 %v2241_v53, %v1410_v14  ;;  %v1640_v24 = vld [vmem:[#allocation2 + $0x18] sm:$0xff]  ;;  %v2257_v16 = vpop.f32.mrf.mxu0 }
 0x126   : > { %1653 = vst.msk [vmem:[#allocation2] sm:$0xff] %vm243_vm0, %v1645_v11  ;;  %v1408_v40 = vld [vmem:[#allocation2 + $0x28] sm:$0xff]  ;;  %v1648_v61 = vadd.f32 %v2247_v46, %v1640_v24  ;;  %v1625_v34 = vpop.f32.mrf.mxu1 }
 0x127   : > { %1426 = vst.msk [vmem:[#allocation2 + $0x38] sm:$0xff] %vm243_vm0, %v1418_v12  ;;  %v1416_v19 = vadd.f32 %v1408_v40, %v1391_v54  ;;  %v1638_v20 = vld [vmem:[#allocation2 + $0x8] sm:$0xff]  ;;  %v1771_v17 = vpop.f32.mrf.mxu0 }
 0x128   : > { %1656 = vst.msk [vmem:[#allocation2 + $0x18] sm:$0xff] %vm243_vm0, %v1648_v61  ;;  %v1646_v4 = vadd.f32 %v1638_v20, %v1609_v62 }
 0x129   : > { %1424 = vst.msk [vmem:[#allocation2 + $0x28] sm:$0xff] %vm243_vm0, %v1416_v19  ;;  %v2260_v63 = vpop.f32.mrf.mxu0 }
 0x12a   : > { %1654 = vst.msk [vmem:[#allocation2 + $0x8] sm:$0xff] %vm243_vm0, %v1646_v4  ;;  %v1643_v18 = vld [vmem:[#allocation2 + $0x30] sm:$0xff] }
 0x12b   : > { %v1651_v51 = vadd.f32 %v2250_v45, %v1643_v18  ;;  %v1801_v22 = vld [vmem:[#allocation2 + $0x10] sm:$0xff]  ;;  %v1784_v30 = vpop.f32.mrf.mxu0 }
 0x12c   : > { %v1641_v59 = vld [vmem:[#allocation2 + $0x20] sm:$0xff]  ;;  %v1809_v21 = vadd.f32 %v2256_v56, %v1801_v22 }
 0x12d   : > { %1659 = vst.msk [vmem:[#allocation2 + $0x30] sm:$0xff] %vm243_vm0, %v1651_v51  ;;  %v1649_v15 = vadd.f32 %v1641_v59, %v1622_v58  ;;  %v1799_v25 = vld [vmem:[#allocation2] sm:$0xff]  ;;  %v2261_v28 = vpop.f32.mrf.mxu0 }
 0x12e   : > { %1817 = vst.msk [vmem:[#allocation2 + $0x10] sm:$0xff] %vm243_vm0, %v1809_v21  ;;  %v1644_v6 = vld [vmem:[#allocation2 + $0x38] sm:$0xff]  ;;  %v1807_v29 = vadd.f32 %v1799_v25, %v1768_v3 }
 0x12f   : > { %1657 = vst.msk [vmem:[#allocation2 + $0x20] sm:$0xff] %vm243_vm0, %v1649_v15  ;;  %v1652_v5 = vadd.f32 %v2251_v13, %v1644_v6  ;;  %v1802_v32 = vld [vmem:[#allocation2 + $0x18] sm:$0xff]  ;;  %v1787_v38 = vpop.f32.mrf.mxu0 }
 0x130   : > { %1815 = vst.msk [vmem:[#allocation2] sm:$0xff] %vm243_vm0, %v1807_v29  ;;  %v1642_v43 = vld [vmem:[#allocation2 + $0x28] sm:$0xff]  ;;  %v1810_v27 = vadd.f32 %v2257_v16, %v1802_v32 }
 0x131   : > { %1660 = vst.msk [vmem:[#allocation2 + $0x38] sm:$0xff] %vm243_vm0, %v1652_v5  ;;  %v1650_v33 = vadd.f32 %v1642_v43, %v1625_v34  ;;  %v1800_v41 = vld [vmem:[#allocation2 + $0x8] sm:$0xff] }
 0x132   : > { %1818 = vst.msk [vmem:[#allocation2 + $0x18] sm:$0xff] %vm243_vm0, %v1810_v27  ;;  %v1808_v37 = vadd.f32 %v1800_v41, %v1771_v17 }
 0x133   : > { %1658 = vst.msk [vmem:[#allocation2 + $0x28] sm:$0xff] %vm243_vm0, %v1650_v33 }
 0x134   : > { %1816 = vst.msk [vmem:[#allocation2 + $0x8] sm:$0xff] %vm243_vm0, %v1808_v37  ;;  %v1805_v47 = vld [vmem:[#allocation2 + $0x30] sm:$0xff] }
 0x135   : > { %v1825_v36 = vld [vmem:[#allocation2 + $0x10] sm:$0xff]  ;;  %v1813_v44 = vadd.f32 %v2260_v63, %v1805_v47 }
 0x136   : > { %v1840_v42 = vadd.f32 %v2123_v26, %v1825_v36  ;;  %v1803_v48 = vld [vmem:[#allocation2 + $0x20] sm:$0xff] }
 0x137   : > { %v1823_v1 = vld [vmem:[#allocation2] sm:$0xff]  ;;  %1821 = vst.msk [vmem:[#allocation2 + $0x30] sm:$0xff] %vm243_vm0, %v1813_v44  ;;  %v1811_v10 = vadd.f32 %v1803_v48, %v1784_v30 }
 0x138   : > { %v1848_v49 = vmax.f32 %v1840_v42, 0.0  ;;  %v1838_v50 = vadd.f32 %v2123_v26, %v1823_v1  ;;  %v1806_v52 = vld [vmem:[#allocation2 + $0x38] sm:$0xff] }
 0x139   : > { %v1826_v7 = vld [vmem:[#allocation2 + $0x18] sm:$0xff]  ;;  %1819 = vst.msk [vmem:[#allocation2 + $0x20] sm:$0xff] %vm243_vm0, %v1811_v10  ;;  %v1814_v53 = vadd.f32 %v2261_v28, %v1806_v52 }
 0x13a   : > { %v1856_v55 = vpack.c.bf16 %v1848_v49, %v1848_v49  ;;  %v1846_v57 = vmax.f32 %v1838_v50, 0.0  ;;  %v1841_v46 = vadd.f32 %v2123_v26, %v1826_v7  ;;  %v1804_v8 = vld [vmem:[#allocation2 + $0x28] sm:$0xff] }
 0x13b   : > { %v1824_v60 = vld [vmem:[#allocation2 + $0x8] sm:$0xff]  ;;  %1822 = vst.msk [vmem:[#allocation2 + $0x38] sm:$0xff] %vm243_vm0, %v1814_v53  ;;  %v1812_v54 = vadd.f32 %v1804_v8, %v1787_v38 }
 0x13c   : > { %1865 = vst.msk [vmem:[%s2934_s20 + $0x8] sm:$0xf] %vm1862_vm7, %v1856_v55  ;;  %v1854_v9 = vpack.c.bf16 %v1846_v57, %v1846_v57  ;;  %v1849_v62 = vmax.f32 %v1841_v46, 0.0  ;;  %v1839_v2 = vadd.f32 %v2123_v26, %v1824_v60 }
 0x13d   : > { %1820 = vst.msk [vmem:[#allocation2 + $0x28] sm:$0xff] %vm243_vm0, %v1812_v54 }
 0x13e   : > { %1863 = vst.msk [vmem:[%s2934_s20] sm:$0xf] %vm1862_vm7, %v1854_v9  ;;  %v1857_v23 = vpack.c.bf16 %v1849_v62, %v1849_v62  ;;  %v1847_v56 = vmax.f32 %v1839_v2, 0.0  ;;  %v1829_v31 = vld [vmem:[#allocation2 + $0x30] sm:$0xff] }
 0x13f   : > { %v1844_v35 = vadd.f32 %v2123_v26, %v1829_v31 }
 0x140   : > { %1866 = vst.msk [vmem:[%s2934_s20 + $0xc] sm:$0xf] %vm1862_vm7, %v1857_v23  ;;  %v1855_v0 = vpack.c.bf16 %v1847_v56, %v1847_v56  ;;  %v1827_v39 = vld [vmem:[#allocation2 + $0x20] sm:$0xff] }
 0x141   : > { %v1852_v3 = vmax.f32 %v1844_v35, 0.0  ;;  %v1842_v14 = vadd.f32 %v2123_v26, %v1827_v39 }
 0x142   : > { %1864 = vst.msk [vmem:[%s2934_s20 + $0x4] sm:$0xf] %vm1862_vm7, %v1855_v0  ;;  %v1830_v11 = vld [vmem:[#allocation2 + $0x38] sm:$0xff] }
 0x143   : > { %v1860_v45 = vpack.c.bf16 %v1852_v3, %v1852_v3  ;;  %v1850_v12 = vmax.f32 %v1842_v14, 0.0  ;;  %v1845_v24 = vadd.f32 %v2123_v26, %v1830_v11 }
 0x144   : > { %v1828_v40 = vld [vmem:[#allocation2 + $0x28] sm:$0xff] }
 0x145   : > { %1869 = vst.msk [vmem:[%s2934_s20 + $0x18] sm:$0xf] %vm1862_vm7, %v1860_v45  ;;  %v1858_v61 = vpack.c.bf16 %v1850_v12, %v1850_v12  ;;  %v1853_v16 = vmax.f32 %v1845_v24, 0.0  ;;  %v1843_v19 = vadd.f32 %v2123_v26, %v1828_v40 }
 0x147   : > { %1867 = vst.msk [vmem:[%s2934_s20 + $0x10] sm:$0xf] %vm1862_vm7, %v1858_v61  ;;  %v1861_v20 = vpack.c.bf16 %v1853_v16, %v1853_v16  ;;  %v1851_v4 = vmax.f32 %v1843_v19, 0.0 }
 0x149   : > { %1870 = vst.msk [vmem:[%s2934_s20 + $0x1c] sm:$0xf] %vm1862_vm7, %v1861_v20  ;;  %v1859_v58 = vpack.c.bf16 %v1851_v4, %v1851_v4 }
 0x14b   : > { %1868 = vst.msk [vmem:[%s2934_s20 + $0x14] sm:$0xf] %vm1862_vm7, %v1859_v58 }
 0x14c PF: > { %s13_s14 = sadd.s32 1, %s2332_s14   ;;  %s2972_s12 = smov %s2328_s13 }
 0x14d   : > { %p10_p5 = scmp.ge.s32.totalorder %s13_s14, 4   ;;  %s2973_s13 = smov %s2975_s15 }
 0x14f   :  { %12 = sbr.rel (!%p10_p5) target bundleno = 2 (0x2), region = 73 }

// kernel: rtdetr_resnet_embeddings.6
= control target key start
LH: loop header
LB: loop body
LE: loop exit
PB: predicated region body
PF: predicated region fallthrough
CT: control target
= control target key end

     0   :  { %s2346_s12 = smov 0   ;;  %s2348_s13 = smov 0   ;;  %s2956_s0 = inlined_call_operand.vmem [shape: bf16[2,1,10,10,16], index: 0, kind: input, shape index: {}]   ;;  %s2957_s1 = inlined_call_operand.vmem [shape: bf16[3,3,16,32], index: 1, kind: input, shape index: {}]   ;;  %s2958_s2 = inlined_call_operand.vmem [shape: f32[1,32], index: 2, kind: input, shape index: {}]   ;;  %s2959_s3 = inlined_call_operand.vmem [shape: f32[2,8,8,32], index: 3, kind: output, shape index: {}]  }
   0x1   :  { %s2350_s14 = smov 0  }
   0x2 LB: > { %s25_s15 = sadd.s32 1, %s2320_s13  ;;  %p1958_p0 = scmp.ge.s32.totalorder %s2324_s14, 1  ;;  %s2324_s14 = sphi %s2350_s14, %s13_s14   ;;  %s2320_s13 = sphi %s2348_s13, %s2965_s13   ;;  %s2316_s12 = sphi %s2346_s12, %s2964_s12  }
   0x3   : > { %p27_p1 = scmp.ge.s32.totalorder %s25_s15, 2  ;;  %p151_p2 = scmp.lt.s32.totalorder %s2324_s14, 3 }
   0x5   : > { %s2967_s15 = smov (%p27_p1, %s25_s15), 0  ;;  %p152_p3 = pnand %p1958_p0, %p151_p2 }
   0x6   : > { %p179_p4 = scmp.lt.s32.totalorder (!%p152_p3), %s2316_s12, 1 }
   0x7   : > { %155 = sbr.rel (%p152_p3) target bundleno = 330 (0x14a), region = 32 }
   0xc   : > { %v2281_v0 = vld [vmem:[%s2957_s1] sm:$0xff]   ;;  %v2370_v1 = vld [vmem:[%s2957_s1 + $0x8] sm:$0xff]   ;;  %s2969_s12 = smov (!%p179_p4, %s2316_s12), 1  ;;  %v2377_v2 = vld [vmem:[%s2957_s1 + $0x10] sm:$0xff]   ;;  %vm243_vm0 = vcmask 130048   ;;  %vm575_vm1 = vcmask 1042432  }
   0xd   : > { %2254 = vmatprep.subr.bf16.mxu1 %v2281_v0  ;;  %2164 = vmatprep.subr.bf16.mxu0 %v2281_v0  ;;  %s2256_s22 = smul.u32 80, %s2969_s12  ;;  %vm576_vm2 = vcmask 1046532   ;;  %vm330_vm3 = vsmask.f32 3328  ;;  %vm331_vm4 = vsmask.f32 7440 }
   0xe   : > { %2255 = vmatpush3.bf16.msra.mxu1 %v2281_v0  ;;  %2165 = vmatpush3.bf16.msra.mxu0 %v2281_v0  ;;  %v2438_v39 = vld [vmem:[%s2957_s1 + $0x18] sm:$0xff]   ;;  %v2455_v51 = vld [vmem:[%s2957_s1 + $0x20] sm:$0xff]   ;;  %vm2468_vm5 = vmor %vm575_vm1, %vm576_vm2  ;;  %vm321_vm7 = vcmask 261120   ;;  %s2118_s17 = sshll.u32 %s2969_s12, 6 }
   0xf   : > { %2174 = vmatprep.subr.bf16.mxu1 %v2370_v1  ;;  %2184 = vmatprep.subr.bf16.mxu0 %v2377_v2  ;;  %s2385_s25 = scalar_lea.vmem %s2956_s0, %s2256_s22  ;;  %vm2474_vm6 = vmor %vm330_vm3, %vm331_vm4  ;;  %s2925_s20 = scalar_lea.vmem %s2959_s3, %s2118_s17 }
  0x10   : > { %v2388_v3 = vld [vmem:[%s2385_s25 + $0x20] sm:$0xf]  ;;  %v2391_v4 = vld [vmem:[%s2385_s25 + $0x28] sm:$0xf]  ;;  %v2412_v19 = vld [vmem:[%s2385_s25 + $0x30] sm:$0xf] }
  0x11   : > { %v2394_v5 = vld [vmem:[%s2385_s25] sm:$0xf]  ;;  %v1964_v6 = vcombine.low %v2388_v3, %v2391_v4  ;;  %v390_v7 = vshrl.u32 %v2388_v3, 16  ;;  %v393_v8 = vshll.u32 %v2388_v3, 16  ;;  %v404_v9 = vshrl.u32 %v2391_v4, 16 }
  0x12   : > { %v2402_v10 = vld [vmem:[%s2385_s25 + $0x8] sm:$0xf]  ;;  %v407_v11 = vshll.u32 %v2391_v4, 16  ;;  %v1986_v12 = vrot.slane %v2388_v3, 9  ;;  %v1987_v13 = vrot.slane %v2391_v4, 9  ;;  %v334_v18 = vshrl.u32 %v2394_v5, 16 }
  0x13   : > { %v1962_v14 = vcombine.low %v2394_v5, %v2402_v10  ;;  %2170 = vmatprep.mubr.msk.bf16.mxu1 %vm243_vm0, %v1964_v6  ;;  %v392_v15 = vrot.slane %v390_v7, 4  ;;  %v395_v16 = vrot.slane %v393_v8, 5  ;;  %v406_v17 = vrot.slane %v404_v9, 4  ;;  %v2419_v24 = vld [vmem:[%s2385_s25 + $0x38] sm:$0xf] }
  0x14   : > { %v409_v20 = vrot.slane %v407_v11, 5  ;;  %v337_v21 = vshll.u32 %v2394_v5, 16  ;;  %v348_v22 = vshrl.u32 %v2402_v10, 16  ;;  %v351_v23 = vshll.u32 %v2402_v10, 16  ;;  %v2424_v29 = vld [vmem:[%s2385_s25 + $0x10] sm:$0xf] }
  0x15   : > { %2166 = vmatprep.mubr.msk.bf16.mxu0 %vm243_vm0, %v1962_v14  ;;  %v396_v25 = vor.u32 %v395_v16, %v392_v15  ;;  %v336_v26 = vrot.slane %v334_v18, 4  ;;  %v1982_v27 = vrot.slane %v2394_v5, 9  ;;  %v1983_v28 = vrot.slane %v2402_v10, 9  ;;  %v2427_v34 = vld [vmem:[%s2385_s25 + $0x18] sm:$0xf] }
  0x16   : > { %v410_v30 = vor.u32 %v409_v20, %v406_v17  ;;  %v339_v31 = vrot.slane %v337_v21, 5  ;;  %v350_v32 = vrot.slane %v348_v22, 4  ;;  %v353_v33 = vrot.slane %v351_v23, 5  ;;  %v200_v44 = vld [vmem:[%s2385_s25 + $0x4] sm:$0x1] }
  0x17   : > { %v2429_v35 = vrot.slane %v396_v25, 4  ;;  %v1965_v36 = vcombine.low %v2412_v19, %v2419_v24  ;;  %v418_v37 = vshrl.u32 %v2412_v19, 16  ;;  %v421_v38 = vshll.u32 %v2412_v19, 16  ;;  %v202_v45 = vld [vmem:[%s2385_s25 + $0xc] sm:$0x1] }
  0x18   : > { %v2440_v40 = vrot.slane %v410_v30, 4  ;;  %v340_v41 = vor.u32 %v339_v31, %v336_v26  ;;  %v354_v42 = vor.u32 %v353_v33, %v350_v32  ;;  %v432_v43 = vshrl.u32 %v2419_v24, 16  ;;  %v204_v50 = vld [vmem:[%s2385_s25 + $0x14] sm:$0x1]  ;;  %v206_v56 = vld [vmem:[%s2385_s25 + $0x1c] sm:$0x1] }
  0x19   : > { %2171 = vmatmul.mubr.msk.bf16.vlgmr.msra.gmra.mxu1 %vm243_vm0, %v1965_v36  ;;  %v435_v46 = vshll.u32 %v2419_v24, 16  ;;  %v1963_v47 = vcombine.low %v2424_v29, %v2427_v34  ;;  %v362_v48 = vshrl.u32 %v2424_v29, 16  ;;  %v365_v49 = vshll.u32 %v2424_v29, 16  ;;  %v208_v16 = vld [vmem:[%s2385_s25 + $0x24] sm:$0x1] }
  0x1a   : > { %v341_v52 = vrot.slane %v340_v41, 4  ;;  %v355_v53 = vrot.slane %v354_v42, 4  ;;  %v376_v54 = vshrl.u32 %v2427_v34, 16  ;;  %v379_v55 = vshll.u32 %v2427_v34, 16  ;;  %2175 = vmatpush3.bf16.msra.mxu1 %v2370_v1  ;;  %v210_v22 = vld [vmem:[%s2385_s25 + $0x2c] sm:$0x1] }
  0x1b   : > { %2167 = vmatmul.mubr.msk.bf16.vlgmr.msra.gmra.mxu0 %vm243_vm0, %v1963_v47  ;;  %v364_v57 = vrot.slane %v362_v48, 4  ;;  %v367_v58 = vrot.slane %v365_v49, 5  ;;  %v1984_v59 = vrot.slane %v2424_v29, 9  ;;  %v1985_v60 = vrot.slane %v2427_v34, 9  ;;  %2194 = vmatprep.subr.bf16.mxu1 %v2438_v39  ;;  %v212_v33 = vld [vmem:[%s2385_s25 + $0x34] sm:$0x1] }
  0x1c   : > { %v378_v61 = vrot.slane %v376_v54, 4  ;;  %v381_v62 = vrot.slane %v379_v55, 5  ;;  %v343_v63 = vshll.u32 %v200_v44, 16  ;;  %v357_v0 = vshll.u32 %v202_v45, 16  ;;  %2185 = vmatpush3.bf16.msra.mxu0 %v2377_v2  ;;  %v2508_v48 = vld [vmem:[%s2957_s1 + $0x28] sm:$0xff]  }
  0x1d   : > { %v368_v6 = vor.u32 %v367_v58, %v364_v57  ;;  %v371_v7 = vshll.u32 %v204_v50, 16  ;;  %v385_v8 = vshll.u32 %v206_v56, 16  ;;  %v580_v9 = vrot.slane %v200_v44, 5  ;;  %2204 = vmatprep.subr.bf16.mxu0 %v2455_v51 }
  0x1e   : > { %v345_v2 = vrot.slane %v343_v63, 5  ;;  %v359_v11 = vrot.slane %v357_v0, 5  ;;  %v382_v14 = vor.u32 %v381_v62, %v378_v61  ;;  %v584_v15 = vrot.slane %v202_v45, 5  ;;  %v2534_v63 = vld [vmem:[%s2385_s25 + $0x10] sm:$0xf] }
  0x1f   : > { %v369_v17 = vrot.slane %v368_v6, 4  ;;  %v373_v18 = vrot.slane %v371_v7, 5  ;;  %v387_v20 = vrot.slane %v385_v8, 5  ;;  %v581_v21 = vsel %vm2468_vm5, %v1982_v27, %v580_v9 }
  0x20   : > { %v346_v23 = vsel %vm2474_vm6, %v341_v52, %v345_v2  ;;  %v360_v25 = vsel %vm2474_vm6, %v355_v53, %v359_v11  ;;  %v383_v26 = vrot.slane %v382_v14, 4  ;;  %v585_v29 = vsel %vm2468_vm5, %v1983_v28, %v584_v15  ;;  %v214_v28 = vld [vmem:[%s2385_s25 + $0x3c] sm:$0x1]  ;;  %v2548_v11 = vld [vmem:[%s2385_s25 + $0x18] sm:$0xf] }
  0x21   : > { %v1973_v30 = vcombine.low %v346_v23, %v360_v25  ;;  %v374_v31 = vsel %vm2474_vm6, %v369_v17, %v373_v18  ;;  %v1992_v32 = vcombine.low %v581_v21, %v585_v29  ;;  %v588_v27 = vrot.slane %v204_v50, 5  ;;  %v2567_v17 = vld [vmem:[%s2385_s25 + $0x28] sm:$0xf]  ;;  %v2577_v23 = vld [vmem:[%s2385_s25 + $0xc] sm:$0x1] }
  0x22   : > { %v388_v34 = vsel %vm2474_vm6, %v383_v26, %v387_v20  ;;  %v592_v36 = vrot.slane %v206_v56, 5  ;;  %v399_v41 = vshll.u32 %v208_v16, 16  ;;  %v413_v42 = vshll.u32 %v210_v22, 16  ;;  %v2520_v56 = vld [vmem:[%s2957_s1 + $0x30] sm:$0xff]  }
  0x23   : > { %2176 = vmatprep.mubr.msk.bf16.mxu1 %vm243_vm0, %v1973_v30  ;;  %v1974_v44 = vcombine.low %v374_v31, %v388_v34  ;;  %2186 = vmatprep.mubr.msk.bf16.mxu0 %vm243_vm0, %v1992_v32  ;;  %v589_v10 = vsel %vm2468_vm5, %v1984_v59, %v588_v27  ;;  %v420_v45 = vrot.slane %v418_v37, 4  ;;  %v423_v47 = vrot.slane %v421_v38, 5  ;;  %v2585_v31 = vld [vmem:[%s2385_s25 + $0x14] sm:$0x1]  ;;  %v2588_v32 = vld [vmem:[%s2385_s25 + $0x38] sm:$0xf] }
  0x24   : > { %v593_v49 = vsel %vm2468_vm5, %v1985_v60, %v592_v36  ;;  %v401_v50 = vrot.slane %v399_v41, 5  ;;  %v415_v52 = vrot.slane %v413_v42, 5  ;;  %v427_v53 = vshll.u32 %v212_v33, 16  ;;  %v2530_v60 = vld [vmem:[%s2385_s25 + $0x8] sm:$0xf] }
  0x25   : > { %2177 = vmatmul.mubr.msk.bf16.vlgmr.msra.gmra.mxu1 %vm243_vm0, %v1974_v44  ;;  %v1993_v54 = vcombine.low %v589_v10, %v593_v49  ;;  %v424_v37 = vor.u32 %v423_v47, %v420_v45  ;;  %v434_v38 = vrot.slane %v432_v43, 4  ;;  %v437_v55 = vrot.slane %v435_v46, 5  ;;  %v2597_v41 = vld [vmem:[%s2385_s25 + $0x40] sm:$0xf]  ;;  %v2605_v45 = vld [vmem:[%s2385_s25 + $0x1c] sm:$0x1] }
  0x26   : > { %2195 = vmatpush3.bf16.msra.mxu1 %v2438_v39  ;;  %v402_v57 = vsel %vm2474_vm6, %v2429_v35, %v401_v50  ;;  %v416_v58 = vsel %vm2474_vm6, %v2440_v40, %v415_v52  ;;  %v429_v59 = vrot.slane %v427_v53, 5  ;;  %v441_v43 = vshll.u32 %v214_v28, 16 }
  0x27   : > { %2187 = vmatmul.mubr.msk.bf16.vlgmr.msra.gmra.mxu0 %vm243_vm0, %v1993_v54  ;;  %v1975_v46 = vcombine.low %v402_v57, %v416_v58  ;;  %v425_v61 = vrot.slane %v424_v37, 4  ;;  %v438_v62 = vor.u32 %v437_v55, %v434_v38  ;;  %v596_v39 = vrot.slane %v208_v16, 5  ;;  %2214 = vmatprep.subr.bf16.mxu1 %v2508_v48 }
  0x28   : > { %v443_v35 = vrot.slane %v441_v43, 5  ;;  %v600_v0 = vrot.slane %v210_v22, 5  ;;  %v1988_v40 = vrot.slane %v2412_v19, 9  ;;  %v604_v6 = vrot.slane %v212_v33, 5  ;;  %2205 = vmatpush3.bf16.msra.mxu0 %v2455_v51  ;;  %v2551_v19 = vld [vmem:[%s2385_s25 + $0x20] sm:$0xf] }
  0x29   : > { %2180 = vmatprep.mubr.msk.bf16.mxu1 %vm243_vm0, %v1975_v46  ;;  %v430_v7 = vsel %vm2474_vm6, %v425_v61, %v429_v59  ;;  %v439_v8 = vrot.slane %v438_v62, 4  ;;  %v597_v9 = vsel %vm2468_vm5, %v1986_v12, %v596_v39  ;;  %v1989_v2 = vrot.slane %v2419_v24, 9  ;;  %2224 = vmatprep.subr.bf16.mxu0 %v2520_v56  ;;  %v2615_v43 = vld [vmem:[%s2385_s25 + $0x24] sm:$0x1] }
  0x2a   : > { %v601_v51 = vsel %vm2468_vm5, %v1987_v13, %v600_v0  ;;  %v605_v3 = vsel %vm2468_vm5, %v1988_v40, %v604_v6  ;;  %v608_v14 = vrot.slane %v214_v28, 5  ;;  %v2019_v12 = vcombine.low %v2530_v60, %v2534_v63  ;;  %v2570_v13 = vld [vmem:[%s2385_s25 + $0x30] sm:$0xf] }
  0x2b   : > { %v444_v24 = vsel %vm2474_vm6, %v439_v8, %v443_v35  ;;  %v1994_v15 = vcombine.low %v597_v9, %v601_v51  ;;  %v883_v16 = vshrl.u32 %v2530_v60, 16  ;;  %v886_v4 = vshll.u32 %v2530_v60, 16  ;;  %v2626_v51 = vld [vmem:[%s2385_s25 + $0x2c] sm:$0x1] }
  0x2c   : > { %v1976_v18 = vcombine.low %v430_v7, %v444_v24  ;;  %v609_v20 = vsel %vm2468_vm5, %v1989_v2, %v608_v14  ;;  %v897_v21 = vshrl.u32 %v2534_v63, 16  ;;  %v900_v22 = vshll.u32 %v2534_v63, 16  ;;  %v2622_v7 = vld [vmem:[%s2957_s1 + $0x38] sm:$0xff]  }
  0x2d   : > { %2190 = vmatprep.mubr.msk.bf16.mxu0 %vm243_vm0, %v1994_v15  ;;  %v1995_v25 = vcombine.low %v605_v3, %v609_v20  ;;  %v2020_v26 = vcombine.low %v2548_v11, %v2551_v19  ;;  %v911_v29 = vshrl.u32 %v2548_v11, 16  ;;  %v914_v30 = vshll.u32 %v2548_v11, 16  ;;  %v2634_v15 = vld [vmem:[%s2385_s25 + $0x34] sm:$0x1] }
  0x2e   : > { %2181 = vmatmul.mubr.msk.bf16.gmra.mxu1 %vm243_vm0, %v1976_v18  ;;  %v925_v27 = vshrl.u32 %v2551_v19, 16  ;;  %v928_v33 = vshll.u32 %v2551_v19, 16  ;;  %v2021_v34 = vcombine.low %v2567_v17, %v2570_v13  ;;  %v939_v36 = vshrl.u32 %v2567_v17, 16 }
  0x2f   : > { %2191 = vmatmul.mubr.msk.bf16.gmra.mxu0 %vm243_vm0, %v1995_v25  ;;  %2196 = vmatprep.mubr.msk.bf16.mxu1 %vm243_vm0, %v2019_v12  ;;  %v942_v42 = vshll.u32 %v2567_v17, 16  ;;  %v953_v44 = vshrl.u32 %v2570_v13, 16  ;;  %v956_v10 = vshll.u32 %v2570_v13, 16  ;;  %v885_v28 = vrot.slane %v883_v16, 4 }
  0x30   : > { %v888_v47 = vrot.slane %v886_v4, 5  ;;  %v892_v49 = vshll.u32 %v2577_v23, 16  ;;  %v899_v50 = vrot.slane %v897_v21, 4  ;;  %v902_v52 = vrot.slane %v900_v22, 5 }
  0x31   : > { %v906_v53 = vshll.u32 %v2585_v31, 16  ;;  %v2022_v54 = vcombine.low %v2588_v32, %v2597_v41  ;;  %v967_v37 = vshrl.u32 %v2588_v32, 16  ;;  %v970_v38 = vshll.u32 %v2588_v32, 16 }
  0x32   : > { %v889_v55 = vor.u32 %v888_v47, %v885_v28  ;;  %v894_v57 = vrot.slane %v892_v49, 5  ;;  %v903_v58 = vor.u32 %v902_v52, %v899_v50  ;;  %v981_v59 = vshrl.u32 %v2597_v41, 16  ;;  %v2648_v47 = vld [vmem:[%s2385_s25 + $0x44] sm:$0x1] }
  0x33   : > { %v908_v46 = vrot.slane %v906_v53, 5  ;;  %v984_v61 = vshll.u32 %v2597_v41, 16  ;;  %v913_v62 = vrot.slane %v911_v29, 4  ;;  %v916_v39 = vrot.slane %v914_v30, 5  ;;  %v2640_v30 = vld [vmem:[%s2385_s25 + $0x3c] sm:$0x1] }
  0x34   : > { %v890_v35 = vrot.slane %v889_v55, 4  ;;  %v904_v0 = vrot.slane %v903_v58, 4  ;;  %v920_v40 = vshll.u32 %v2605_v45, 16  ;;  %v927_v6 = vrot.slane %v925_v27, 4 }
  0x35   : > { %v917_v8 = vor.u32 %v916_v39, %v913_v62  ;;  %v930_v9 = vrot.slane %v928_v33, 5  ;;  %v934_v2 = vshll.u32 %v2615_v43, 16  ;;  %v941_v3 = vrot.slane %v939_v36, 4 }
  0x36   : > { %2197 = vmatmul.mubr.msk.bf16.vlgmr.msra.gmra.mxu1 %vm243_vm0, %v2020_v26  ;;  %v895_v14 = vsel %vm2474_vm6, %v890_v35, %v894_v57  ;;  %v909_v12 = vsel %vm2474_vm6, %v904_v0, %v908_v46  ;;  %v922_v24 = vrot.slane %v920_v40, 5  ;;  %v944_v16 = vrot.slane %v942_v42, 5 }
  0x37   : > { %2200 = vmatprep.mubr.msk.bf16.mxu1 %vm243_vm0, %v2021_v34  ;;  %v2030_v4 = vcombine.low %v895_v14, %v909_v12  ;;  %v918_v18 = vrot.slane %v917_v8, 4  ;;  %v931_v20 = vor.u32 %v930_v9, %v927_v6  ;;  %v936_v21 = vrot.slane %v934_v2, 5  ;;  %2215 = vmatpush3.bf16.msra.mxu1 %v2508_v48 }
  0x38   : > { %v945_v22 = vor.u32 %v944_v16, %v941_v3  ;;  %v948_v25 = vshll.u32 %v2626_v51, 16  ;;  %v955_v26 = vrot.slane %v953_v44, 4  ;;  %v958_v29 = vrot.slane %v956_v10, 5  ;;  %2234 = vmatprep.subr.bf16.mxu1 %v2622_v7 }
  0x39   : > { %2206 = vmatprep.mubr.msk.bf16.mxu0 %vm243_vm0, %v2030_v4  ;;  %v923_v27 = vsel %vm2474_vm6, %v918_v18, %v922_v24  ;;  %v932_v33 = vrot.slane %v931_v20, 4  ;;  %v962_v34 = vshll.u32 %v2634_v15, 16  ;;  %v969_v36 = vrot.slane %v967_v37, 4  ;;  %v2658_v37 = vld [vmem:[%s2957_s1 + $0x40] sm:$0xff]   ;;  %v2696_v4 = vld [vmem:[%s2385_s25 + $0x10] sm:$0xf] }
  0x3a   : > { %v946_v42 = vrot.slane %v945_v22, 4  ;;  %v950_v48 = vrot.slane %v948_v25, 5  ;;  %v959_v28 = vor.u32 %v958_v29, %v955_v26  ;;  %v972_v44 = vrot.slane %v970_v38, 5  ;;  %v2699_v18 = vld [vmem:[%s2385_s25 + $0x18] sm:$0xf] }
  0x3b   : > { %v937_v10 = vsel %vm2474_vm6, %v932_v33, %v936_v21  ;;  %v964_v49 = vrot.slane %v962_v34, 5  ;;  %v976_v50 = vshll.u32 %v2640_v30, 16  ;;  %v983_v52 = vrot.slane %v981_v59, 4  ;;  %v2706_v22 = vld [vmem:[%s2385_s25 + $0x20] sm:$0xf] }
  0x3c   : > { %v2031_v53 = vcombine.low %v923_v27, %v937_v10  ;;  %v951_v55 = vsel %vm2474_vm6, %v946_v42, %v950_v48  ;;  %v960_v57 = vrot.slane %v959_v28, 4  ;;  %v973_v58 = vor.u32 %v972_v44, %v969_v36  ;;  %v2714_v29 = vld [vmem:[%s2385_s25 + $0x28] sm:$0xf]  ;;  %v2723_v34 = vld [vmem:[%s2385_s25 + $0x30] sm:$0xf] }
  0x3d   : > { %v978_v46 = vrot.slane %v976_v50, 5  ;;  %v986_v38 = vrot.slane %v984_v61, 5  ;;  %v990_v62 = vshll.u32 %v2648_v47, 16  ;;  %v2039_v39 = vrot.slane %v2530_v60, 9  ;;  %v2739_v44 = vld [vmem:[%s2385_s25 + $0x48] sm:$0xf] }
  0x3e   : > { %2201 = vmatmul.mubr.msk.bf16.gmra.mxu1 %vm243_vm0, %v2022_v54  ;;  %2207 = vmatmul.mubr.msk.bf16.vlgmr.msra.gmra.mxu0 %vm243_vm0, %v2031_v53  ;;  %v965_v59 = vsel %vm2474_vm6, %v960_v57, %v964_v49  ;;  %v974_v35 = vrot.slane %v973_v58, 4  ;;  %v1126_v0 = vrot.slane %v2577_v23, 5  ;;  %v2040_v40 = vrot.slane %v2534_v63, 9  ;;  %v2753_v58 = vld [vmem:[%s2385_s25 + $0x14] sm:$0x1] }
  0x3f   : > { %v2032_v61 = vcombine.low %v951_v55, %v965_v59  ;;  %v987_v6 = vor.u32 %v986_v38, %v983_v52  ;;  %v992_v8 = vrot.slane %v990_v62, 5  ;;  %v1130_v60 = vrot.slane %v2585_v31, 5  ;;  %2225 = vmatpush3.bf16.msra.mxu0 %v2520_v56  ;;  %v2761_v59 = vld [vmem:[%s2385_s25 + $0x1c] sm:$0x1] }
  0x40   : > { %v979_v54 = vsel %vm2474_vm6, %v974_v35, %v978_v46  ;;  %v1127_v9 = vsel %vm2468_vm5, %v2039_v39, %v1126_v0  ;;  %v2041_v2 = vrot.slane %v2548_v11, 9  ;;  %v1134_v23 = vrot.slane %v2605_v45, 5  ;;  %2244 = vmatprep.subr.bf16.mxu0 %v2658_v37 }
  0x41   : > { %2210 = vmatprep.mubr.msk.bf16.mxu0 %vm243_vm0, %v2032_v61  ;;  %v988_v63 = vrot.slane %v987_v6, 4  ;;  %v1131_v56 = vsel %vm2468_vm5, %v2040_v40, %v1130_v60  ;;  %v2042_v31 = vrot.slane %v2551_v19, 9  ;;  %v1138_v3 = vrot.slane %v2615_v43, 5  ;;  %v2768_v6 = vld [vmem:[%s2385_s25 + $0x24] sm:$0x1] }
  0x42   : > { %v2049_v14 = vcombine.low %v1127_v9, %v1131_v56  ;;  %v1135_v11 = vsel %vm2468_vm5, %v2041_v2, %v1134_v23  ;;  %v2043_v45 = vrot.slane %v2567_v17, 9  ;;  %v1142_v12 = vrot.slane %v2626_v51, 5 }
  0x43   : > { %v993_v24 = vsel %vm2474_vm6, %v988_v63, %v992_v8  ;;  %v1139_v16 = vsel %vm2468_vm5, %v2042_v31, %v1138_v3  ;;  %v2044_v19 = vrot.slane %v2570_v13, 9  ;;  %v1146_v43 = vrot.slane %v2634_v15, 5  ;;  %v2773_v63 = vld [vmem:[%s2385_s25 + $0x2c] sm:$0x1] }
  0x44   : > { %v2033_v20 = vcombine.low %v979_v54, %v993_v24  ;;  %2216 = vmatprep.mubr.msk.bf16.mxu1 %vm243_vm0, %v2049_v14  ;;  %v2050_v17 = vcombine.low %v1135_v11, %v1139_v16  ;;  %v1143_v51 = vsel %vm2468_vm5, %v2043_v45, %v1142_v12  ;;  %v2045_v21 = vrot.slane %v2588_v32, 9 }
  0x45   : > { %v1147_v13 = vsel %vm2468_vm5, %v2044_v19, %v1146_v43  ;;  %v1150_v15 = vrot.slane %v2640_v30, 5  ;;  %v2046_v25 = vrot.slane %v2597_v41, 9  ;;  %v1154_v26 = vrot.slane %v2648_v47, 5  ;;  %v2726_v41 = vld [vmem:[%s2385_s25 + $0x38] sm:$0xf] }
  0x46   : > { %2211 = vmatmul.mubr.msk.bf16.gmra.mxu0 %vm243_vm0, %v2033_v20  ;;  %2217 = vmatmul.mubr.msk.bf16.vlgmr.msra.gmra.mxu1 %vm243_vm0, %v2050_v17  ;;  %v2051_v32 = vcombine.low %v1143_v51, %v1147_v13  ;;  %v2076_v27 = vcombine.low %v2696_v4, %v2699_v18  ;;  %v1429_v33 = vshrl.u32 %v2696_v4, 16  ;;  %v1432_v30 = vshll.u32 %v2696_v4, 16  ;;  %v2736_v47 = vld [vmem:[%s2385_s25 + $0x40] sm:$0xf]  ;;  %v2781_v43 = vld [vmem:[%s2385_s25 + $0x34] sm:$0x1] }
  0x47   : > { %v1151_v36 = vsel %vm2468_vm5, %v2045_v21, %v1150_v15  ;;  %v1155_v42 = vsel %vm2468_vm5, %v2046_v25, %v1154_v26  ;;  %v1443_v48 = vshrl.u32 %v2699_v18, 16  ;;  %v1446_v28 = vshll.u32 %v2699_v18, 16  ;;  %2235 = vmatpush3.bf16.msra.mxu1 %v2622_v7  ;;  %v2785_v26 = vld [vmem:[%s2385_s25 + $0x3c] sm:$0x1] }
  0x48   : > { %2220 = vmatprep.mubr.msk.bf16.mxu1 %vm243_vm0, %v2051_v32  ;;  %v2052_v10 = vcombine.low %v1151_v36, %v1155_v42  ;;  %2226 = vmatprep.mubr.msk.bf16.mxu0 %vm243_vm0, %v2076_v27  ;;  %v2077_v49 = vcombine.low %v2706_v22, %v2714_v29  ;;  %v1457_v50 = vshrl.u32 %v2706_v22, 16  ;;  %v1460_v52 = vshll.u32 %v2706_v22, 16 }
  0x49   : > { %v1471_v7 = vshrl.u32 %v2714_v29, 16  ;;  %v1474_v53 = vshll.u32 %v2714_v29, 16  ;;  %v2078_v55 = vcombine.low %v2723_v34, %v2726_v41  ;;  %v1485_v57 = vshrl.u32 %v2723_v34, 16 }
  0x4a   : > { %v1488_v46 = vshll.u32 %v2723_v34, 16  ;;  %v1499_v38 = vshrl.u32 %v2726_v41, 16  ;;  %v1502_v62 = vshll.u32 %v2726_v41, 16  ;;  %v2079_v39 = vcombine.low %v2736_v47, %v2739_v44 }
  0x4b   : > { %v1513_v35 = vshrl.u32 %v2736_v47, 16  ;;  %v1516_v0 = vshll.u32 %v2736_v47, 16  ;;  %v1527_v40 = vshrl.u32 %v2739_v44, 16  ;;  %v1530_v61 = vshll.u32 %v2739_v44, 16 }
  0x4c   : > { %v1431_v8 = vrot.slane %v1429_v33, 4  ;;  %v1434_v60 = vrot.slane %v1432_v30, 5  ;;  %v1438_v54 = vshll.u32 %v2753_v58, 16  ;;  %v1445_v9 = vrot.slane %v1443_v48, 4 }
  0x4d   : > { %v1448_v2 = vrot.slane %v1446_v28, 5  ;;  %v1452_v23 = vshll.u32 %v2761_v59, 16  ;;  %v1459_v56 = vrot.slane %v1457_v50, 4  ;;  %v1462_v31 = vrot.slane %v1460_v52, 5 }
  0x4e   : > { %2221 = vmatmul.mubr.msk.bf16.gmra.mxu1 %vm243_vm0, %v2052_v10  ;;  %2227 = vmatmul.mubr.msk.bf16.vlgmr.msra.gmra.mxu0 %vm243_vm0, %v2077_v49  ;;  %v1435_v3 = vor.u32 %v1434_v60, %v1431_v8  ;;  %v1440_v14 = vrot.slane %v1438_v54, 5  ;;  %v1466_v11 = vshll.u32 %v2768_v6, 16  ;;  %v1473_v45 = vrot.slane %v1471_v7, 4  ;;  %v2795_v10 = vld [vmem:[%s2385_s25 + $0x44] sm:$0x1] }
  0x4f   : > { %2230 = vmatprep.mubr.msk.bf16.mxu0 %vm243_vm0, %v2078_v55  ;;  %v1449_v12 = vor.u32 %v1448_v2, %v1445_v9  ;;  %v1454_v24 = vrot.slane %v1452_v23, 5  ;;  %v1463_v16 = vor.u32 %v1462_v31, %v1459_v56  ;;  %v1476_v19 = vrot.slane %v1474_v53, 5  ;;  %2245 = vmatpush3.bf16.msra.mxu0 %v2658_v37 }
  0x50   : > { %v1436_v20 = vrot.slane %v1435_v3, 4  ;;  %v1468_v17 = vrot.slane %v1466_v11, 5  ;;  %v1480_v51 = vshll.u32 %v2773_v63, 16  ;;  %v1487_v21 = vrot.slane %v1485_v57, 4  ;;  %v2073_v57 = vld [vmem:[%s2385_s25 + $0x4c] sm:$0x1] }
  0x51   : > { %v1450_v13 = vrot.slane %v1449_v12, 4  ;;  %v1464_v15 = vrot.slane %v1463_v16, 4  ;;  %v1477_v25 = vor.u32 %v1476_v19, %v1473_v45  ;;  %v1490_v32 = vrot.slane %v1488_v46, 5 }
  0x52   : > { %v1441_v27 = vsel %vm2474_vm6, %v1436_v20, %v1440_v14  ;;  %v1482_v33 = vrot.slane %v1480_v51, 5  ;;  %v1494_v37 = vshll.u32 %v2781_v43, 16  ;;  %v1501_v30 = vrot.slane %v1499_v38, 4 }
  0x53   : > { %v1455_v36 = vsel %vm2474_vm6, %v1450_v13, %v1454_v24  ;;  %v1469_v42 = vsel %vm2474_vm6, %v1464_v15, %v1468_v17  ;;  %v1478_v48 = vrot.slane %v1477_v25, 4  ;;  %v1491_v28 = vor.u32 %v1490_v32, %v1487_v21 }
  0x54   : > { %v2087_v49 = vcombine.low %v1441_v27, %v1455_v36  ;;  %v1496_v50 = vrot.slane %v1494_v37, 5  ;;  %v1504_v52 = vrot.slane %v1502_v62, 5  ;;  %v1508_v7 = vshll.u32 %v2785_v26, 16 }
  0x55   : > { %v1483_v53 = vsel %vm2474_vm6, %v1478_v48, %v1482_v33  ;;  %v1492_v55 = vrot.slane %v1491_v28, 4  ;;  %v1515_v46 = vrot.slane %v1513_v35, 4  ;;  %v1518_v38 = vrot.slane %v1516_v0, 5 }
  0x56   : > { %2231 = vmatmul.mubr.msk.bf16.gmra.mxu0 %vm243_vm0, %v2079_v39  ;;  %2236 = vmatprep.mubr.msk.bf16.mxu1 %vm243_vm0, %v2087_v49  ;;  %v2088_v8 = vcombine.low %v1469_v42, %v1483_v53  ;;  %v1505_v60 = vor.u32 %v1504_v52, %v1501_v30  ;;  %v1510_v54 = vrot.slane %v1508_v7, 5  ;;  %v1522_v9 = vshll.u32 %v2795_v10, 16 }
  0x57   : > { %v1497_v62 = vsel %vm2474_vm6, %v1492_v55, %v1496_v50  ;;  %v1519_v2 = vor.u32 %v1518_v38, %v1515_v46  ;;  %v1529_v23 = vrot.slane %v1527_v40, 4  ;;  %v1532_v56 = vrot.slane %v1530_v61, 5 }
  0x58   : > { %2237 = vmatmul.mubr.msk.bf16.vlgmr.msra.gmra.mxu1 %vm243_vm0, %v2088_v8  ;;  %v1506_v31 = vrot.slane %v1505_v60, 4  ;;  %v1524_v35 = vrot.slane %v1522_v9, 5  ;;  %v1536_v0 = vshll.u32 %v2073_v57, 16  ;;  %v2096_v39 = vrot.slane %v2696_v4, 9 }
  0x59   : > { %v1520_v3 = vrot.slane %v1519_v2, 4  ;;  %v1533_v14 = vor.u32 %v1532_v56, %v1529_v23  ;;  %v1672_v11 = vrot.slane %v2753_v58, 5  ;;  %v2097_v45 = vrot.slane %v2699_v18, 9 }
  0x5a   : > { %v1511_v12 = vsel %vm2474_vm6, %v1506_v31, %v1510_v54  ;;  %v1538_v24 = vrot.slane %v1536_v0, 5  ;;  %v1676_v40 = vrot.slane %v2761_v59, 5  ;;  %v2098_v61 = vrot.slane %v2706_v22, 9 }
  0x5b   : > { %v2089_v16 = vcombine.low %v1497_v62, %v1511_v12  ;;  %v1525_v19 = vsel %vm2474_vm6, %v1520_v3, %v1524_v35  ;;  %v1534_v20 = vrot.slane %v1533_v14, 4  ;;  %v1673_v4 = vsel %vm2468_vm5, %v2096_v39, %v1672_v11 }
  0x5c   : > { %v1677_v58 = vsel %vm2468_vm5, %v2097_v45, %v1676_v40  ;;  %v1680_v18 = vrot.slane %v2768_v6, 5  ;;  %v2099_v17 = vrot.slane %v2714_v29, 9  ;;  %v1684_v51 = vrot.slane %v2773_v63, 5 }
  0x5d   : > { %2240 = vmatprep.mubr.msk.bf16.mxu1 %vm243_vm0, %v2089_v16  ;;  %v1539_v22 = vsel %vm2474_vm6, %v1534_v20, %v1538_v24  ;;  %v2106_v59 = vcombine.low %v1673_v4, %v1677_v58  ;;  %v2100_v21 = vrot.slane %v2723_v34, 9  ;;  %v1688_v13 = vrot.slane %v2781_v43, 5 }
  0x5e   : > { %v2090_v15 = vcombine.low %v1525_v19, %v1539_v22  ;;  %v1681_v25 = vsel %vm2468_vm5, %v2098_v61, %v1680_v18  ;;  %v1685_v6 = vsel %vm2468_vm5, %v2099_v17, %v1684_v51  ;;  %v2101_v29 = vrot.slane %v2726_v41, 9 }
  0x5f   : > { %2246 = vmatprep.mubr.msk.bf16.mxu0 %vm243_vm0, %v2106_v59  ;;  %v2107_v63 = vcombine.low %v1681_v25, %v1685_v6  ;;  %v1689_v5 = vsel %vm2468_vm5, %v2100_v21, %v1688_v13  ;;  %v1692_v32 = vrot.slane %v2785_v26, 5  ;;  %v2102_v34 = vrot.slane %v2736_v47, 9 }
  0x60   : > { %2241 = vmatmul.mubr.msk.bf16.gmra.mxu1 %vm243_vm0, %v2090_v15  ;;  %v1696_v43 = vrot.slane %v2795_v10, 5  ;;  %v2103_v27 = vrot.slane %v2739_v44, 9  ;;  %v1700_v33 = vrot.slane %v2073_v57, 5 }
  0x61   : > { %2247 = vmatmul.mubr.msk.bf16.vlgmr.msra.gmra.mxu0 %vm243_vm0, %v2107_v63  ;;  %v1693_v41 = vsel %vm2468_vm5, %v2101_v29, %v1692_v32 }
  0x62   : > { %v2108_v37 = vcombine.low %v1689_v5, %v1693_v41  ;;  %v1697_v30 = vsel %vm2468_vm5, %v2102_v34, %v1696_v43  ;;  %v1701_v26 = vsel %vm2468_vm5, %v2103_v27, %v1700_v33 }
  0x63   : > { %v2109_v47 = vcombine.low %v1697_v30, %v1701_v26 }
  0x64   : > { %2250 = vmatprep.mubr.msk.bf16.mxu0 %vm243_vm0, %v2108_v37 }
  0x69   : > { %2251 = vmatmul.mubr.msk.bf16.gmra.mxu0 %vm243_vm0, %v2109_v47 }
  0xd9   : > { %v2172_v44 = vpop.f32.mrf.mxu1 }
  0xda   : > { %328 = vst.msk [vmem:[#allocation2 + $0x30] sm:$0xff] %vm321_vm7, %v2172_v44 }
  0xdb   : > { %v2168_v36 = vpop.f32.mrf.mxu0  ;;  %v306_v42 = vpop.f32.mrf.mxu1 }
  0xdc   : > { %324 = vst.msk [vmem:[#allocation2 + $0x10] sm:$0xff] %vm321_vm7, %v2168_v36  ;;  %326 = vst.msk [vmem:[#allocation2 + $0x20] sm:$0xff] %vm321_vm7, %v306_v42 }
  0xdd   : > { %v290_v48 = vpop.f32.mrf.mxu0  ;;  %v2173_v28 = vpop.f32.mrf.mxu1 }
  0xde   : > { %322 = vst.msk [vmem:[#allocation2] sm:$0xff] %vm321_vm7, %v290_v48  ;;  %329 = vst.msk [vmem:[#allocation2 + $0x38] sm:$0xff] %vm321_vm7, %v2173_v28 }
  0xdf   : > { %v2169_v1 = vpop.f32.mrf.mxu0  ;;  %v309_v10 = vpop.f32.mrf.mxu1 }
  0xe0   : > { %325 = vst.msk [vmem:[#allocation2 + $0x18] sm:$0xff] %vm321_vm7, %v2169_v1  ;;  %327 = vst.msk [vmem:[#allocation2 + $0x28] sm:$0xff] %vm321_vm7, %v309_v10 }
  0xe1   : > { %v293_v49 = vpop.f32.mrf.mxu0  ;;  %v549_v35 = vld [vmem:[#allocation2 + $0x30] sm:$0xff] }
  0xe2   : > { %323 = vst.msk [vmem:[#allocation2 + $0x8] sm:$0xff] %vm321_vm7, %v293_v49 }
  0xe3   : > { %v545_v50 = vld [vmem:[#allocation2 + $0x10] sm:$0xff]  ;;  %v547_v11 = vld [vmem:[#allocation2 + $0x20] sm:$0xff] }
  0xe5   : > { %v2178_v52 = vpop.f32.mrf.mxu1  ;;  %v543_v7 = vld [vmem:[#allocation2] sm:$0xff]  ;;  %v550_v16 = vld [vmem:[#allocation2 + $0x38] sm:$0xff] }
  0xe6   : > { %v553_v53 = vadd.f32 %v2178_v52, %v545_v50 }
  0xe7   : > { %v512_v55 = vpop.f32.mrf.mxu1  ;;  %v546_v57 = vld [vmem:[#allocation2 + $0x18] sm:$0xff]  ;;  %v2188_v46 = vpop.f32.mrf.mxu0  ;;  %v548_v18 = vld [vmem:[#allocation2 + $0x28] sm:$0xff] }
  0xe8   : > { %561 = vst.msk [vmem:[#allocation2 + $0x10] sm:$0xff] %vm321_vm7, %v553_v53  ;;  %v551_v38 = vadd.f32 %v543_v7, %v512_v55 }
  0xe9   : > { %v2179_v8 = vpop.f32.mrf.mxu1  ;;  %v544_v60 = vld [vmem:[#allocation2 + $0x8] sm:$0xff]  ;;  %v677_v54 = vpop.f32.mrf.mxu0 }
  0xea   : > { %559 = vst.msk [vmem:[#allocation2] sm:$0xff] %vm321_vm7, %v551_v38  ;;  %v554_v9 = vadd.f32 %v2179_v8, %v546_v57 }
  0xeb   : > { %v515_v62 = vpop.f32.mrf.mxu1  ;;  %v2189_v2 = vpop.f32.mrf.mxu0 }
  0xec   : > { %562 = vst.msk [vmem:[#allocation2 + $0x18] sm:$0xff] %vm321_vm7, %v554_v9  ;;  %v552_v23 = vadd.f32 %v544_v60, %v515_v62 }
  0xed   : > { %v680_v56 = vpop.f32.mrf.mxu0 }
  0xee   : > { %560 = vst.msk [vmem:[#allocation2 + $0x8] sm:$0xff] %vm321_vm7, %v552_v23  ;;  %v2182_v31 = vpop.f32.mrf.mxu1 }
  0xef   : > { %v710_v0 = vld [vmem:[#allocation2 + $0x10] sm:$0xff]  ;;  %v557_v39 = vadd.f32 %v2182_v31, %v549_v35  ;;  %v2192_v45 = vpop.f32.mrf.mxu0 }
  0xf0   : > { %v718_v3 = vadd.f32 %v2188_v46, %v710_v0  ;;  %v528_v14 = vpop.f32.mrf.mxu1 }
  0xf1   : > { %v708_v12 = vld [vmem:[#allocation2] sm:$0xff]  ;;  %565 = vst.msk [vmem:[#allocation2 + $0x30] sm:$0xff] %vm321_vm7, %v557_v39  ;;  %v555_v24 = vadd.f32 %v547_v11, %v528_v14  ;;  %v693_v17 = vpop.f32.mrf.mxu0 }
  0xf2   : > { %726 = vst.msk [vmem:[#allocation2 + $0x10] sm:$0xff] %vm321_vm7, %v718_v3  ;;  %v716_v40 = vadd.f32 %v708_v12, %v677_v54  ;;  %v2183_v61 = vpop.f32.mrf.mxu1 }
  0xf3   : > { %v711_v19 = vld [vmem:[#allocation2 + $0x18] sm:$0xff]  ;;  %563 = vst.msk [vmem:[#allocation2 + $0x20] sm:$0xff] %vm321_vm7, %v555_v24  ;;  %v558_v20 = vadd.f32 %v2183_v61, %v550_v16  ;;  %v2193_v15 = vpop.f32.mrf.mxu0 }
  0xf4   : > { %724 = vst.msk [vmem:[#allocation2] sm:$0xff] %vm321_vm7, %v716_v40  ;;  %v719_v4 = vadd.f32 %v2189_v2, %v711_v19  ;;  %v531_v58 = vpop.f32.mrf.mxu1 }
  0xf5   : > { %v709_v51 = vld [vmem:[#allocation2 + $0x8] sm:$0xff]  ;;  %566 = vst.msk [vmem:[#allocation2 + $0x38] sm:$0xff] %vm321_vm7, %v558_v20  ;;  %v556_v22 = vadd.f32 %v548_v18, %v531_v58  ;;  %v696_v33 = vpop.f32.mrf.mxu0 }
  0xf6   : > { %727 = vst.msk [vmem:[#allocation2 + $0x18] sm:$0xff] %vm321_vm7, %v719_v4  ;;  %v717_v59 = vadd.f32 %v709_v51, %v680_v56  ;;  %v2198_v21 = vpop.f32.mrf.mxu1 }
  0xf7   : > { %564 = vst.msk [vmem:[#allocation2 + $0x28] sm:$0xff] %vm321_vm7, %v556_v22 }
  0xf8   : > { %725 = vst.msk [vmem:[#allocation2 + $0x8] sm:$0xff] %vm321_vm7, %v717_v59  ;;  %v714_v13 = vld [vmem:[#allocation2 + $0x30] sm:$0xff]  ;;  %v827_v25 = vpop.f32.mrf.mxu1 }
  0xf9   : > { %v722_v6 = vadd.f32 %v2192_v45, %v714_v13  ;;  %v860_v29 = vld [vmem:[#allocation2 + $0x10] sm:$0xff] }
  0xfa   : > { %v712_v63 = vld [vmem:[#allocation2 + $0x20] sm:$0xff]  ;;  %v868_v5 = vadd.f32 %v2198_v21, %v860_v29  ;;  %v2199_v32 = vpop.f32.mrf.mxu1 }
  0xfb   : > { %730 = vst.msk [vmem:[#allocation2 + $0x30] sm:$0xff] %vm321_vm7, %v722_v6  ;;  %v720_v34 = vadd.f32 %v712_v63, %v693_v17  ;;  %v858_v43 = vld [vmem:[#allocation2] sm:$0xff] }
  0xfc   : > { %v715_v27 = vld [vmem:[#allocation2 + $0x38] sm:$0xff]  ;;  %876 = vst.msk [vmem:[#allocation2 + $0x10] sm:$0xff] %vm321_vm7, %v868_v5  ;;  %v866_v41 = vadd.f32 %v858_v43, %v827_v25  ;;  %v830_v37 = vpop.f32.mrf.mxu1 }
  0xfd   : > { %728 = vst.msk [vmem:[#allocation2 + $0x20] sm:$0xff] %vm321_vm7, %v720_v34  ;;  %v723_v30 = vadd.f32 %v2193_v15, %v715_v27  ;;  %v861_v26 = vld [vmem:[#allocation2 + $0x18] sm:$0xff] }
  0xfe   : > { %v713_v47 = vld [vmem:[#allocation2 + $0x28] sm:$0xff]  ;;  %874 = vst.msk [vmem:[#allocation2] sm:$0xff] %vm321_vm7, %v866_v41  ;;  %v869_v44 = vadd.f32 %v2199_v32, %v861_v26  ;;  %v2202_v36 = vpop.f32.mrf.mxu1  ;;  %v2208_v42 = vpop.f32.mrf.mxu0 }
  0xff   : > { %731 = vst.msk [vmem:[#allocation2 + $0x38] sm:$0xff] %vm321_vm7, %v723_v30  ;;  %v721_v48 = vadd.f32 %v713_v47, %v696_v33  ;;  %v859_v28 = vld [vmem:[#allocation2 + $0x8] sm:$0xff] }
 0x100   : > { %877 = vst.msk [vmem:[#allocation2 + $0x18] sm:$0xff] %vm321_vm7, %v869_v44  ;;  %v867_v1 = vadd.f32 %v859_v28, %v830_v37  ;;  %v843_v10 = vpop.f32.mrf.mxu1  ;;  %v1061_v49 = vpop.f32.mrf.mxu0 }
 0x101   : > { %729 = vst.msk [vmem:[#allocation2 + $0x28] sm:$0xff] %vm321_vm7, %v721_v48 }
 0x102   : > { %875 = vst.msk [vmem:[#allocation2 + $0x8] sm:$0xff] %vm321_vm7, %v867_v1  ;;  %v864_v50 = vld [vmem:[#allocation2 + $0x30] sm:$0xff]  ;;  %v2203_v52 = vpop.f32.mrf.mxu1  ;;  %v2209_v7 = vpop.f32.mrf.mxu0 }
 0x103   : > { %v872_v53 = vadd.f32 %v2202_v36, %v864_v50  ;;  %v1094_v55 = vld [vmem:[#allocation2 + $0x10] sm:$0xff] }
 0x104   : > { %v1102_v57 = vadd.f32 %v2208_v42, %v1094_v55  ;;  %v862_v46 = vld [vmem:[#allocation2 + $0x20] sm:$0xff]  ;;  %v846_v38 = vpop.f32.mrf.mxu1  ;;  %v1064_v8 = vpop.f32.mrf.mxu0 }
 0x105   : > { %880 = vst.msk [vmem:[#allocation2 + $0x30] sm:$0xff] %vm321_vm7, %v872_v53  ;;  %v870_v60 = vadd.f32 %v862_v46, %v843_v10  ;;  %v1092_v54 = vld [vmem:[#allocation2] sm:$0xff] }
 0x106   : > { %1110 = vst.msk [vmem:[#allocation2 + $0x10] sm:$0xff] %vm321_vm7, %v1102_v57  ;;  %v1100_v9 = vadd.f32 %v1092_v54, %v1061_v49  ;;  %v865_v62 = vld [vmem:[#allocation2 + $0x38] sm:$0xff]  ;;  %v2212_v2 = vpop.f32.mrf.mxu0  ;;  %v2218_v23 = vpop.f32.mrf.mxu1 }
 0x107   : > { %878 = vst.msk [vmem:[#allocation2 + $0x20] sm:$0xff] %vm321_vm7, %v870_v60  ;;  %v873_v56 = vadd.f32 %v2203_v52, %v865_v62  ;;  %v1095_v31 = vld [vmem:[#allocation2 + $0x18] sm:$0xff] }
 0x108   : > { %1108 = vst.msk [vmem:[#allocation2] sm:$0xff] %vm321_vm7, %v1100_v9  ;;  %v1103_v35 = vadd.f32 %v2209_v7, %v1095_v31  ;;  %v863_v0 = vld [vmem:[#allocation2 + $0x28] sm:$0xff]  ;;  %v1077_v39 = vpop.f32.mrf.mxu0  ;;  %v1223_v3 = vpop.f32.mrf.mxu1 }
 0x109   : > { %881 = vst.msk [vmem:[#allocation2 + $0x38] sm:$0xff] %vm321_vm7, %v873_v56  ;;  %v871_v14 = vadd.f32 %v863_v0, %v846_v38  ;;  %v1093_v11 = vld [vmem:[#allocation2 + $0x8] sm:$0xff] }
 0x10a   : > { %1111 = vst.msk [vmem:[#allocation2 + $0x18] sm:$0xff] %vm321_vm7, %v1103_v35  ;;  %v1101_v45 = vadd.f32 %v1093_v11, %v1064_v8  ;;  %v2213_v12 = vpop.f32.mrf.mxu0  ;;  %v2219_v24 = vpop.f32.mrf.mxu1 }
 0x10b   : > { %879 = vst.msk [vmem:[#allocation2 + $0x28] sm:$0xff] %vm321_vm7, %v871_v14 }
 0x10c   : > { %1109 = vst.msk [vmem:[#allocation2 + $0x8] sm:$0xff] %vm321_vm7, %v1101_v45  ;;  %v1098_v40 = vld [vmem:[#allocation2 + $0x30] sm:$0xff]  ;;  %v1080_v61 = vpop.f32.mrf.mxu0  ;;  %v1226_v16 = vpop.f32.mrf.mxu1 }
 0x10d   : > { %v1106_v19 = vadd.f32 %v2212_v2, %v1098_v40  ;;  %v1256_v20 = vld [vmem:[#allocation2 + $0x10] sm:$0xff] }
 0x10e   : > { %v1096_v4 = vld [vmem:[#allocation2 + $0x20] sm:$0xff]  ;;  %v1264_v58 = vadd.f32 %v2218_v23, %v1256_v20  ;;  %v2222_v18 = vpop.f32.mrf.mxu1  ;;  %v2228_v17 = vpop.f32.mrf.mxu0 }
 0x10f   : > { %1114 = vst.msk [vmem:[#allocation2 + $0x30] sm:$0xff] %vm321_vm7, %v1106_v19  ;;  %v1104_v51 = vadd.f32 %v1096_v4, %v1077_v39  ;;  %v1254_v22 = vld [vmem:[#allocation2] sm:$0xff] }
 0x110   : > { %1272 = vst.msk [vmem:[#allocation2 + $0x10] sm:$0xff] %vm321_vm7, %v1264_v58  ;;  %v1099_v59 = vld [vmem:[#allocation2 + $0x38] sm:$0xff]  ;;  %v1262_v21 = vadd.f32 %v1254_v22, %v1223_v3  ;;  %v1239_v13 = vpop.f32.mrf.mxu1  ;;  %v1373_v15 = vpop.f32.mrf.mxu0 }
 0x111   : > { %1112 = vst.msk [vmem:[#allocation2 + $0x20] sm:$0xff] %vm321_vm7, %v1104_v51  ;;  %v1107_v25 = vadd.f32 %v2213_v12, %v1099_v59  ;;  %v1257_v6 = vld [vmem:[#allocation2 + $0x18] sm:$0xff] }
 0x112   : > { %1270 = vst.msk [vmem:[#allocation2] sm:$0xff] %vm321_vm7, %v1262_v21  ;;  %v1097_v29 = vld [vmem:[#allocation2 + $0x28] sm:$0xff]  ;;  %v1265_v63 = vadd.f32 %v2219_v24, %v1257_v6  ;;  %v2223_v5 = vpop.f32.mrf.mxu1  ;;  %v2229_v32 = vpop.f32.mrf.mxu0 }
 0x113   : > { %1115 = vst.msk [vmem:[#allocation2 + $0x38] sm:$0xff] %vm321_vm7, %v1107_v25  ;;  %v1105_v34 = vadd.f32 %v1097_v29, %v1080_v61  ;;  %v1255_v43 = vld [vmem:[#allocation2 + $0x8] sm:$0xff] }
 0x114   : > { %1273 = vst.msk [vmem:[#allocation2 + $0x18] sm:$0xff] %vm321_vm7, %v1265_v63  ;;  %v1263_v27 = vadd.f32 %v1255_v43, %v1226_v16  ;;  %v1376_v33 = vpop.f32.mrf.mxu0  ;;  %v1242_v37 = vpop.f32.mrf.mxu1 }
 0x115   : > { %1113 = vst.msk [vmem:[#allocation2 + $0x28] sm:$0xff] %vm321_vm7, %v1105_v34 }
 0x116   : > { %1271 = vst.msk [vmem:[#allocation2 + $0x8] sm:$0xff] %vm321_vm7, %v1263_v27  ;;  %v1260_v41 = vld [vmem:[#allocation2 + $0x30] sm:$0xff]  ;;  %v2232_v30 = vpop.f32.mrf.mxu0 }
 0x117   : > { %v1268_v26 = vadd.f32 %v2222_v18, %v1260_v41  ;;  %v1406_v47 = vld [vmem:[#allocation2 + $0x10] sm:$0xff] }
 0x118   : > { %v1258_v44 = vld [vmem:[#allocation2 + $0x20] sm:$0xff]  ;;  %v1414_v36 = vadd.f32 %v2228_v17, %v1406_v47  ;;  %v1389_v42 = vpop.f32.mrf.mxu0  ;;  %v2238_v48 = vpop.f32.mrf.mxu1 }
 0x119   : > { %1276 = vst.msk [vmem:[#allocation2 + $0x30] sm:$0xff] %vm321_vm7, %v1268_v26  ;;  %v1266_v28 = vadd.f32 %v1258_v44, %v1239_v13  ;;  %v1404_v1 = vld [vmem:[#allocation2] sm:$0xff] }
 0x11a   : > { %1422 = vst.msk [vmem:[#allocation2 + $0x10] sm:$0xff] %vm321_vm7, %v1414_v36  ;;  %v1261_v10 = vld [vmem:[#allocation2 + $0x38] sm:$0xff]  ;;  %v1412_v49 = vadd.f32 %v1404_v1, %v1373_v15  ;;  %v1607_v50 = vpop.f32.mrf.mxu1  ;;  %v2233_v53 = vpop.f32.mrf.mxu0  ;;  %v2115_v26 = vld [vmem:[%s2958_s2] ss:$0 sm:$0xff] }
 0x11b   : > { %1274 = vst.msk [vmem:[#allocation2 + $0x20] sm:$0xff] %vm321_vm7, %v1266_v28  ;;  %v1269_v52 = vadd.f32 %v2223_v5, %v1261_v10  ;;  %v1407_v7 = vld [vmem:[#allocation2 + $0x18] sm:$0xff] }
 0x11c   : > { %1420 = vst.msk [vmem:[#allocation2] sm:$0xff] %vm321_vm7, %v1412_v49  ;;  %v1259_v55 = vld [vmem:[#allocation2 + $0x28] sm:$0xff]  ;;  %v1415_v57 = vadd.f32 %v2229_v32, %v1407_v7  ;;  %v2239_v46 = vpop.f32.mrf.mxu1  ;;  %v1392_v54 = vpop.f32.mrf.mxu0 }
 0x11d   : > { %1277 = vst.msk [vmem:[#allocation2 + $0x38] sm:$0xff] %vm321_vm7, %v1269_v52  ;;  %v1267_v38 = vadd.f32 %v1259_v55, %v1242_v37  ;;  %v1405_v8 = vld [vmem:[#allocation2 + $0x8] sm:$0xff] }
 0x11e   : > { %1423 = vst.msk [vmem:[#allocation2 + $0x18] sm:$0xff] %vm321_vm7, %v1415_v57  ;;  %v1413_v60 = vadd.f32 %v1405_v8, %v1376_v33  ;;  %v1610_v62 = vpop.f32.mrf.mxu1 }
 0x11f   : > { %1275 = vst.msk [vmem:[#allocation2 + $0x28] sm:$0xff] %vm321_vm7, %v1267_v38 }
 0x120   : > { %1421 = vst.msk [vmem:[#allocation2 + $0x8] sm:$0xff] %vm321_vm7, %v1413_v60  ;;  %v1410_v9 = vld [vmem:[#allocation2 + $0x30] sm:$0xff]  ;;  %v2242_v45 = vpop.f32.mrf.mxu1 }
 0x121   : > { %v1418_v2 = vadd.f32 %v2232_v30, %v1410_v9  ;;  %v1640_v23 = vld [vmem:[#allocation2 + $0x10] sm:$0xff]  ;;  %v2248_v56 = vpop.f32.mrf.mxu0 }
 0x122   : > { %v1408_v31 = vld [vmem:[#allocation2 + $0x20] sm:$0xff]  ;;  %v1648_v35 = vadd.f32 %v2238_v48, %v1640_v23  ;;  %v1623_v58 = vpop.f32.mrf.mxu1 }
 0x123   : > { %1426 = vst.msk [vmem:[#allocation2 + $0x30] sm:$0xff] %vm321_vm7, %v1418_v2  ;;  %v1416_v0 = vadd.f32 %v1408_v31, %v1389_v42  ;;  %v1638_v39 = vld [vmem:[#allocation2] sm:$0xff]  ;;  %v1769_v3 = vpop.f32.mrf.mxu0 }
 0x124   : > { %1656 = vst.msk [vmem:[#allocation2 + $0x10] sm:$0xff] %vm321_vm7, %v1648_v35  ;;  %v1411_v14 = vld [vmem:[#allocation2 + $0x38] sm:$0xff]  ;;  %v1646_v11 = vadd.f32 %v1638_v39, %v1607_v50  ;;  %v2243_v13 = vpop.f32.mrf.mxu1 }
 0x125   : > { %1424 = vst.msk [vmem:[#allocation2 + $0x20] sm:$0xff] %vm321_vm7, %v1416_v0  ;;  %v1419_v12 = vadd.f32 %v2233_v53, %v1411_v14  ;;  %v1641_v24 = vld [vmem:[#allocation2 + $0x18] sm:$0xff]  ;;  %v2249_v16 = vpop.f32.mrf.mxu0 }
 0x126   : > { %1654 = vst.msk [vmem:[#allocation2] sm:$0xff] %vm321_vm7, %v1646_v11  ;;  %v1409_v40 = vld [vmem:[#allocation2 + $0x28] sm:$0xff]  ;;  %v1649_v61 = vadd.f32 %v2239_v46, %v1641_v24  ;;  %v1626_v34 = vpop.f32.mrf.mxu1 }
 0x127   : > { %1427 = vst.msk [vmem:[#allocation2 + $0x38] sm:$0xff] %vm321_vm7, %v1419_v12  ;;  %v1417_v19 = vadd.f32 %v1409_v40, %v1392_v54  ;;  %v1639_v20 = vld [vmem:[#allocation2 + $0x8] sm:$0xff]  ;;  %v1772_v17 = vpop.f32.mrf.mxu0 }
 0x128   : > { %1657 = vst.msk [vmem:[#allocation2 + $0x18] sm:$0xff] %vm321_vm7, %v1649_v61  ;;  %v1647_v4 = vadd.f32 %v1639_v20, %v1610_v62 }
 0x129   : > { %1425 = vst.msk [vmem:[#allocation2 + $0x28] sm:$0xff] %vm321_vm7, %v1417_v19  ;;  %v2252_v63 = vpop.f32.mrf.mxu0 }
 0x12a   : > { %1655 = vst.msk [vmem:[#allocation2 + $0x8] sm:$0xff] %vm321_vm7, %v1647_v4  ;;  %v1644_v18 = vld [vmem:[#allocation2 + $0x30] sm:$0xff] }
 0x12b   : > { %v1652_v51 = vadd.f32 %v2242_v45, %v1644_v18  ;;  %v1802_v22 = vld [vmem:[#allocation2 + $0x10] sm:$0xff]  ;;  %v1785_v30 = vpop.f32.mrf.mxu0 }
 0x12c   : > { %v1642_v59 = vld [vmem:[#allocation2 + $0x20] sm:$0xff]  ;;  %v1810_v21 = vadd.f32 %v2248_v56, %v1802_v22 }
 0x12d   : > { %1660 = vst.msk [vmem:[#allocation2 + $0x30] sm:$0xff] %vm321_vm7, %v1652_v51  ;;  %v1650_v15 = vadd.f32 %v1642_v59, %v1623_v58  ;;  %v1800_v25 = vld [vmem:[#allocation2] sm:$0xff]  ;;  %v2253_v28 = vpop.f32.mrf.mxu0 }
 0x12e   : > { %1818 = vst.msk [vmem:[#allocation2 + $0x10] sm:$0xff] %vm321_vm7, %v1810_v21  ;;  %v1645_v6 = vld [vmem:[#allocation2 + $0x38] sm:$0xff]  ;;  %v1808_v29 = vadd.f32 %v1800_v25, %v1769_v3 }
 0x12f   : > { %1658 = vst.msk [vmem:[#allocation2 + $0x20] sm:$0xff] %vm321_vm7, %v1650_v15  ;;  %v1653_v5 = vadd.f32 %v2243_v13, %v1645_v6  ;;  %v1803_v32 = vld [vmem:[#allocation2 + $0x18] sm:$0xff]  ;;  %v1788_v46 = vpop.f32.mrf.mxu0 }
 0x130   : > { %1816 = vst.msk [vmem:[#allocation2] sm:$0xff] %vm321_vm7, %v1808_v29  ;;  %v1643_v43 = vld [vmem:[#allocation2 + $0x28] sm:$0xff]  ;;  %v1811_v27 = vadd.f32 %v2249_v16, %v1803_v32 }
 0x131   : > { %1661 = vst.msk [vmem:[#allocation2 + $0x38] sm:$0xff] %vm321_vm7, %v1653_v5  ;;  %v1651_v33 = vadd.f32 %v1643_v43, %v1626_v34  ;;  %v1801_v41 = vld [vmem:[#allocation2 + $0x8] sm:$0xff] }
 0x132   : > { %1819 = vst.msk [vmem:[#allocation2 + $0x18] sm:$0xff] %vm321_vm7, %v1811_v27  ;;  %v1809_v37 = vadd.f32 %v1801_v41, %v1772_v17 }
 0x133   : > { %1659 = vst.msk [vmem:[#allocation2 + $0x28] sm:$0xff] %vm321_vm7, %v1651_v33 }
 0x134   : > { %1817 = vst.msk [vmem:[#allocation2 + $0x8] sm:$0xff] %vm321_vm7, %v1809_v37  ;;  %v1806_v47 = vld [vmem:[#allocation2 + $0x30] sm:$0xff] }
 0x135   : > { %v1826_v44 = vld [vmem:[#allocation2 + $0x10] sm:$0xff]  ;;  %v1814_v36 = vadd.f32 %v2252_v63, %v1806_v47 }
 0x136   : > { %v1841_v42 = vadd.f32 %v2115_v26, %v1826_v44  ;;  %v1804_v48 = vld [vmem:[#allocation2 + $0x20] sm:$0xff] }
 0x137   : > { %v1824_v1 = vld [vmem:[#allocation2] sm:$0xff]  ;;  %1822 = vst.msk [vmem:[#allocation2 + $0x30] sm:$0xff] %vm321_vm7, %v1814_v36  ;;  %v1812_v10 = vadd.f32 %v1804_v48, %v1785_v30 }
 0x138   : > { %v1849_v49 = vmax.f32 %v1841_v42, 0.0  ;;  %v1839_v50 = vadd.f32 %v2115_v26, %v1824_v1  ;;  %v1807_v52 = vld [vmem:[#allocation2 + $0x38] sm:$0xff] }
 0x139   : > { %v1827_v7 = vld [vmem:[#allocation2 + $0x18] sm:$0xff]  ;;  %1820 = vst.msk [vmem:[#allocation2 + $0x20] sm:$0xff] %vm321_vm7, %v1812_v10  ;;  %v1815_v53 = vadd.f32 %v2253_v28, %v1807_v52 }
 0x13a   : > { %1857 = vst.msk [vmem:[%s2925_s20 + $0x10] sm:$0xff] %vm321_vm7, %v1849_v49  ;;  %v1847_v55 = vmax.f32 %v1839_v50, 0.0  ;;  %v1842_v57 = vadd.f32 %v2115_v26, %v1827_v7  ;;  %v1805_v38 = vld [vmem:[#allocation2 + $0x28] sm:$0xff] }
 0x13b   : > { %v1825_v8 = vld [vmem:[#allocation2 + $0x8] sm:$0xff]  ;;  %1823 = vst.msk [vmem:[#allocation2 + $0x38] sm:$0xff] %vm321_vm7, %v1815_v53  ;;  %v1813_v60 = vadd.f32 %v1805_v38, %v1788_v46 }
 0x13c   : > { %1855 = vst.msk [vmem:[%s2925_s20] sm:$0xff] %vm321_vm7, %v1847_v55  ;;  %v1850_v54 = vmax.f32 %v1842_v57, 0.0  ;;  %v1840_v9 = vadd.f32 %v2115_v26, %v1825_v8 }
 0x13d   : > { %1821 = vst.msk [vmem:[#allocation2 + $0x28] sm:$0xff] %vm321_vm7, %v1813_v60 }
 0x13e   : > { %1858 = vst.msk [vmem:[%s2925_s20 + $0x18] sm:$0xff] %vm321_vm7, %v1850_v54  ;;  %v1848_v62 = vmax.f32 %v1840_v9, 0.0  ;;  %v1830_v2 = vld [vmem:[#allocation2 + $0x30] sm:$0xff] }
 0x13f   : > { %v1845_v23 = vadd.f32 %v2115_v26, %v1830_v2 }
 0x140   : > { %1856 = vst.msk [vmem:[%s2925_s20 + $0x8] sm:$0xff] %vm321_vm7, %v1848_v62  ;;  %v1828_v56 = vld [vmem:[#allocation2 + $0x20] sm:$0xff] }
 0x141   : > { %v1853_v31 = vmax.f32 %v1845_v23, 0.0  ;;  %v1843_v35 = vadd.f32 %v2115_v26, %v1828_v56 }
 0x142   : > { %v1831_v0 = vld [vmem:[#allocation2 + $0x38] sm:$0xff] }
 0x143   : > { %1861 = vst.msk [vmem:[%s2925_s20 + $0x30] sm:$0xff] %vm321_vm7, %v1853_v31  ;;  %v1851_v39 = vmax.f32 %v1843_v35, 0.0  ;;  %v1846_v3 = vadd.f32 %v2115_v26, %v1831_v0 }
 0x144   : > { %v1829_v14 = vld [vmem:[#allocation2 + $0x28] sm:$0xff] }
 0x145   : > { %1859 = vst.msk [vmem:[%s2925_s20 + $0x20] sm:$0xff] %vm321_vm7, %v1851_v39  ;;  %v1854_v11 = vmax.f32 %v1846_v3, 0.0  ;;  %v1844_v45 = vadd.f32 %v2115_v26, %v1829_v14 }
 0x147   : > { %1862 = vst.msk [vmem:[%s2925_s20 + $0x38] sm:$0xff] %vm321_vm7, %v1854_v11  ;;  %v1852_v12 = vmax.f32 %v1844_v45, 0.0 }
 0x149   : > { %1860 = vst.msk [vmem:[%s2925_s20 + $0x28] sm:$0xff] %vm321_vm7, %v1852_v12 }
 0x14a PF: > { %s13_s14 = sadd.s32 1, %s2324_s14   ;;  %s2964_s12 = smov %s2320_s13 }
 0x14b   : > { %p10_p5 = scmp.ge.s32.totalorder %s13_s14, 4   ;;  %s2965_s13 = smov %s2967_s15 }
 0x14d   :  { %12 = sbr.rel (!%p10_p5) target bundleno = 2 (0x2), region = 73 }

// kernel: rtdetr_resnet_embeddings.7
= control target key start
LH: loop header
LB: loop body
LE: loop exit
PB: predicated region body
PF: predicated region fallthrough
CT: control target
= control target key end

     0   :  { %6 = vsyncpa [#allocation3], 0  ;;  %s679_s0 = inlined_call_operand.vmem [shape: f32[2,4,5,5,32], index: 0, kind: input, shape index: {}]   ;;  %s680_s1 = inlined_call_operand.hbm [shape: f32[2,4,4,32], index: 1, kind: output, shape index: {}]  }
   0x1   :  { %8 = vsyncpa [#allocation3 + $0x1], 0  ;;  %s531_s6 = smov 0   ;;  %s533_s7 = smov 0  }
   0x2   :  { %s535_s8 = smov 0   ;;  %s537_s9 = smov 0  }
   0x3   :  { %s539_s10 = smov 0   ;;  %s541_s11 = smov 0  }
   0x4 LB: > { %s349_s12 = sadd.s32 4294967295, %s516_s11   ;;  %s350_s13 = sadd.s32 4294967294, %s516_s11   ;;  %s516_s11 = sphi %s541_s11, %s14_s11   ;;  %s512_s10 = sphi %s539_s10, %s687_s10   ;;  %s508_s9 = sphi %s537_s9, %s686_s9   ;;  %s504_s8 = sphi %s535_s8, %s685_s8   ;;  %s500_s7 = sphi %s533_s7, %s684_s7   ;;  %s496_s6 = sphi %s531_s6, %s683_s6  }
   0x5   : > { %s26_s14 = sadd.s32 1, %s512_s10  ;;  %s61_s15 = sadd.s32 1, %s504_s8 }
   0x6   : > { %p28_p0 = scmp.ge.s32.totalorder %s26_s14, 2  ;;  %p71_p1 = scmp.ne.s32.totalorder %s504_s8, %s500_s7 }
   0x7   : > { %p72_p2 = scmp.eq.s32.totalorder %s349_s12, 1  ;;  %p77_p3 = scmp.ne.s32.totalorder %s500_s7, %s496_s6 }
   0x8   : > { %s689_s14 = smov (%p28_p0, %s26_s14), 0  ;;  %p78_p5 = scmp.eq.s32.totalorder %s350_s13, 1 }
   0x9   : > { %p571_p4 = por %p72_p2, %p71_p1  ;;  %s56_s17 = ssub.s32 %s512_s10, %s689_s14 }
   0xa   : > { %p353_p6 = scmp.ge.s32.totalorder %s516_s11, 1  ;;  %p59_p7 = scmp.eq.s32.totalorder %s56_s17, 0 }
   0xb   : > { %p578_p8 = por %p78_p5, %p77_p3  ;;  %p104_p9 = scmp.lt.s32.totalorder %s516_s11, 3 }
   0xc   : > { %s584_s19 = scalar_select %p59_p7, %s504_s8, %s61_s15  }
   0xd   : > { %p105_p10 = pnand %p353_p6, %p104_p9 }
   0xe   : > { %p124_p11 = scmp.lt.s32.totalorder (!%p105_p10), %s508_s9, 1  ;;  %s121_s25 = sand.u32 (!%p105_p10), 1, %s500_s7  }
   0xf   : > { %108 = sbr.rel (%p105_p10) target bundleno = 62 (0x3e), region = 24  ;;  %s354_s26 = sshll.u32 (!%p105_p10), %s121_s25, 4 }
  0x10   : > { %s123_s27 = scalar_lea.vmem (!%p105_p10), [#allocation2], %s354_s26  ;;  %s381_s29 = sshll.u32 (!%p105_p10), %s508_s9, 8 }
  0x11   : > { %s257_s28 = sshll.u32 (!%p105_p10), %s123_s27, 4  ;;  %s629_s3 = scalar_lea.hbm (!%p105_p10), %s680_s1, %s381_s29  ;;  %s623_s28 = int_to_ptr.vmem [resolvable:$true] %s257_s28 }
  0x12   : > { %s634_s4 = scalar_lea.sflag (!%p105_p10), [#allocation3], %s121_s25  ;;  %s440_s5 = scalar_lea.vmem (!%p105_p10), %s623_s28, 256 }
  0x13   : > { %p441_p12 = scmp.ne.s32.totalorder (!%p105_p10), %s623_s28, %s440_s5 }
  0x14   : > { %s125_s20 = scalar_select %p124_p11, %s508_s9, 1  ;;  %vm236_vm0 = vcmask 257024  }
  0x15   : > { %p442_p13 = pnand %p441_p12, %p571_p4  ;;  %s518_s9 = smov [#allocation2]  }
  0x16   : > { %s382_s21 = smul.u32 160, %s125_s20  ;;  %s444_s12 = sshll.u32 %s518_s9, 4  ;;  %s445_s12 = int_to_ptr.vmem [resolvable:$false] %s444_s12 }
  0x17   : > { %p443_p0 = pneg %p442_p13  ;;  %s446_s13 = scalar_lea.vmem %s445_s12, 512 }
  0x18   : > { %s591_s24 = scalar_lea.vmem %s679_s0, %s382_s21  ;;  %p447_p1 = scmp.lt.s32.totalorder %s623_s28, %s445_s12 }
  0x19   : > { %v133_v0 = vld [vmem:[%s591_s24] sm:$0x1f]  ;;  %v356_v1 = vld [vmem:[%s591_s24 + $0x28] sm:$0x1f]  ;;  %v360_v4 = vld [vmem:[%s591_s24 + $0x50] sm:$0x1f]  ;;  %p448_p2 = scmp.lt.s32.totalorder %s446_s13, %s440_s5 }
  0x1a   : > { %v143_v2 = vmax.f32 %v133_v0, %v356_v1  ;;  %v151_v3 = vrot.slane %v133_v0, 1  ;;  %v134_v5 = vld [vmem:[%s591_s24 + $0x8] sm:$0x1f]  ;;  %v357_v7 = vld [vmem:[%s591_s24 + $0x30] sm:$0x1f]  ;;  %v187_v12 = vrot.slane %v360_v4, 1 }
  0x1b   : > { %v152_v8 = vrot.slane %v134_v5, 1  ;;  %v364_v9 = vld [vmem:[%s591_s24 + $0x78] sm:$0x1f]  ;;  %v144_v10 = vmax.f32 %v134_v5, %v357_v7  ;;  %v135_v14 = vld [vmem:[%s591_s24 + $0x10] sm:$0x1f]  ;;  %p449_p3 = por %p448_p2, %p447_p1 }
  0x1c   : > { %v159_v6 = vmax.f32 %v143_v2, %v151_v3  ;;  %v361_v13 = vld [vmem:[%s591_s24 + $0x58] sm:$0x1f]  ;;  %v153_v17 = vrot.slane %v135_v14, 1  ;;  %v368_v19 = vld [vmem:[%s591_s24 + $0x8] sm:$0x1f] }
  0x1d   : > { %v160_v15 = vmax.f32 %v144_v10, %v152_v8  ;;  %v358_v16 = vld [vmem:[%s591_s24 + $0x38] sm:$0x1f]  ;;  %v365_v20 = vld [vmem:[%s591_s24 + $0x80] sm:$0x1f]  ;;  %v188_v23 = vrot.slane %v361_v13, 1  ;;  %v224_v35 = vrot.slane %v368_v19, 1  ;;  %p450_p5 = pnand %p449_p3, %p443_p0 }
  0x1e   : > { %v175_v11 = vmax.f32 %v159_v6, %v360_v4  ;;  %v145_v21 = vmax.f32 %v135_v14, %v358_v16  ;;  %v362_v24 = vld [vmem:[%s591_s24 + $0x60] sm:$0x1f]  ;;  %v136_v25 = vld [vmem:[%s591_s24 + $0x18] sm:$0x1f]  ;;  %v372_v30 = vld [vmem:[%s591_s24 + $0x30] sm:$0x1f] }
  0x1f   : > { %v176_v22 = vmax.f32 %v160_v15, %v361_v13  ;;  %v359_v28 = vld [vmem:[%s591_s24 + $0x40] sm:$0x1f]  ;;  %v154_v29 = vrot.slane %v136_v25, 1  ;;  %v366_v32 = vld [vmem:[%s591_s24 + $0x88] sm:$0x1f]  ;;  %v189_v38 = vrot.slane %v362_v24, 1 }
  0x20   : > { %v179_v18 = vmax.f32 %v175_v11, %v364_v9  ;;  %v161_v27 = vmax.f32 %v145_v21, %v153_v17  ;;  %v146_v33 = vmax.f32 %v136_v25, %v359_v28  ;;  %v369_v36 = vld [vmem:[%s591_s24 + $0x10] sm:$0x1f]  ;;  %v363_v39 = vld [vmem:[%s591_s24 + $0x68] sm:$0x1f]  ;;  %v373_v43 = vld [vmem:[%s591_s24 + $0x38] sm:$0x1f] }
  0x21   : > { %v180_v31 = vmax.f32 %v176_v22, %v365_v20  ;;  %v367_v45 = vld [vmem:[%s591_s24 + $0x90] sm:$0x1f]  ;;  %v225_v47 = vrot.slane %v369_v36, 1  ;;  %v370_v48 = vld [vmem:[%s591_s24 + $0x18] sm:$0x1f]  ;;  %v190_v50 = vrot.slane %v363_v39, 1 }
  0x22   : > { %v195_v26 = vmax.f32 %v179_v18, %v187_v12  ;;  %v177_v37 = vmax.f32 %v161_v27, %v362_v24  ;;  %v162_v41 = vmax.f32 %v146_v33, %v154_v29  ;;  %v374_v54 = vld [vmem:[%s591_s24 + $0x40] sm:$0x1f]  ;;  %v226_v57 = vrot.slane %v370_v48, 1  ;;  %v375_v62 = vld [vmem:[%s591_s24 + $0x48] sm:$0x1f] }
  0x23   : > { %v196_v40 = vmax.f32 %v180_v31, %v188_v23  ;;  %v371_v58 = vld [vmem:[%s591_s24 + $0x20] sm:$0x1f] }
  0x24   : > { %v212_v34 = vmax.f32 %v195_v26, %v368_v19  ;;  %v181_v44 = vmax.f32 %v177_v37, %v366_v32  ;;  %v178_v49 = vmax.f32 %v162_v41, %v363_v39  ;;  %v227_v0 = vrot.slane %v371_v58, 1 }
  0x25   : > { %v213_v46 = vmax.f32 %v196_v40, %v369_v36 }
  0x26   : > { %v216_v42 = vmax.f32 %v212_v34, %v372_v30  ;;  %v197_v52 = vmax.f32 %v181_v44, %v189_v38  ;;  %v182_v55 = vmax.f32 %v178_v49, %v367_v45 }
  0x27   : > { %v217_v53 = vmax.f32 %v213_v46, %v373_v43 }
  0x28   : > { %v232_v51 = vmax.f32 %v216_v42, %v224_v35  ;;  %v214_v56 = vmax.f32 %v197_v52, %v370_v48  ;;  %v198_v60 = vmax.f32 %v182_v55, %v190_v50 }
  0x29   : > { %v233_v59 = vmax.f32 %v217_v53, %v225_v47 }
  0x2a   : > { %237 = vst.msk [vmem:[%s123_s27] sm:$0xf] %vm236_vm0, %v232_v51  ;;  %v218_v61 = vmax.f32 %v214_v56, %v374_v54  ;;  %v215_v63 = vmax.f32 %v198_v60, %v371_v58 }
  0x2b   : > { %238 = vst.msk [vmem:[%s123_s27 + $0x4] sm:$0xf] %vm236_vm0, %v233_v59 }
  0x2c   : > { %v234_v1 = vmax.f32 %v218_v61, %v226_v57  ;;  %v219_v2 = vmax.f32 %v215_v63, %v375_v62 }
  0x2e   : > { %239 = vst.msk [vmem:[%s123_s27 + $0x8] sm:$0xf] %vm236_vm0, %v234_v1  ;;  %v235_v3 = vmax.f32 %v219_v2, %v227_v0 }
  0x30   : > { %240 = vst.msk [vmem:[%s123_s27 + $0xc] sm:$0xf] %vm236_vm0, %v235_v3 }
  0x31   : > { %453 = shalt.err (!%p450_p5)
}
  0x32   : > { %s454_s15 = scalar_lea.hbm %s629_s3, 256  ;;  %s458_s21 = scalar_lea.hbm %s680_s1, 512 }
  0x33   : > { %p455_p6 = scmp.ne.s32.totalorder %s629_s3, %s454_s15  ;;  %p459_p10 = scmp.lt.s32.totalorder %s629_s3, %s680_s1 }
  0x34   : > { %p460_p11 = scmp.lt.s32.totalorder %s458_s21, %s454_s15 }
  0x35   : > { %p456_p7 = pnand %p455_p6, %p571_p4 }
  0x36   : > { %p461_p12 = por %p460_p11, %p459_p10 }
  0x37   : > { %p457_p9 = pneg %p456_p7 }
  0x39   : > { %p462_p13 = pnand %p461_p12, %p457_p9 }
  0x3b   : > { %465 = shalt.err (!%p462_p13)
}
  0x3c   : > { %s519_s24 = smov 64   ;;  %s520_s25 = smov 4  }
  0x3d   : > { %383 = dma.vmem_to_hbm [thread:$0]  (%p571_p4), %s623_s28, 256, %s629_s3, %s634_s4, %s519_s24, %s519_s24, %s520_s25  }
  0x3e PF: > { %p389_p0 = scmp.ge.s32.totalorder %s516_s11, 2  ;;  %s272_s26 = sand.u32 1, %s496_s6  }
  0x3f   : > { %s273_s27 = scalar_lea.sflag [#allocation3], %s272_s26 }
  0x40   : > { %p386_p1 = pnand %p389_p0, %p578_p8 }
  0x42   : > { %p387_p2 = pneg %p386_p1 }
  0x44   : > { %491 = dma.done.wait (%p387_p2), %s273_s27, 256  }
  0x45   : > { %493 = vsyncadd (%p387_p2), %s273_s27, 4294967040  ;;  %s14_s11 = sadd.s32 1, %s516_s11   ;;  %s683_s6 = smov %s500_s7 }
  0x46   : > { %p11_p3 = scmp.ge.s32.totalorder %s14_s11, 4   ;;  %s684_s7 = smov %s504_s8 }
  0x47   : > { %s685_s8 = smov %s584_s19  ;;  %s686_s9 = smov %s512_s10 }
  0x48   : > { %s687_s10 = smov %s689_s14  ;;  %13 = sbr.rel (!%p11_p3) target bundleno = 4 (0x4), region = 65 }
  0x4d   :  { %278 = vsyncpa [#allocation3], 1 }
  0x4e   :  { %280 = vsyncpa [#allocation3 + $0x1], 1 }

</bundles_post_ra>
